<compile_context>
chip_gen: v7x
topology: tpu7x:2x2x1
jax: 0.10.0
libtpu: 0.0.40
codegen_flags: <defaults>
</compile_context>

<pallas_src>
import math
import functools

import jax
import jax.numpy as jnp
from jax.experimental import pallas as pl
from jax.experimental.pallas import tpu as pltpu


# ----------------------------------------------------------------------------
# In-kernel building blocks (token-major (rows, E) tiles, f32 math).
# ----------------------------------------------------------------------------

def _layernorm(x, g, b, eps=1e-5):
    # x: (R, E); g/b: (1, E).  Biased variance (matches nn.LayerNorm).
    mu = jnp.mean(x, axis=-1, keepdims=True)
    xc = x - mu
    var = jnp.mean(xc * xc, axis=-1, keepdims=True)
    return xc * jax.lax.rsqrt(var + eps) * g + b


def _mha(q, k, v, wo_ref, bo_ref, B, Sq, Sk, H, D, scale):
    """Multi-head attention fused with its output projection.

    q: (B*Sq, E) f32; k/v: (B*Sk, E) f32; wo_ref: (1, H, D, E) bf16 ref;
    bo_ref: (1, 1, E) f32 ref.  Returns (B*Sq, E) f32.

    Each head's context (B*Sq, D) is multiplied by its (D, E) slab of the output
    projection and accumulated in f32 — so head outputs are never concatenated
    along the lane dim and never stored into a scratch with masked stores.
    """
    E = H * D
    q3 = q.reshape(B, Sq, E).astype(jnp.bfloat16)
    k3 = k.reshape(B, Sk, E).astype(jnp.bfloat16)
    v3 = v.reshape(B, Sk, E).astype(jnp.bfloat16)
    out = None
    for h in range(H):                      # static, small head count; MXU work
        sl = slice(h * D, (h + 1) * D)      # identical to an all-heads batched push
        s = jnp.einsum('bqd,bkd->bqk', q3[:, :, sl], k3[:, :, sl],
                       preferred_element_type=jnp.float32) * scale
        s = s - jnp.max(s, axis=-1, keepdims=True)
        p = jnp.exp(s)
        p = p * pl.reciprocal(jnp.sum(p, axis=-1, keepdims=True), approx=False)
        ah = jnp.einsum('bqk,bkd->bqd', p.astype(jnp.bfloat16), v3[:, :, sl],
                        preferred_element_type=jnp.float32)          # (B,Sq,D) f32
        contrib = jnp.dot(ah.reshape(B * Sq, D).astype(jnp.bfloat16), wo_ref[0, h],
                          preferred_element_type=jnp.float32)        # (B*Sq, E)
        out = contrib if out is None else out + contrib
    return out + bo_ref[0]


def _proj(x_bf16, w_bf16, b_f32):
    return jnp.dot(x_bf16, w_bf16, preferred_element_type=jnp.float32) + b_f32


# ----------------------------------------------------------------------------
# Fused encoder kernels.  Grid = (batch_chunks, num_layers); layer axis is
# "arbitrary" (sequential), the activation lives in the x_acc VMEM scratch.
# ----------------------------------------------------------------------------

def _self_kernel(src_ref,
                 swqkv, sbqkv, swo, sbo,
                 fw1, fb1, fw2, fb2, lng, lnb,
                 out_ref, x_acc, *, num_heads):
    l = pl.program_id(1)
    Bc, S, E = src_ref.shape
    H = num_heads
    D = E // H
    BS = Bc * S
    scale = 1.0 / math.sqrt(D)

    @pl.when(l == 0)
    def _():
        x_acc[...] = src_ref[...].reshape(BS, E).astype(jnp.float32)

    x = x_acc[...]                              # (BS, E) f32 — this layer's input
    x_bf = x.astype(jnp.bfloat16)               # cast once, reused by Q/K/V dots
    gam = lng[0]                                # (3, E) rows: norm1, norm2, norm3
    bet = lnb[0]

    # --- self attention (separate Q/K/V matmuls, head-major fused out-proj) ---
    q = _proj(x_bf, swqkv[0, 0], sbqkv[0, 0])
    k = _proj(x_bf, swqkv[0, 1], sbqkv[0, 1])
    v = _proj(x_bf, swqkv[0, 2], sbqkv[0, 2])
    sa = _mha(q, k, v, swo, sbo, Bc, S, S, H, D, scale)
    x1 = _layernorm(x + sa, gam[0:1], bet[0:1])                   # norm1

    # --- FFN (bf16 hidden halves the largest live intermediate) ---
    x1_bf = x1.astype(jnp.bfloat16)
    h1 = jnp.maximum(_proj(x1_bf, fw1[0], fb1[0]), 0.0).astype(jnp.bfloat16)
    f = _proj(h1, fw2[0], fb2[0])
    x2 = _layernorm(x1 + f, gam[1:2], bet[1:2])                   # norm2

    x_acc[...] = x2

    @pl.when(l == pl.num_programs(1) - 1)
    def _():
        out_ref[...] = x2.reshape(Bc, S, E).astype(out_ref.dtype)


def _cross_kernel(src_ref, cross_ref,
                  swqkv, sbqkv, swo, sbo,
                  cwqkv, cbqkv, cwo, cbo,
                  fw1, fb1, fw2, fb2, lng, lnb,
                  out_ref, x_acc, *, num_heads):
    l = pl.program_id(1)
    Bc, S, E = src_ref.shape
    Sc = cross_ref.shape[1]
    H = num_heads
    D = E // H
    BS = Bc * S
    scale = 1.0 / math.sqrt(D)

    @pl.when(l == 0)
    def _():
        x_acc[...] = src_ref[...].reshape(BS, E).astype(jnp.float32)

    x = x_acc[...]                                        # src2 tokens (BS, E) f32
    x_bf = x.astype(jnp.bfloat16)
    ctok_bf = cross_ref[...].reshape(Bc * Sc, E).astype(jnp.bfloat16)
    gam = lng[0]
    bet = lnb[0]

    # --- self attention on the carried activation ---
    q = _proj(x_bf, swqkv[0, 0], sbqkv[0, 0])
    k = _proj(x_bf, swqkv[0, 1], sbqkv[0, 1])
    v = _proj(x_bf, swqkv[0, 2], sbqkv[0, 2])
    sa = _mha(q, k, v, swo, sbo, Bc, S, S, H, D, scale)
    x1 = _layernorm(x + sa, gam[0:1], bet[0:1])                   # norm1

    # --- cross attention: Q from x1, K/V from cross tokens ---
    x1_bf = x1.astype(jnp.bfloat16)
    qc = _proj(x1_bf, cwqkv[0, 0], cbqkv[0, 0])
    kc = _proj(ctok_bf, cwqkv[0, 1], cbqkv[0, 1])
    vc = _proj(ctok_bf, cwqkv[0, 2], cbqkv[0, 2])
    ca = _mha(qc, kc, vc, cwo, cbo, Bc, S, Sc, H, D, scale)
    o = _layernorm(x + ca, gam[1:2], bet[1:2])                    # norm2, residual from src2!

    # --- FFN ---
    o_bf = o.astype(jnp.bfloat16)
    h1 = jnp.maximum(_proj(o_bf, fw1[0], fb1[0]), 0.0).astype(jnp.bfloat16)
    f = _proj(h1, fw2[0], fb2[0])
    x2 = _layernorm(o + f, gam[2:3], bet[2:3])                    # norm3

    x_acc[...] = x2

    @pl.when(l == pl.num_programs(1) - 1)
    def _():
        out_ref[...] = x2.reshape(Bc, S, E).astype(out_ref.dtype)


# ----------------------------------------------------------------------------
# pallas_call wrappers.
# ----------------------------------------------------------------------------

_SELF_KEYS = ['swqkv', 'sbqkv', 'swo', 'sbo',
              'fw1', 'fb1', 'fw2', 'fb2', 'lng', 'lnb']
_CROSS_KEYS = ['swqkv', 'sbqkv', 'swo', 'sbo',
               'cwqkv', 'cbqkv', 'cwo', 'cbo',
               'fw1', 'fb1', 'fw2', 'fb2', 'lng', 'lnb']


def _weight_spec(arr):
    # Stacked weight (L, ...): stream one layer's slab per grid step (double
    # buffered by the Pallas pipeline, hidden behind the previous layer's math).
    nd = arr.ndim
    return pl.BlockSpec((1,) + arr.shape[1:],
                        lambda c, l, _n=nd - 1: (l,) + (0,) * _n)


def _vmem_limit_bytes(weights, activation_bytes, scratch_bytes, live_bytes):
    # Double-buffered per-layer weight slab + streamed activation blocks +
    # activation carry + largest live intermediates, with headroom, capped to
    # the chip's VMEM (query it when possible; fall back to v7x's 64 MiB).
    per_layer = sum(int(math.prod(w.shape[1:])) * w.dtype.itemsize for w in weights)
    est = 2 * per_layer + activation_bytes + scratch_bytes + live_bytes + (4 << 20)
    try:
        cap = int(pltpu.get_tpu_info().vmem_capacity_bytes)
    except Exception:
        cap = 64 << 20
    return int(min(max(est, 32 << 20), min(cap - (8 << 20), 100 << 20)))


def _cost_estimate(B, S, Sc, E, F, H, L, weights, batch_chunks, cross):
    proj = 2 * B * S * E * E
    fl = 4 * proj + 4 * B * S * S * E + 4 * B * S * E * F        # qkv+out, self attn, ffn
    tr = B * H * S * S
    if cross:
        fl += 2 * proj + 4 * B * Sc * E * E + 4 * B * S * Sc * E  # cross q/out, k/v, attn
        tr += B * H * S * Sc
    wbytes = sum(int(w.size) * w.dtype.itemsize for w in weights)   # already x L
    bytes_acc = batch_chunks * wbytes + 2 * B * S * E * 4 + (B * Sc * E * 4 if cross else 0)
    return pl.CostEstimate(flops=int(L * fl), transcendentals=int(L * tr),
                           bytes_accessed=int(bytes_acc))


def self_forward(src, params, num_heads, num_layers, batch_chunks=1):
    B, S, E = src.shape
    F = params['fw1'].shape[-1]
    assert B % batch_chunks == 0
    Bc = B // batch_chunks
    weights = [params[k] for k in _SELF_KEYS]
    in_specs = [pl.BlockSpec((Bc, S, E), lambda c, l: (c, 0, 0))] \
             + [_weight_spec(w) for w in weights]
    vmem_limit = _vmem_limit_bytes(
        weights,
        activation_bytes=2 * 2 * Bc * S * E * 4,
        scratch_bytes=Bc * S * E * 4,
        live_bytes=Bc * S * (4 * E + F) * 4)
    return pl.pallas_call(
        functools.partial(_self_kernel, num_heads=num_heads),
        grid=(batch_chunks, num_layers),
        in_specs=in_specs,
        out_specs=pl.BlockSpec((Bc, S, E), lambda c, l: (c, 0, 0)),
        out_shape=jax.ShapeDtypeStruct((B, S, E), src.dtype),
        scratch_shapes=[pltpu.VMEM((Bc * S, E), jnp.float32)],   # activation carry
        compiler_params=pltpu.CompilerParams(
            dimension_semantics=("parallel", "arbitrary"),
            vmem_limit_bytes=vmem_limit),
        cost_estimate=_cost_estimate(B, S, 0, E, F, num_heads, num_layers,
                                     weights, batch_chunks, cross=False),
    )(src, *weights)


def cross_forward(src, cross_src, params, num_heads, num_layers, batch_chunks=1):
    B, S, E = src.shape
    Sc = cross_src.shape[1]
    F = params['fw1'].shape[-1]
    assert B % batch_chunks == 0
    Bc = B // batch_chunks
    weights = [params[k] for k in _CROSS_KEYS]
    in_specs = [pl.BlockSpec((Bc, S, E), lambda c, l: (c, 0, 0)),
                pl.BlockSpec((Bc, Sc, E), lambda c, l: (c, 0, 0))] \
             + [_weight_spec(w) for w in weights]
    vmem_limit = _vmem_limit_bytes(
        weights,
        activation_bytes=2 * 2 * (Bc * S * E + Bc * Sc * E) * 4,
        scratch_bytes=Bc * S * E * 4,
        live_bytes=(Bc * S * (4 * E + F) + Bc * Sc * 3 * E) * 4)
    return pl.pallas_call(
        functools.partial(_cross_kernel, num_heads=num_heads),
        grid=(batch_chunks, num_layers),
        in_specs=in_specs,
        out_specs=pl.BlockSpec((Bc, S, E), lambda c, l: (c, 0, 0)),
        out_shape=jax.ShapeDtypeStruct((B, S, E), src.dtype),
        scratch_shapes=[pltpu.VMEM((Bc * S, E), jnp.float32)],
        compiler_params=pltpu.CompilerParams(
            dimension_semantics=("parallel", "arbitrary"),
            vmem_limit_bytes=vmem_limit),
        cost_estimate=_cost_estimate(B, S, Sc, E, F, num_heads, num_layers,
                                     weights, batch_chunks, cross=True),
    )(src, cross_src, *weights)


# ----------------------------------------------------------------------------
# Parameters (deterministic, synthetic).  Matmul weights live pre-transposed
# (right-multiply) and stored bf16; Q/K/V stacked on a leading (3,...) axis so
# the kernel never slices the lane dim; output projections head-major
# (H, D, E); biases / layernorm params f32; all stacked on a layer axis.
# ----------------------------------------------------------------------------

def _init_layer(key, E, F, H):
    D = E // H
    ks = jax.random.split(key, 12)
    it = iter(ks)

    def w(shape, fan_in):
        return jax.random.normal(next(it), shape, jnp.float32) / math.sqrt(fan_in)

    def b(shape):
        return 0.02 * jax.random.normal(next(it), shape, jnp.float32)

    return {
        'swqkv': w((3, E, E), E), 'sbqkv': b((3, 1, E)),
        'swo': w((E, E), E).reshape(H, D, E), 'sbo': b((1, E)),
        'cwqkv': w((3, E, E), E), 'cbqkv': b((3, 1, E)),
        'cwo': w((E, E), E).reshape(H, D, E), 'cbo': b((1, E)),
        'fw1': w((E, F), E), 'fb1': b((1, F)),
        'fw2': w((F, E), F), 'fb2': b((1, E)),
        'lng': jnp.ones((3, E), jnp.float32),   # rows: norm1, norm2, norm3
        'lnb': jnp.zeros((3, E), jnp.float32),
    }


_BF16_KEYS = ('swqkv', 'swo', 'cwqkv', 'cwo', 'fw1', 'fw2')


def init_stacked_params(key, E, F, L, H):
    per = [_init_layer(k, E, F, H) for k in jax.random.split(key, L)]
    out = {}
    for name in per[0]:
        dt = jnp.bfloat16 if name in _BF16_KEYS else jnp.float32
        out[name] = jnp.stack([p[name] for p in per], axis=0).astype(dt)
    return out


class PallasTransformerEncoder:
    def __init__(self, embed_dim, num_heads, ff_dim, num_layers, key):
        assert embed_dim % num_heads == 0
        self.num_heads = num_heads
        self.num_layers = num_layers
        self.params = init_stacked_params(key, embed_dim, ff_dim, num_layers, num_heads)

    def __call__(self, src, cross_src, mask=None, cross_mask=None, *,
                 same=None, batch_chunks=1):
        assert mask is None and cross_mask is None  # TODO(synk): masks unsupported
        if same is None:
            # Structural dispatch first (no device sync); only fall back to a
            # value compare (torch.equal parity) when it cannot be avoided.
            if src is cross_src:
                same = True
            elif src.shape != cross_src.shape:
                same = False
            else:
                same = bool(jnp.array_equal(src, cross_src))
        if same:
            return self_forward(src, self.params, self.num_heads,
                                self.num_layers, batch_chunks)
        return cross_forward(src, cross_src, self.params, self.num_heads,
                             self.num_layers, batch_chunks)


# ----------------------------------------------------------------------------
# Pure-JAX reference with identical bf16/f32 mixed-precision choices.
# ----------------------------------------------------------------------------

def _ref_layernorm(x, g, b, eps=1e-5):
    mu = jnp.mean(x, axis=-1, keepdims=True)
    var = jnp.mean((x - mu) ** 2, axis=-1, keepdims=True)
    return (x - mu) * jax.lax.rsqrt(var + eps) * g + b


def _ref_project(x, w_bf16, b_f32):
    return jnp.dot(x.astype(jnp.bfloat16), w_bf16,
                   preferred_element_type=jnp.float32) + b_f32


def _ref_attention(q, k, v, H):
    B, Sq, E = q.shape
    Sk = k.shape[1]
    D = E // H
    q4 = q.reshape(B, Sq, H, D).astype(jnp.bfloat16)
    k4 = k.reshape(B, Sk, H, D).astype(jnp.bfloat16)
    v4 = v.reshape(B, Sk, H, D).astype(jnp.bfloat16)
    s = jnp.einsum('bqhd,bkhd->bhqk', q4, k4,
                   preferred_element_type=jnp.float32) * (1.0 / math.sqrt(D))
    s = s - jnp.max(s, axis=-1, keepdims=True)
    p = jnp.exp(s)
    p = p / jnp.sum(p, axis=-1, keepdims=True)
    o = jnp.einsum('bhqk,bkhd->bqhd', p.astype(jnp.bfloat16), v4,
                   preferred_element_type=jnp.float32)
    return o.reshape(B, Sq, E)


def _ref_self_layer(x, p, H):
    E = x.shape[-1]
    q = _ref_project(x, p['swqkv'][0], p['sbqkv'][0])
    k = _ref_project(x, p['swqkv'][1], p['sbqkv'][1])
    v = _ref_project(x, p['swqkv'][2], p['sbqkv'][2])
    sa = _ref_project(_ref_attention(q, k, v, H), p['swo'].reshape(E, E), p['sbo'])
    x1 = _ref_layernorm(x + sa, p['lng'][0:1], p['lnb'][0:1])
    h1 = jnp.maximum(_ref_project(x1, p['fw1'], p['fb1']), 0.0)
    f = _ref_project(h1, p['fw2'], p['fb2'])
    return _ref_layernorm(x1 + f, p['lng'][1:2], p['lnb'][1:2])


def _ref_cross_layer(x, c, p, H):
    E = x.shape[-1]
    q = _ref_project(x, p['swqkv'][0], p['sbqkv'][0])
    k = _ref_project(x, p['swqkv'][1], p['sbqkv'][1])
    v = _ref_project(x, p['swqkv'][2], p['sbqkv'][2])
    sa = _ref_project(_ref_attention(q, k, v, H), p['swo'].reshape(E, E), p['sbo'])
    x1 = _ref_layernorm(x + sa, p['lng'][0:1], p['lnb'][0:1])
    qc = _ref_project(x1, p['cwqkv'][0], p['cbqkv'][0])
    kc = _ref_project(c, p['cwqkv'][1], p['cbqkv'][1])
    vc = _ref_project(c, p['cwqkv'][2], p['cbqkv'][2])
    ca = _ref_project(_ref_attention(qc, kc, vc, H), p['cwo'].reshape(E, E), p['cbo'])
    o = _ref_layernorm(x + ca, p['lng'][1:2], p['lnb'][1:2])
    h1 = jnp.maximum(_ref_project(o, p['fw1'], p['fb1']), 0.0)
    f = _ref_project(h1, p['fw2'], p['fb2'])
    return _ref_layernorm(o + f, p['lng'][2:3], p['lnb'][2:3])


def _ref_encoder(params, num_heads, num_layers, src, cross_src, same):
    x = src
    for l in range(num_layers):
        p = {k: v[l] for k, v in params.items()}
        if same:
            x = _ref_self_layer(x, p, num_heads)
        else:
            x = _ref_cross_layer(x, cross_src, p, num_heads)
    return x


# ----------------------------------------------------------------------------
if __name__ == "__main__":
    B, S, Sc, E, H, F, L = 2, 8, 12, 32, 4, 64, 2

    key = jax.random.PRNGKey(0)
    k_model, k_src, k_cross = jax.random.split(key, 3)

    model = PallasTransformerEncoder(E, H, F, L, k_model)

    src = jax.random.normal(k_src, (B, S, E), jnp.float32)
    cross_src = jax.random.normal(k_cross, (B, Sc, E), jnp.float32)

    tol = 2e-3

    # Cross-attention path (shapes differ -> structural dispatch, no sync).
    out_cross = jax.block_until_ready(model(src, cross_src))
    ref_cross = _ref_encoder(model.params, H, L, src, cross_src, same=False)
    assert out_cross.shape == (B, S, E)
    err = float(jnp.max(jnp.abs(out_cross - ref_cross)))
    assert err < tol, err

    # Cross path split into 2 batch chunks (leading "parallel" grid axis for
    # v7x dual TensorCores; keep batch_chunks=1 on single-core v5e/v6e).
    out_cross2 = jax.block_until_ready(model(src, cross_src, batch_chunks=2))
    err2 = float(jnp.max(jnp.abs(out_cross2 - ref_cross)))
    assert err2 < tol, err2

    # Self-attention-only path (same object -> identity dispatch, no sync).
    out_self = jax.block_until_ready(model(src, src))
    ref_self = _ref_encoder(model.params, H, L, src, src, same=True)
    assert out_self.shape == (B, S, E)
    err3 = float(jnp.max(jnp.abs(out_self - ref_self)))
    assert err3 < tol, err3

    print("KERNEL_OK")
</pallas_src>

<mosaic_0001>
module attributes {stable_mosaic.version = 11 : i64} {
  func.func @_cross_kernel(%arg0: i32, %arg1: i32, %arg2: memref<2x8x32xf32, #tpu.memory_space<vmem>>, %arg3: memref<2x12x32xf32, #tpu.memory_space<vmem>>, %arg4: memref<1x3x32x32xbf16, #tpu.memory_space<vmem>>, %arg5: memref<1x3x1x32xf32, #tpu.memory_space<vmem>>, %arg6: memref<1x4x8x32xbf16, #tpu.memory_space<vmem>>, %arg7: memref<1x1x32xf32, #tpu.memory_space<vmem>>, %arg8: memref<1x3x32x32xbf16, #tpu.memory_space<vmem>>, %arg9: memref<1x3x1x32xf32, #tpu.memory_space<vmem>>, %arg10: memref<1x4x8x32xbf16, #tpu.memory_space<vmem>>, %arg11: memref<1x1x32xf32, #tpu.memory_space<vmem>>, %arg12: memref<1x32x64xbf16, #tpu.memory_space<vmem>>, %arg13: memref<1x1x64xf32, #tpu.memory_space<vmem>>, %arg14: memref<1x64x32xbf16, #tpu.memory_space<vmem>>, %arg15: memref<1x1x32xf32, #tpu.memory_space<vmem>>, %arg16: memref<1x3x32xf32, #tpu.memory_space<vmem>>, %arg17: memref<1x3x32xf32, #tpu.memory_space<vmem>>, %arg18: memref<2x8x32xf32, #tpu.memory_space<vmem>>, %arg19: memref<16x32xf32, #tpu.memory_space<vmem>>) attributes {dimension_semantics = [#tpu.dimension_semantics<parallel>, #tpu.dimension_semantics<arbitrary>], iteration_bounds = array<i64: 1, 2>, scalar_prefetch = 0 : i64, scratch_operands = 1 : i64, tpu.core_type = #tpu.core_type<tc>, window_params = [{transform_indices = @transform_0, window_bounds = array<i64: 2, 8, 32>}, {transform_indices = @transform_1, window_bounds = array<i64: 2, 12, 32>}, {transform_indices = @transform_2, window_bounds = array<i64: 1, 3, 32, 32>}, {transform_indices = @transform_3, window_bounds = array<i64: 1, 3, 1, 32>}, {transform_indices = @transform_4, window_bounds = array<i64: 1, 4, 8, 32>}, {transform_indices = @transform_5, window_bounds = array<i64: 1, 1, 32>}, {transform_indices = @transform_6, window_bounds = array<i64: 1, 3, 32, 32>}, {transform_indices = @transform_7, window_bounds = array<i64: 1, 3, 1, 32>}, {transform_indices = @transform_8, window_bounds = array<i64: 1, 4, 8, 32>}, {transform_indices = @transform_9, window_bounds = array<i64: 1, 1, 32>}, {transform_indices = @transform_10, window_bounds = array<i64: 1, 32, 64>}, {transform_indices = @transform_11, window_bounds = array<i64: 1, 1, 64>}, {transform_indices = @transform_12, window_bounds = array<i64: 1, 64, 32>}, {transform_indices = @transform_13, window_bounds = array<i64: 1, 1, 32>}, {transform_indices = @transform_14, window_bounds = array<i64: 1, 3, 32>}, {transform_indices = @transform_15, window_bounds = array<i64: 1, 3, 32>}, {transform_indices = @transform_16, window_bounds = array<i64: 2, 8, 32>}]} {
    %c0_i32 = arith.constant 0 : i32
    %0 = arith.cmpi eq, %arg1, %c0_i32 : i32
    %1 = arith.extui %0 : i1 to i32
    %c0_i32_0 = arith.constant 0 : i32
    %2 = arith.cmpi ne, %1, %c0_i32_0 : i32
    scf.if %2 {
      %c0_180 = arith.constant 0 : index
      %c0_181 = arith.constant 0 : index
      %c0_182 = arith.constant 0 : index
      %356 = vector.load %arg2[%c0_180, %c0_181, %c0_182] : memref<2x8x32xf32, #tpu.memory_space<vmem>>, vector<2x8x32xf32>
      %357 = vector.shape_cast %356 : vector<2x8x32xf32> to vector<16x32xf32>
      %c0_183 = arith.constant 0 : index
      %c0_184 = arith.constant 0 : index
      %358 = vector.load %arg19[%c0_183, %c0_184] : memref<16x32xf32, #tpu.memory_space<vmem>>, vector<16x32xf32>
      tpu.vector_store %arg19[%c0_183, %c0_184], %357 {strides = array<i32>} : memref<16x32xf32, #tpu.memory_space<vmem>>, vector<16x32xf32>,
    } else {
    }
    %c0 = arith.constant 0 : index
    %c0_1 = arith.constant 0 : index
    %3 = vector.load %arg19[%c0, %c0_1] : memref<16x32xf32, #tpu.memory_space<vmem>>, vector<16x32xf32>
    %4 = arith.truncf %3 : vector<16x32xf32> to vector<16x32xbf16>
    %c0_2 = arith.constant 0 : index
    %c0_3 = arith.constant 0 : index
    %c0_4 = arith.constant 0 : index
    %5 = vector.load %arg3[%c0_2, %c0_3, %c0_4] : memref<2x12x32xf32, #tpu.memory_space<vmem>>, vector<2x12x32xf32>
    %6 = vector.shape_cast %5 : vector<2x12x32xf32> to vector<24x32xf32>
    %7 = arith.truncf %6 : vector<24x32xf32> to vector<24x32xbf16>
    %c0_5 = arith.constant 0 : index
    %c0_6 = arith.constant 0 : index
    %c0_7 = arith.constant 0 : index
    %8 = vector.load %arg16[%c0_5, %c0_6, %c0_7] : memref<1x3x32xf32, #tpu.memory_space<vmem>>, vector<1x3x32xf32>
    %9 = vector.shape_cast %8 : vector<1x3x32xf32> to vector<3x32xf32>
    %c0_8 = arith.constant 0 : index
    %c0_9 = arith.constant 0 : index
    %c0_10 = arith.constant 0 : index
    %10 = vector.load %arg17[%c0_8, %c0_9, %c0_10] : memref<1x3x32xf32, #tpu.memory_space<vmem>>, vector<1x3x32xf32>
    %11 = vector.shape_cast %10 : vector<1x3x32xf32> to vector<3x32xf32>
    %c0_11 = arith.constant 0 : index
    %c0_12 = arith.constant 0 : index
    %c0_13 = arith.constant 0 : index
    %c0_14 = arith.constant 0 : index
    %12 = vector.load %arg4[%c0_11, %c0_12, %c0_13, %c0_14] : memref<1x3x32x32xbf16, #tpu.memory_space<vmem>>, vector<1x1x32x32xbf16>
    %13 = vector.shape_cast %12 : vector<1x1x32x32xbf16> to vector<32x32xbf16>
    %c0_15 = arith.constant 0 : index
    %c0_16 = arith.constant 0 : index
    %c0_17 = arith.constant 0 : index
    %c0_18 = arith.constant 0 : index
    %14 = vector.load %arg5[%c0_15, %c0_16, %c0_17, %c0_18] : memref<1x3x1x32xf32, #tpu.memory_space<vmem>>, vector<1x1x1x32xf32>
    %15 = vector.shape_cast %14 : vector<1x1x1x32xf32> to vector<1x32xf32>
    %cst = arith.constant dense<0.000000e+00> : vector<16x32xf32>
    %16 = tpu.matmul %4, %13, %cst {dimension_numbers = #tpu.dot_dimension_numbers<[1], [0], [0], [1], [0, 0, 1, 1], [], []>} : vector<16x32xbf16>, vector<32x32xbf16>, vector<16x32xf32> -> vector<16x32xf32>
    %17 = vector.broadcast %15 : vector<1x32xf32> to vector<16x32xf32>
    %18 = arith.addf %16, %17 : vector<16x32xf32>
    %c0_19 = arith.constant 0 : index
    %c1 = arith.constant 1 : index
    %c0_20 = arith.constant 0 : index
    %c0_21 = arith.constant 0 : index
    %19 = vector.load %arg4[%c0_19, %c1, %c0_20, %c0_21] : memref<1x3x32x32xbf16, #tpu.memory_space<vmem>>, vector<1x1x32x32xbf16>
    %20 = vector.shape_cast %19 : vector<1x1x32x32xbf16> to vector<32x32xbf16>
    %c0_22 = arith.constant 0 : index
    %c1_23 = arith.constant 1 : index
    %c0_24 = arith.constant 0 : index
    %c0_25 = arith.constant 0 : index
    %21 = vector.load %arg5[%c0_22, %c1_23, %c0_24, %c0_25] : memref<1x3x1x32xf32, #tpu.memory_space<vmem>>, vector<1x1x1x32xf32>
    %22 = vector.shape_cast %21 : vector<1x1x1x32xf32> to vector<1x32xf32>
    %cst_26 = arith.constant dense<0.000000e+00> : vector<16x32xf32>
    %23 = tpu.matmul %4, %20, %cst_26 {dimension_numbers = #tpu.dot_dimension_numbers<[1], [0], [0], [1], [0, 0, 1, 1], [], []>} : vector<16x32xbf16>, vector<32x32xbf16>, vector<16x32xf32> -> vector<16x32xf32>
    %24 = vector.broadcast %22 : vector<1x32xf32> to vector<16x32xf32>
    %25 = arith.addf %23, %24 : vector<16x32xf32>
    %c0_27 = arith.constant 0 : index
    %c2 = arith.constant 2 : index
    %c0_28 = arith.constant 0 : index
    %c0_29 = arith.constant 0 : index
    %26 = vector.load %arg4[%c0_27, %c2, %c0_28, %c0_29] : memref<1x3x32x32xbf16, #tpu.memory_space<vmem>>, vector<1x1x32x32xbf16>
    %27 = vector.shape_cast %26 : vector<1x1x32x32xbf16> to vector<32x32xbf16>
    %c0_30 = arith.constant 0 : index
    %c2_31 = arith.constant 2 : index
    %c0_32 = arith.constant 0 : index
    %c0_33 = arith.constant 0 : index
    %28 = vector.load %arg5[%c0_30, %c2_31, %c0_32, %c0_33] : memref<1x3x1x32xf32, #tpu.memory_space<vmem>>, vector<1x1x1x32xf32>
    %29 = vector.shape_cast %28 : vector<1x1x1x32xf32> to vector<1x32xf32>
    %cst_34 = arith.constant dense<0.000000e+00> : vector<16x32xf32>
    %30 = tpu.matmul %4, %27, %cst_34 {dimension_numbers = #tpu.dot_dimension_numbers<[1], [0], [0], [1], [0, 0, 1, 1], [], []>} : vector<16x32xbf16>, vector<32x32xbf16>, vector<16x32xf32> -> vector<16x32xf32>
    %31 = vector.broadcast %29 : vector<1x32xf32> to vector<16x32xf32>
    %32 = arith.addf %30, %31 : vector<16x32xf32>
    %33 = vector.shape_cast %18 : vector<16x32xf32> to vector<2x8x32xf32>
    %34 = arith.truncf %33 : vector<2x8x32xf32> to vector<2x8x32xbf16>
    %35 = vector.shape_cast %25 : vector<16x32xf32> to vector<2x8x32xf32>
    %36 = arith.truncf %35 : vector<2x8x32xf32> to vector<2x8x32xbf16>
    %37 = vector.shape_cast %32 : vector<16x32xf32> to vector<2x8x32xf32>
    %38 = arith.truncf %37 : vector<2x8x32xf32> to vector<2x8x32xbf16>
    %39 = vector.extract_strided_slice %34 {offsets = [0, 0, 0], sizes = [2, 8, 8], strides = [1, 1, 1]} : vector<2x8x32xbf16> to vector<2x8x8xbf16>
    %40 = vector.extract_strided_slice %36 {offsets = [0, 0, 0], sizes = [2, 8, 8], strides = [1, 1, 1]} : vector<2x8x32xbf16> to vector<2x8x8xbf16>
    "tpu.trace_start"() <{level = 10 : i32, message = "bqd,bkd->bqk"}> : () -> ()
    %cst_35 = arith.constant dense<0.000000e+00> : vector<2x8x8xf32>
    %41 = tpu.matmul %39, %40, %cst_35 {dimension_numbers = #tpu.dot_dimension_numbers<[2], [2], [1], [1], [0, 0, 0, 1, 1, 1], [0], [0]>} : vector<2x8x8xbf16>, vector<2x8x8xbf16>, vector<2x8x8xf32> -> vector<2x8x8xf32>
    "tpu.trace_stop"() : () -> ()
    %cst_36 = arith.constant 0.353553385 : f32
    %42 = vector.broadcast %cst_36 : f32 to vector<2x8x8xf32>
    %43 = arith.mulf %41, %42 : vector<2x8x8xf32>
    %cst_37 = arith.constant dense<0xFF800000> : vector<2x8xf32>
    %44 = vector.multi_reduction <maximumf>, %43, %cst_37 [2] : vector<2x8x8xf32> to vector<2x8xf32>
    %45 = vector.shape_cast %44 : vector<2x8xf32> to vector<2x8x1xf32>
    %46 = vector.broadcast %45 : vector<2x8x1xf32> to vector<2x8x8xf32>
    %47 = arith.subf %43, %46 : vector<2x8x8xf32>
    %48 = math.exp %47 : vector<2x8x8xf32>
    %cst_38 = arith.constant dense<0.000000e+00> : vector<2x8xf32>
    %49 = vector.multi_reduction <add>, %48, %cst_38 [2] : vector<2x8x8xf32> to vector<2x8xf32>
    %50 = vector.shape_cast %49 : vector<2x8xf32> to vector<2x8x1xf32>
    %51 = tpu.reciprocal %50 : vector<2x8x1xf32> -> vector<2x8x1xf32>
    %52 = vector.broadcast %51 : vector<2x8x1xf32> to vector<2x8x8xf32>
    %53 = arith.mulf %48, %52 : vector<2x8x8xf32>
    %54 = arith.truncf %53 : vector<2x8x8xf32> to vector<2x8x8xbf16>
    %55 = vector.extract_strided_slice %38 {offsets = [0, 0, 0], sizes = [2, 8, 8], strides = [1, 1, 1]} : vector<2x8x32xbf16> to vector<2x8x8xbf16>
    "tpu.trace_start"() <{level = 10 : i32, message = "bqk,bkd->bqd"}> : () -> ()
    %cst_39 = arith.constant dense<0.000000e+00> : vector<2x8x8xf32>
    %56 = tpu.matmul %54, %55, %cst_39 {dimension_numbers = #tpu.dot_dimension_numbers<[2], [1], [1], [2], [0, 0, 0, 1, 1, 2], [0], [0]>} : vector<2x8x8xbf16>, vector<2x8x8xbf16>, vector<2x8x8xf32> -> vector<2x8x8xf32>
    "tpu.trace_stop"() : () -> ()
    %57 = vector.shape_cast %56 : vector<2x8x8xf32> to vector<16x8xf32>
    %58 = arith.truncf %57 : vector<16x8xf32> to vector<16x8xbf16>
    %c0_40 = arith.constant 0 : index
    %c0_41 = arith.constant 0 : index
    %c0_42 = arith.constant 0 : index
    %c0_43 = arith.constant 0 : index
    %59 = vector.load %arg6[%c0_40, %c0_41, %c0_42, %c0_43] : memref<1x4x8x32xbf16, #tpu.memory_space<vmem>>, vector<1x1x8x32xbf16>
    %60 = vector.shape_cast %59 : vector<1x1x8x32xbf16> to vector<8x32xbf16>
    %cst_44 = arith.constant dense<0.000000e+00> : vector<16x32xf32>
    %61 = tpu.matmul %58, %60, %cst_44 {dimension_numbers = #tpu.dot_dimension_numbers<[1], [0], [0], [1], [0, 0, 1, 1], [], []>} : vector<16x8xbf16>, vector<8x32xbf16>, vector<16x32xf32> -> vector<16x32xf32>
    %62 = vector.extract_strided_slice %34 {offsets = [0, 0, 8], sizes = [2, 8, 8], strides = [1, 1, 1]} : vector<2x8x32xbf16> to vector<2x8x8xbf16>
    %63 = vector.extract_strided_slice %36 {offsets = [0, 0, 8], sizes = [2, 8, 8], strides = [1, 1, 1]} : vector<2x8x32xbf16> to vector<2x8x8xbf16>
    "tpu.trace_start"() <{level = 10 : i32, message = "bqd,bkd->bqk"}> : () -> ()
    %cst_45 = arith.constant dense<0.000000e+00> : vector<2x8x8xf32>
    %64 = tpu.matmul %62, %63, %cst_45 {dimension_numbers = #tpu.dot_dimension_numbers<[2], [2], [1], [1], [0, 0, 0, 1, 1, 1], [0], [0]>} : vector<2x8x8xbf16>, vector<2x8x8xbf16>, vector<2x8x8xf32> -> vector<2x8x8xf32>
    "tpu.trace_stop"() : () -> ()
    %cst_46 = arith.constant 0.353553385 : f32
    %65 = vector.broadcast %cst_46 : f32 to vector<2x8x8xf32>
    %66 = arith.mulf %64, %65 : vector<2x8x8xf32>
    %cst_47 = arith.constant dense<0xFF800000> : vector<2x8xf32>
    %67 = vector.multi_reduction <maximumf>, %66, %cst_47 [2] : vector<2x8x8xf32> to vector<2x8xf32>
    %68 = vector.shape_cast %67 : vector<2x8xf32> to vector<2x8x1xf32>
    %69 = vector.broadcast %68 : vector<2x8x1xf32> to vector<2x8x8xf32>
    %70 = arith.subf %66, %69 : vector<2x8x8xf32>
    %71 = math.exp %70 : vector<2x8x8xf32>
    %cst_48 = arith.constant dense<0.000000e+00> : vector<2x8xf32>
    %72 = vector.multi_reduction <add>, %71, %cst_48 [2] : vector<2x8x8xf32> to vector<2x8xf32>
    %73 = vector.shape_cast %72 : vector<2x8xf32> to vector<2x8x1xf32>
    %74 = tpu.reciprocal %73 : vector<2x8x1xf32> -> vector<2x8x1xf32>
    %75 = vector.broadcast %74 : vector<2x8x1xf32> to vector<2x8x8xf32>
    %76 = arith.mulf %71, %75 : vector<2x8x8xf32>
    %77 = arith.truncf %76 : vector<2x8x8xf32> to vector<2x8x8xbf16>
    %78 = vector.extract_strided_slice %38 {offsets = [0, 0, 8], sizes = [2, 8, 8], strides = [1, 1, 1]} : vector<2x8x32xbf16> to vector<2x8x8xbf16>
    "tpu.trace_start"() <{level = 10 : i32, message = "bqk,bkd->bqd"}> : () -> ()
    %cst_49 = arith.constant dense<0.000000e+00> : vector<2x8x8xf32>
    %79 = tpu.matmul %77, %78, %cst_49 {dimension_numbers = #tpu.dot_dimension_numbers<[2], [1], [1], [2], [0, 0, 0, 1, 1, 2], [0], [0]>} : vector<2x8x8xbf16>, vector<2x8x8xbf16>, vector<2x8x8xf32> -> vector<2x8x8xf32>
    "tpu.trace_stop"() : () -> ()
    %80 = vector.shape_cast %79 : vector<2x8x8xf32> to vector<16x8xf32>
    %81 = arith.truncf %80 : vector<16x8xf32> to vector<16x8xbf16>
    %c0_50 = arith.constant 0 : index
    %c1_51 = arith.constant 1 : index
    %c0_52 = arith.constant 0 : index
    %c0_53 = arith.constant 0 : index
    %82 = vector.load %arg6[%c0_50, %c1_51, %c0_52, %c0_53] : memref<1x4x8x32xbf16, #tpu.memory_space<vmem>>, vector<1x1x8x32xbf16>
    %83 = vector.shape_cast %82 : vector<1x1x8x32xbf16> to vector<8x32xbf16>
    %cst_54 = arith.constant dense<0.000000e+00> : vector<16x32xf32>
    %84 = tpu.matmul %81, %83, %cst_54 {dimension_numbers = #tpu.dot_dimension_numbers<[1], [0], [0], [1], [0, 0, 1, 1], [], []>} : vector<16x8xbf16>, vector<8x32xbf16>, vector<16x32xf32> -> vector<16x32xf32>
    %85 = arith.addf %61, %84 : vector<16x32xf32>
    %86 = vector.extract_strided_slice %34 {offsets = [0, 0, 16], sizes = [2, 8, 8], strides = [1, 1, 1]} : vector<2x8x32xbf16> to vector<2x8x8xbf16>
    %87 = vector.extract_strided_slice %36 {offsets = [0, 0, 16], sizes = [2, 8, 8], strides = [1, 1, 1]} : vector<2x8x32xbf16> to vector<2x8x8xbf16>
    "tpu.trace_start"() <{level = 10 : i32, message = "bqd,bkd->bqk"}> : () -> ()
    %cst_55 = arith.constant dense<0.000000e+00> : vector<2x8x8xf32>
    %88 = tpu.matmul %86, %87, %cst_55 {dimension_numbers = #tpu.dot_dimension_numbers<[2], [2], [1], [1], [0, 0, 0, 1, 1, 1], [0], [0]>} : vector<2x8x8xbf16>, vector<2x8x8xbf16>, vector<2x8x8xf32> -> vector<2x8x8xf32>
    "tpu.trace_stop"() : () -> ()
    %cst_56 = arith.constant 0.353553385 : f32
    %89 = vector.broadcast %cst_56 : f32 to vector<2x8x8xf32>
    %90 = arith.mulf %88, %89 : vector<2x8x8xf32>
    %cst_57 = arith.constant dense<0xFF800000> : vector<2x8xf32>
    %91 = vector.multi_reduction <maximumf>, %90, %cst_57 [2] : vector<2x8x8xf32> to vector<2x8xf32>
    %92 = vector.shape_cast %91 : vector<2x8xf32> to vector<2x8x1xf32>
    %93 = vector.broadcast %92 : vector<2x8x1xf32> to vector<2x8x8xf32>
    %94 = arith.subf %90, %93 : vector<2x8x8xf32>
    %95 = math.exp %94 : vector<2x8x8xf32>
    %cst_58 = arith.constant dense<0.000000e+00> : vector<2x8xf32>
    %96 = vector.multi_reduction <add>, %95, %cst_58 [2] : vector<2x8x8xf32> to vector<2x8xf32>
    %97 = vector.shape_cast %96 : vector<2x8xf32> to vector<2x8x1xf32>
    %98 = tpu.reciprocal %97 : vector<2x8x1xf32> -> vector<2x8x1xf32>
    %99 = vector.broadcast %98 : vector<2x8x1xf32> to vector<2x8x8xf32>
    %100 = arith.mulf %95, %99 : vector<2x8x8xf32>
    %101 = arith.truncf %100 : vector<2x8x8xf32> to vector<2x8x8xbf16>
    %102 = vector.extract_strided_slice %38 {offsets = [0, 0, 16], sizes = [2, 8, 8], strides = [1, 1, 1]} : vector<2x8x32xbf16> to vector<2x8x8xbf16>
    "tpu.trace_start"() <{level = 10 : i32, message = "bqk,bkd->bqd"}> : () -> ()
    %cst_59 = arith.constant dense<0.000000e+00> : vector<2x8x8xf32>
    %103 = tpu.matmul %101, %102, %cst_59 {dimension_numbers = #tpu.dot_dimension_numbers<[2], [1], [1], [2], [0, 0, 0, 1, 1, 2], [0], [0]>} : vector<2x8x8xbf16>, vector<2x8x8xbf16>, vector<2x8x8xf32> -> vector<2x8x8xf32>
    "tpu.trace_stop"() : () -> ()
    %104 = vector.shape_cast %103 : vector<2x8x8xf32> to vector<16x8xf32>
    %105 = arith.truncf %104 : vector<16x8xf32> to vector<16x8xbf16>
    %c0_60 = arith.constant 0 : index
    %c2_61 = arith.constant 2 : index
    %c0_62 = arith.constant 0 : index
    %c0_63 = arith.constant 0 : index
    %106 = vector.load %arg6[%c0_60, %c2_61, %c0_62, %c0_63] : memref<1x4x8x32xbf16, #tpu.memory_space<vmem>>, vector<1x1x8x32xbf16>
    %107 = vector.shape_cast %106 : vector<1x1x8x32xbf16> to vector<8x32xbf16>
    %cst_64 = arith.constant dense<0.000000e+00> : vector<16x32xf32>
    %108 = tpu.matmul %105, %107, %cst_64 {dimension_numbers = #tpu.dot_dimension_numbers<[1], [0], [0], [1], [0, 0, 1, 1], [], []>} : vector<16x8xbf16>, vector<8x32xbf16>, vector<16x32xf32> -> vector<16x32xf32>
    %109 = arith.addf %85, %108 : vector<16x32xf32>
    %110 = vector.extract_strided_slice %34 {offsets = [0, 0, 24], sizes = [2, 8, 8], strides = [1, 1, 1]} : vector<2x8x32xbf16> to vector<2x8x8xbf16>
    %111 = vector.extract_strided_slice %36 {offsets = [0, 0, 24], sizes = [2, 8, 8], strides = [1, 1, 1]} : vector<2x8x32xbf16> to vector<2x8x8xbf16>
    "tpu.trace_start"() <{level = 10 : i32, message = "bqd,bkd->bqk"}> : () -> ()
    %cst_65 = arith.constant dense<0.000000e+00> : vector<2x8x8xf32>
    %112 = tpu.matmul %110, %111, %cst_65 {dimension_numbers = #tpu.dot_dimension_numbers<[2], [2], [1], [1], [0, 0, 0, 1, 1, 1], [0], [0]>} : vector<2x8x8xbf16>, vector<2x8x8xbf16>, vector<2x8x8xf32> -> vector<2x8x8xf32>
    "tpu.trace_stop"() : () -> ()
    %cst_66 = arith.constant 0.353553385 : f32
    %113 = vector.broadcast %cst_66 : f32 to vector<2x8x8xf32>
    %114 = arith.mulf %112, %113 : vector<2x8x8xf32>
    %cst_67 = arith.constant dense<0xFF800000> : vector<2x8xf32>
    %115 = vector.multi_reduction <maximumf>, %114, %cst_67 [2] : vector<2x8x8xf32> to vector<2x8xf32>
    %116 = vector.shape_cast %115 : vector<2x8xf32> to vector<2x8x1xf32>
    %117 = vector.broadcast %116 : vector<2x8x1xf32> to vector<2x8x8xf32>
    %118 = arith.subf %114, %117 : vector<2x8x8xf32>
    %119 = math.exp %118 : vector<2x8x8xf32>
    %cst_68 = arith.constant dense<0.000000e+00> : vector<2x8xf32>
    %120 = vector.multi_reduction <add>, %119, %cst_68 [2] : vector<2x8x8xf32> to vector<2x8xf32>
    %121 = vector.shape_cast %120 : vector<2x8xf32> to vector<2x8x1xf32>
    %122 = tpu.reciprocal %121 : vector<2x8x1xf32> -> vector<2x8x1xf32>
    %123 = vector.broadcast %122 : vector<2x8x1xf32> to vector<2x8x8xf32>
    %124 = arith.mulf %119, %123 : vector<2x8x8xf32>
    %125 = arith.truncf %124 : vector<2x8x8xf32> to vector<2x8x8xbf16>
    %126 = vector.extract_strided_slice %38 {offsets = [0, 0, 24], sizes = [2, 8, 8], strides = [1, 1, 1]} : vector<2x8x32xbf16> to vector<2x8x8xbf16>
    "tpu.trace_start"() <{level = 10 : i32, message = "bqk,bkd->bqd"}> : () -> ()
    %cst_69 = arith.constant dense<0.000000e+00> : vector<2x8x8xf32>
    %127 = tpu.matmul %125, %126, %cst_69 {dimension_numbers = #tpu.dot_dimension_numbers<[2], [1], [1], [2], [0, 0, 0, 1, 1, 2], [0], [0]>} : vector<2x8x8xbf16>, vector<2x8x8xbf16>, vector<2x8x8xf32> -> vector<2x8x8xf32>
    "tpu.trace_stop"() : () -> ()
    %128 = vector.shape_cast %127 : vector<2x8x8xf32> to vector<16x8xf32>
    %129 = arith.truncf %128 : vector<16x8xf32> to vector<16x8xbf16>
    %c0_70 = arith.constant 0 : index
    %c3 = arith.constant 3 : index
    %c0_71 = arith.constant 0 : index
    %c0_72 = arith.constant 0 : index
    %130 = vector.load %arg6[%c0_70, %c3, %c0_71, %c0_72] : memref<1x4x8x32xbf16, #tpu.memory_space<vmem>>, vector<1x1x8x32xbf16>
    %131 = vector.shape_cast %130 : vector<1x1x8x32xbf16> to vector<8x32xbf16>
    %cst_73 = arith.constant dense<0.000000e+00> : vector<16x32xf32>
    %132 = tpu.matmul %129, %131, %cst_73 {dimension_numbers = #tpu.dot_dimension_numbers<[1], [0], [0], [1], [0, 0, 1, 1], [], []>} : vector<16x8xbf16>, vector<8x32xbf16>, vector<16x32xf32> -> vector<16x32xf32>
    %133 = arith.addf %109, %132 : vector<16x32xf32>
    %c0_74 = arith.constant 0 : index
    %c0_75 = arith.constant 0 : index
    %c0_76 = arith.constant 0 : index
    %134 = vector.load %arg7[%c0_74, %c0_75, %c0_76] : memref<1x1x32xf32, #tpu.memory_space<vmem>>, vector<1x1x32xf32>
    %135 = vector.shape_cast %134 : vector<1x1x32xf32> to vector<1x32xf32>
    %136 = vector.broadcast %135 : vector<1x32xf32> to vector<16x32xf32>
    %137 = arith.addf %133, %136 : vector<16x32xf32>
    %138 = arith.addf %3, %137 : vector<16x32xf32>
    %139 = vector.extract_strided_slice %9 {offsets = [0, 0], sizes = [1, 32], strides = [1, 1]} : vector<3x32xf32> to vector<1x32xf32>
    %140 = vector.extract_strided_slice %11 {offsets = [0, 0], sizes = [1, 32], strides = [1, 1]} : vector<3x32xf32> to vector<1x32xf32>
    %cst_77 = arith.constant dense<0.000000e+00> : vector<16xf32>
    %141 = vector.multi_reduction <add>, %138, %cst_77 [1] : vector<16x32xf32> to vector<16xf32>
    %142 = vector.shape_cast %141 : vector<16xf32> to vector<16x1xf32>
    %cst_78 = arith.constant 3.200000e+01 : f32
    %143 = vector.broadcast %cst_78 : f32 to vector<16x1xf32>
    %144 = arith.divf %142, %143 : vector<16x1xf32>
    %145 = vector.broadcast %144 : vector<16x1xf32> to vector<16x32xf32>
    %146 = arith.subf %138, %145 : vector<16x32xf32>
    %147 = arith.mulf %146, %146 : vector<16x32xf32>
    %cst_79 = arith.constant dense<0.000000e+00> : vector<16xf32>
    %148 = vector.multi_reduction <add>, %147, %cst_79 [1] : vector<16x32xf32> to vector<16xf32>
    %149 = vector.shape_cast %148 : vector<16xf32> to vector<16x1xf32>
    %cst_80 = arith.constant 3.200000e+01 : f32
    %150 = vector.broadcast %cst_80 : f32 to vector<16x1xf32>
    %151 = arith.divf %149, %150 : vector<16x1xf32>
    %cst_81 = arith.constant 9.99999974E-6 : f32
    %152 = vector.broadcast %cst_81 : f32 to vector<16x1xf32>
    %153 = arith.addf %151, %152 : vector<16x1xf32>
    %154 = math.rsqrt %153 : vector<16x1xf32>
    %155 = vector.broadcast %154 : vector<16x1xf32> to vector<16x32xf32>
    %156 = arith.mulf %146, %155 : vector<16x32xf32>
    %157 = vector.broadcast %139 : vector<1x32xf32> to vector<16x32xf32>
    %158 = arith.mulf %156, %157 : vector<16x32xf32>
    %159 = vector.broadcast %140 : vector<1x32xf32> to vector<16x32xf32>
    %160 = arith.addf %158, %159 : vector<16x32xf32>
    %161 = arith.truncf %160 : vector<16x32xf32> to vector<16x32xbf16>
    %c0_82 = arith.constant 0 : index
    %c0_83 = arith.constant 0 : index
    %c0_84 = arith.constant 0 : index
    %c0_85 = arith.constant 0 : index
    %162 = vector.load %arg8[%c0_82, %c0_83, %c0_84, %c0_85] : memref<1x3x32x32xbf16, #tpu.memory_space<vmem>>, vector<1x1x32x32xbf16>
    %163 = vector.shape_cast %162 : vector<1x1x32x32xbf16> to vector<32x32xbf16>
    %c0_86 = arith.constant 0 : index
    %c0_87 = arith.constant 0 : index
    %c0_88 = arith.constant 0 : index
    %c0_89 = arith.constant 0 : index
    %164 = vector.load %arg9[%c0_86, %c0_87, %c0_88, %c0_89] : memref<1x3x1x32xf32, #tpu.memory_space<vmem>>, vector<1x1x1x32xf32>
    %165 = vector.shape_cast %164 : vector<1x1x1x32xf32> to vector<1x32xf32>
    %cst_90 = arith.constant dense<0.000000e+00> : vector<16x32xf32>
    %166 = tpu.matmul %161, %163, %cst_90 {dimension_numbers = #tpu.dot_dimension_numbers<[1], [0], [0], [1], [0, 0, 1, 1], [], []>} : vector<16x32xbf16>, vector<32x32xbf16>, vector<16x32xf32> -> vector<16x32xf32>
    %167 = vector.broadcast %165 : vector<1x32xf32> to vector<16x32xf32>
    %168 = arith.addf %166, %167 : vector<16x32xf32>
    %c0_91 = arith.constant 0 : index
    %c1_92 = arith.constant 1 : index
    %c0_93 = arith.constant 0 : index
    %c0_94 = arith.constant 0 : index
    %169 = vector.load %arg8[%c0_91, %c1_92, %c0_93, %c0_94] : memref<1x3x32x32xbf16, #tpu.memory_space<vmem>>, vector<1x1x32x32xbf16>
    %170 = vector.shape_cast %169 : vector<1x1x32x32xbf16> to vector<32x32xbf16>
    %c0_95 = arith.constant 0 : index
    %c1_96 = arith.constant 1 : index
    %c0_97 = arith.constant 0 : index
    %c0_98 = arith.constant 0 : index
    %171 = vector.load %arg9[%c0_95, %c1_96, %c0_97, %c0_98] : memref<1x3x1x32xf32, #tpu.memory_space<vmem>>, vector<1x1x1x32xf32>
    %172 = vector.shape_cast %171 : vector<1x1x1x32xf32> to vector<1x32xf32>
    %cst_99 = arith.constant dense<0.000000e+00> : vector<24x32xf32>
    %173 = tpu.matmul %7, %170, %cst_99 {dimension_numbers = #tpu.dot_dimension_numbers<[1], [0], [0], [1], [0, 0, 1, 1], [], []>} : vector<24x32xbf16>, vector<32x32xbf16>, vector<24x32xf32> -> vector<24x32xf32>
    %174 = vector.broadcast %172 : vector<1x32xf32> to vector<24x32xf32>
    %175 = arith.addf %173, %174 : vector<24x32xf32>
    %c0_100 = arith.constant 0 : index
    %c2_101 = arith.constant 2 : index
    %c0_102 = arith.constant 0 : index
    %c0_103 = arith.constant 0 : index
    %176 = vector.load %arg8[%c0_100, %c2_101, %c0_102, %c0_103] : memref<1x3x32x32xbf16, #tpu.memory_space<vmem>>, vector<1x1x32x32xbf16>
    %177 = vector.shape_cast %176 : vector<1x1x32x32xbf16> to vector<32x32xbf16>
    %c0_104 = arith.constant 0 : index
    %c2_105 = arith.constant 2 : index
    %c0_106 = arith.constant 0 : index
    %c0_107 = arith.constant 0 : index
    %178 = vector.load %arg9[%c0_104, %c2_105, %c0_106, %c0_107] : memref<1x3x1x32xf32, #tpu.memory_space<vmem>>, vector<1x1x1x32xf32>
    %179 = vector.shape_cast %178 : vector<1x1x1x32xf32> to vector<1x32xf32>
    %cst_108 = arith.constant dense<0.000000e+00> : vector<24x32xf32>
    %180 = tpu.matmul %7, %177, %cst_108 {dimension_numbers = #tpu.dot_dimension_numbers<[1], [0], [0], [1], [0, 0, 1, 1], [], []>} : vector<24x32xbf16>, vector<32x32xbf16>, vector<24x32xf32> -> vector<24x32xf32>
    %181 = vector.broadcast %179 : vector<1x32xf32> to vector<24x32xf32>
    %182 = arith.addf %180, %181 : vector<24x32xf32>
    %183 = vector.shape_cast %168 : vector<16x32xf32> to vector<2x8x32xf32>
    %184 = arith.truncf %183 : vector<2x8x32xf32> to vector<2x8x32xbf16>
    %185 = vector.shape_cast %175 : vector<24x32xf32> to vector<2x12x32xf32>
    %186 = arith.truncf %185 : vector<2x12x32xf32> to vector<2x12x32xbf16>
    %187 = vector.shape_cast %182 : vector<24x32xf32> to vector<2x12x32xf32>
    %188 = arith.truncf %187 : vector<2x12x32xf32> to vector<2x12x32xbf16>
    %189 = vector.extract_strided_slice %184 {offsets = [0, 0, 0], sizes = [2, 8, 8], strides = [1, 1, 1]} : vector<2x8x32xbf16> to vector<2x8x8xbf16>
    %190 = vector.extract_strided_slice %186 {offsets = [0, 0, 0], sizes = [2, 12, 8], strides = [1, 1, 1]} : vector<2x12x32xbf16> to vector<2x12x8xbf16>
    "tpu.trace_start"() <{level = 10 : i32, message = "bqd,bkd->bqk"}> : () -> ()
    %cst_109 = arith.constant dense<0.000000e+00> : vector<2x8x12xf32>
    %191 = tpu.matmul %189, %190, %cst_109 {dimension_numbers = #tpu.dot_dimension_numbers<[2], [2], [1], [1], [0, 0, 0, 1, 1, 1], [0], [0]>} : vector<2x8x8xbf16>, vector<2x12x8xbf16>, vector<2x8x12xf32> -> vector<2x8x12xf32>
    "tpu.trace_stop"() : () -> ()
    %cst_110 = arith.constant 0.353553385 : f32
    %192 = vector.broadcast %cst_110 : f32 to vector<2x8x12xf32>
    %193 = arith.mulf %191, %192 : vector<2x8x12xf32>
    %cst_111 = arith.constant dense<0xFF800000> : vector<2x8xf32>
    %194 = vector.multi_reduction <maximumf>, %193, %cst_111 [2] : vector<2x8x12xf32> to vector<2x8xf32>
    %195 = vector.shape_cast %194 : vector<2x8xf32> to vector<2x8x1xf32>
    %196 = vector.broadcast %195 : vector<2x8x1xf32> to vector<2x8x12xf32>
    %197 = arith.subf %193, %196 : vector<2x8x12xf32>
    %198 = math.exp %197 : vector<2x8x12xf32>
    %cst_112 = arith.constant dense<0.000000e+00> : vector<2x8xf32>
    %199 = vector.multi_reduction <add>, %198, %cst_112 [2] : vector<2x8x12xf32> to vector<2x8xf32>
    %200 = vector.shape_cast %199 : vector<2x8xf32> to vector<2x8x1xf32>
    %201 = tpu.reciprocal %200 : vector<2x8x1xf32> -> vector<2x8x1xf32>
    %202 = vector.broadcast %201 : vector<2x8x1xf32> to vector<2x8x12xf32>
    %203 = arith.mulf %198, %202 : vector<2x8x12xf32>
    %204 = arith.truncf %203 : vector<2x8x12xf32> to vector<2x8x12xbf16>
    %205 = vector.extract_strided_slice %188 {offsets = [0, 0, 0], sizes = [2, 12, 8], strides = [1, 1, 1]} : vector<2x12x32xbf16> to vector<2x12x8xbf16>
    "tpu.trace_start"() <{level = 10 : i32, message = "bqk,bkd->bqd"}> : () -> ()
    %cst_113 = arith.constant dense<0.000000e+00> : vector<2x8x8xf32>
    %206 = tpu.matmul %204, %205, %cst_113 {dimension_numbers = #tpu.dot_dimension_numbers<[2], [1], [1], [2], [0, 0, 0, 1, 1, 2], [0], [0]>} : vector<2x8x12xbf16>, vector<2x12x8xbf16>, vector<2x8x8xf32> -> vector<2x8x8xf32>
    "tpu.trace_stop"() : () -> ()
    %207 = vector.shape_cast %206 : vector<2x8x8xf32> to vector<16x8xf32>
    %208 = arith.truncf %207 : vector<16x8xf32> to vector<16x8xbf16>
    %c0_114 = arith.constant 0 : index
    %c0_115 = arith.constant 0 : index
    %c0_116 = arith.constant 0 : index
    %c0_117 = arith.constant 0 : index
    %209 = vector.load %arg10[%c0_114, %c0_115, %c0_116, %c0_117] : memref<1x4x8x32xbf16, #tpu.memory_space<vmem>>, vector<1x1x8x32xbf16>
    %210 = vector.shape_cast %209 : vector<1x1x8x32xbf16> to vector<8x32xbf16>
    %cst_118 = arith.constant dense<0.000000e+00> : vector<16x32xf32>
    %211 = tpu.matmul %208, %210, %cst_118 {dimension_numbers = #tpu.dot_dimension_numbers<[1], [0], [0], [1], [0, 0, 1, 1], [], []>} : vector<16x8xbf16>, vector<8x32xbf16>, vector<16x32xf32> -> vector<16x32xf32>
    %212 = vector.extract_strided_slice %184 {offsets = [0, 0, 8], sizes = [2, 8, 8], strides = [1, 1, 1]} : vector<2x8x32xbf16> to vector<2x8x8xbf16>
    %213 = vector.extract_strided_slice %186 {offsets = [0, 0, 8], sizes = [2, 12, 8], strides = [1, 1, 1]} : vector<2x12x32xbf16> to vector<2x12x8xbf16>
    "tpu.trace_start"() <{level = 10 : i32, message = "bqd,bkd->bqk"}> : () -> ()
    %cst_119 = arith.constant dense<0.000000e+00> : vector<2x8x12xf32>
    %214 = tpu.matmul %212, %213, %cst_119 {dimension_numbers = #tpu.dot_dimension_numbers<[2], [2], [1], [1], [0, 0, 0, 1, 1, 1], [0], [0]>} : vector<2x8x8xbf16>, vector<2x12x8xbf16>, vector<2x8x12xf32> -> vector<2x8x12xf32>
    "tpu.trace_stop"() : () -> ()
    %cst_120 = arith.constant 0.353553385 : f32
    %215 = vector.broadcast %cst_120 : f32 to vector<2x8x12xf32>
    %216 = arith.mulf %214, %215 : vector<2x8x12xf32>
    %cst_121 = arith.constant dense<0xFF800000> : vector<2x8xf32>
    %217 = vector.multi_reduction <maximumf>, %216, %cst_121 [2] : vector<2x8x12xf32> to vector<2x8xf32>
    %218 = vector.shape_cast %217 : vector<2x8xf32> to vector<2x8x1xf32>
    %219 = vector.broadcast %218 : vector<2x8x1xf32> to vector<2x8x12xf32>
    %220 = arith.subf %216, %219 : vector<2x8x12xf32>
    %221 = math.exp %220 : vector<2x8x12xf32>
    %cst_122 = arith.constant dense<0.000000e+00> : vector<2x8xf32>
    %222 = vector.multi_reduction <add>, %221, %cst_122 [2] : vector<2x8x12xf32> to vector<2x8xf32>
    %223 = vector.shape_cast %222 : vector<2x8xf32> to vector<2x8x1xf32>
    %224 = tpu.reciprocal %223 : vector<2x8x1xf32> -> vector<2x8x1xf32>
    %225 = vector.broadcast %224 : vector<2x8x1xf32> to vector<2x8x12xf32>
    %226 = arith.mulf %221, %225 : vector<2x8x12xf32>
    %227 = arith.truncf %226 : vector<2x8x12xf32> to vector<2x8x12xbf16>
    %228 = vector.extract_strided_slice %188 {offsets = [0, 0, 8], sizes = [2, 12, 8], strides = [1, 1, 1]} : vector<2x12x32xbf16> to vector<2x12x8xbf16>
    "tpu.trace_start"() <{level = 10 : i32, message = "bqk,bkd->bqd"}> : () -> ()
    %cst_123 = arith.constant dense<0.000000e+00> : vector<2x8x8xf32>
    %229 = tpu.matmul %227, %228, %cst_123 {dimension_numbers = #tpu.dot_dimension_numbers<[2], [1], [1], [2], [0, 0, 0, 1, 1, 2], [0], [0]>} : vector<2x8x12xbf16>, vector<2x12x8xbf16>, vector<2x8x8xf32> -> vector<2x8x8xf32>
    "tpu.trace_stop"() : () -> ()
    %230 = vector.shape_cast %229 : vector<2x8x8xf32> to vector<16x8xf32>
    %231 = arith.truncf %230 : vector<16x8xf32> to vector<16x8xbf16>
    %c0_124 = arith.constant 0 : index
    %c1_125 = arith.constant 1 : index
    %c0_126 = arith.constant 0 : index
    %c0_127 = arith.constant 0 : index
    %232 = vector.load %arg10[%c0_124, %c1_125, %c0_126, %c0_127] : memref<1x4x8x32xbf16, #tpu.memory_space<vmem>>, vector<1x1x8x32xbf16>
    %233 = vector.shape_cast %232 : vector<1x1x8x32xbf16> to vector<8x32xbf16>
    %cst_128 = arith.constant dense<0.000000e+00> : vector<16x32xf32>
    %234 = tpu.matmul %231, %233, %cst_128 {dimension_numbers = #tpu.dot_dimension_numbers<[1], [0], [0], [1], [0, 0, 1, 1], [], []>} : vector<16x8xbf16>, vector<8x32xbf16>, vector<16x32xf32> -> vector<16x32xf32>
    %235 = arith.addf %211, %234 : vector<16x32xf32>
    %236 = vector.extract_strided_slice %184 {offsets = [0, 0, 16], sizes = [2, 8, 8], strides = [1, 1, 1]} : vector<2x8x32xbf16> to vector<2x8x8xbf16>
    %237 = vector.extract_strided_slice %186 {offsets = [0, 0, 16], sizes = [2, 12, 8], strides = [1, 1, 1]} : vector<2x12x32xbf16> to vector<2x12x8xbf16>
    "tpu.trace_start"() <{level = 10 : i32, message = "bqd,bkd->bqk"}> : () -> ()
    %cst_129 = arith.constant dense<0.000000e+00> : vector<2x8x12xf32>
    %238 = tpu.matmul %236, %237, %cst_129 {dimension_numbers = #tpu.dot_dimension_numbers<[2], [2], [1], [1], [0, 0, 0, 1, 1, 1], [0], [0]>} : vector<2x8x8xbf16>, vector<2x12x8xbf16>, vector<2x8x12xf32> -> vector<2x8x12xf32>
    "tpu.trace_stop"() : () -> ()
    %cst_130 = arith.constant 0.353553385 : f32
    %239 = vector.broadcast %cst_130 : f32 to vector<2x8x12xf32>
    %240 = arith.mulf %238, %239 : vector<2x8x12xf32>
    %cst_131 = arith.constant dense<0xFF800000> : vector<2x8xf32>
    %241 = vector.multi_reduction <maximumf>, %240, %cst_131 [2] : vector<2x8x12xf32> to vector<2x8xf32>
    %242 = vector.shape_cast %241 : vector<2x8xf32> to vector<2x8x1xf32>
    %243 = vector.broadcast %242 : vector<2x8x1xf32> to vector<2x8x12xf32>
    %244 = arith.subf %240, %243 : vector<2x8x12xf32>
    %245 = math.exp %244 : vector<2x8x12xf32>
    %cst_132 = arith.constant dense<0.000000e+00> : vector<2x8xf32>
    %246 = vector.multi_reduction <add>, %245, %cst_132 [2] : vector<2x8x12xf32> to vector<2x8xf32>
    %247 = vector.shape_cast %246 : vector<2x8xf32> to vector<2x8x1xf32>
    %248 = tpu.reciprocal %247 : vector<2x8x1xf32> -> vector<2x8x1xf32>
    %249 = vector.broadcast %248 : vector<2x8x1xf32> to vector<2x8x12xf32>
    %250 = arith.mulf %245, %249 : vector<2x8x12xf32>
    %251 = arith.truncf %250 : vector<2x8x12xf32> to vector<2x8x12xbf16>
    %252 = vector.extract_strided_slice %188 {offsets = [0, 0, 16], sizes = [2, 12, 8], strides = [1, 1, 1]} : vector<2x12x32xbf16> to vector<2x12x8xbf16>
    "tpu.trace_start"() <{level = 10 : i32, message = "bqk,bkd->bqd"}> : () -> ()
    %cst_133 = arith.constant dense<0.000000e+00> : vector<2x8x8xf32>
    %253 = tpu.matmul %251, %252, %cst_133 {dimension_numbers = #tpu.dot_dimension_numbers<[2], [1], [1], [2], [0, 0, 0, 1, 1, 2], [0], [0]>} : vector<2x8x12xbf16>, vector<2x12x8xbf16>, vector<2x8x8xf32> -> vector<2x8x8xf32>
    "tpu.trace_stop"() : () -> ()
    %254 = vector.shape_cast %253 : vector<2x8x8xf32> to vector<16x8xf32>
    %255 = arith.truncf %254 : vector<16x8xf32> to vector<16x8xbf16>
    %c0_134 = arith.constant 0 : index
    %c2_135 = arith.constant 2 : index
    %c0_136 = arith.constant 0 : index
    %c0_137 = arith.constant 0 : index
    %256 = vector.load %arg10[%c0_134, %c2_135, %c0_136, %c0_137] : memref<1x4x8x32xbf16, #tpu.memory_space<vmem>>, vector<1x1x8x32xbf16>
    %257 = vector.shape_cast %256 : vector<1x1x8x32xbf16> to vector<8x32xbf16>
    %cst_138 = arith.constant dense<0.000000e+00> : vector<16x32xf32>
    %258 = tpu.matmul %255, %257, %cst_138 {dimension_numbers = #tpu.dot_dimension_numbers<[1], [0], [0], [1], [0, 0, 1, 1], [], []>} : vector<16x8xbf16>, vector<8x32xbf16>, vector<16x32xf32> -> vector<16x32xf32>
    %259 = arith.addf %235, %258 : vector<16x32xf32>
    %260 = vector.extract_strided_slice %184 {offsets = [0, 0, 24], sizes = [2, 8, 8], strides = [1, 1, 1]} : vector<2x8x32xbf16> to vector<2x8x8xbf16>
    %261 = vector.extract_strided_slice %186 {offsets = [0, 0, 24], sizes = [2, 12, 8], strides = [1, 1, 1]} : vector<2x12x32xbf16> to vector<2x12x8xbf16>
    "tpu.trace_start"() <{level = 10 : i32, message = "bqd,bkd->bqk"}> : () -> ()
    %cst_139 = arith.constant dense<0.000000e+00> : vector<2x8x12xf32>
    %262 = tpu.matmul %260, %261, %cst_139 {dimension_numbers = #tpu.dot_dimension_numbers<[2], [2], [1], [1], [0, 0, 0, 1, 1, 1], [0], [0]>} : vector<2x8x8xbf16>, vector<2x12x8xbf16>, vector<2x8x12xf32> -> vector<2x8x12xf32>
    "tpu.trace_stop"() : () -> ()
    %cst_140 = arith.constant 0.353553385 : f32
    %263 = vector.broadcast %cst_140 : f32 to vector<2x8x12xf32>
    %264 = arith.mulf %262, %263 : vector<2x8x12xf32>
    %cst_141 = arith.constant dense<0xFF800000> : vector<2x8xf32>
    %265 = vector.multi_reduction <maximumf>, %264, %cst_141 [2] : vector<2x8x12xf32> to vector<2x8xf32>
    %266 = vector.shape_cast %265 : vector<2x8xf32> to vector<2x8x1xf32>
    %267 = vector.broadcast %266 : vector<2x8x1xf32> to vector<2x8x12xf32>
    %268 = arith.subf %264, %267 : vector<2x8x12xf32>
    %269 = math.exp %268 : vector<2x8x12xf32>
    %cst_142 = arith.constant dense<0.000000e+00> : vector<2x8xf32>
    %270 = vector.multi_reduction <add>, %269, %cst_142 [2] : vector<2x8x12xf32> to vector<2x8xf32>
    %271 = vector.shape_cast %270 : vector<2x8xf32> to vector<2x8x1xf32>
    %272 = tpu.reciprocal %271 : vector<2x8x1xf32> -> vector<2x8x1xf32>
    %273 = vector.broadcast %272 : vector<2x8x1xf32> to vector<2x8x12xf32>
    %274 = arith.mulf %269, %273 : vector<2x8x12xf32>
    %275 = arith.truncf %274 : vector<2x8x12xf32> to vector<2x8x12xbf16>
    %276 = vector.extract_strided_slice %188 {offsets = [0, 0, 24], sizes = [2, 12, 8], strides = [1, 1, 1]} : vector<2x12x32xbf16> to vector<2x12x8xbf16>
    "tpu.trace_start"() <{level = 10 : i32, message = "bqk,bkd->bqd"}> : () -> ()
    %cst_143 = arith.constant dense<0.000000e+00> : vector<2x8x8xf32>
    %277 = tpu.matmul %275, %276, %cst_143 {dimension_numbers = #tpu.dot_dimension_numbers<[2], [1], [1], [2], [0, 0, 0, 1, 1, 2], [0], [0]>} : vector<2x8x12xbf16>, vector<2x12x8xbf16>, vector<2x8x8xf32> -> vector<2x8x8xf32>
    "tpu.trace_stop"() : () -> ()
    %278 = vector.shape_cast %277 : vector<2x8x8xf32> to vector<16x8xf32>
    %279 = arith.truncf %278 : vector<16x8xf32> to vector<16x8xbf16>
    %c0_144 = arith.constant 0 : index
    %c3_145 = arith.constant 3 : index
    %c0_146 = arith.constant 0 : index
    %c0_147 = arith.constant 0 : index
    %280 = vector.load %arg10[%c0_144, %c3_145, %c0_146, %c0_147] : memref<1x4x8x32xbf16, #tpu.memory_space<vmem>>, vector<1x1x8x32xbf16>
    %281 = vector.shape_cast %280 : vector<1x1x8x32xbf16> to vector<8x32xbf16>
    %cst_148 = arith.constant dense<0.000000e+00> : vector<16x32xf32>
    %282 = tpu.matmul %279, %281, %cst_148 {dimension_numbers = #tpu.dot_dimension_numbers<[1], [0], [0], [1], [0, 0, 1, 1], [], []>} : vector<16x8xbf16>, vector<8x32xbf16>, vector<16x32xf32> -> vector<16x32xf32>
    %283 = arith.addf %259, %282 : vector<16x32xf32>
    %c0_149 = arith.constant 0 : index
    %c0_150 = arith.constant 0 : index
    %c0_151 = arith.constant 0 : index
    %284 = vector.load %arg11[%c0_149, %c0_150, %c0_151] : memref<1x1x32xf32, #tpu.memory_space<vmem>>, vector<1x1x32xf32>
    %285 = vector.shape_cast %284 : vector<1x1x32xf32> to vector<1x32xf32>
    %286 = vector.broadcast %285 : vector<1x32xf32> to vector<16x32xf32>
    %287 = arith.addf %283, %286 : vector<16x32xf32>
    %288 = arith.addf %3, %287 : vector<16x32xf32>
    %289 = vector.extract_strided_slice %9 {offsets = [1, 0], sizes = [1, 32], strides = [1, 1]} : vector<3x32xf32> to vector<1x32xf32>
    %290 = vector.extract_strided_slice %11 {offsets = [1, 0], sizes = [1, 32], strides = [1, 1]} : vector<3x32xf32> to vector<1x32xf32>
    %cst_152 = arith.constant dense<0.000000e+00> : vector<16xf32>
    %291 = vector.multi_reduction <add>, %288, %cst_152 [1] : vector<16x32xf32> to vector<16xf32>
    %292 = vector.shape_cast %291 : vector<16xf32> to vector<16x1xf32>
    %cst_153 = arith.constant 3.200000e+01 : f32
    %293 = vector.broadcast %cst_153 : f32 to vector<16x1xf32>
    %294 = arith.divf %292, %293 : vector<16x1xf32>
    %295 = vector.broadcast %294 : vector<16x1xf32> to vector<16x32xf32>
    %296 = arith.subf %288, %295 : vector<16x32xf32>
    %297 = arith.mulf %296, %296 : vector<16x32xf32>
    %cst_154 = arith.constant dense<0.000000e+00> : vector<16xf32>
    %298 = vector.multi_reduction <add>, %297, %cst_154 [1] : vector<16x32xf32> to vector<16xf32>
    %299 = vector.shape_cast %298 : vector<16xf32> to vector<16x1xf32>
    %cst_155 = arith.constant 3.200000e+01 : f32
    %300 = vector.broadcast %cst_155 : f32 to vector<16x1xf32>
    %301 = arith.divf %299, %300 : vector<16x1xf32>
    %cst_156 = arith.constant 9.99999974E-6 : f32
    %302 = vector.broadcast %cst_156 : f32 to vector<16x1xf32>
    %303 = arith.addf %301, %302 : vector<16x1xf32>
    %304 = math.rsqrt %303 : vector<16x1xf32>
    %305 = vector.broadcast %304 : vector<16x1xf32> to vector<16x32xf32>
    %306 = arith.mulf %296, %305 : vector<16x32xf32>
    %307 = vector.broadcast %289 : vector<1x32xf32> to vector<16x32xf32>
    %308 = arith.mulf %306, %307 : vector<16x32xf32>
    %309 = vector.broadcast %290 : vector<1x32xf32> to vector<16x32xf32>
    %310 = arith.addf %308, %309 : vector<16x32xf32>
    %311 = arith.truncf %310 : vector<16x32xf32> to vector<16x32xbf16>
    %c0_157 = arith.constant 0 : index
    %c0_158 = arith.constant 0 : index
    %c0_159 = arith.constant 0 : index
    %312 = vector.load %arg12[%c0_157, %c0_158, %c0_159] : memref<1x32x64xbf16, #tpu.memory_space<vmem>>, vector<1x32x64xbf16>
    %313 = vector.shape_cast %312 : vector<1x32x64xbf16> to vector<32x64xbf16>
    %c0_160 = arith.constant 0 : index
    %c0_161 = arith.constant 0 : index
    %c0_162 = arith.constant 0 : index
    %314 = vector.load %arg13[%c0_160, %c0_161, %c0_162] : memref<1x1x64xf32, #tpu.memory_space<vmem>>, vector<1x1x64xf32>
    %315 = vector.shape_cast %314 : vector<1x1x64xf32> to vector<1x64xf32>
    %cst_163 = arith.constant dense<0.000000e+00> : vector<16x64xf32>
    %316 = tpu.matmul %311, %313, %cst_163 {dimension_numbers = #tpu.dot_dimension_numbers<[1], [0], [0], [1], [0, 0, 1, 1], [], []>} : vector<16x32xbf16>, vector<32x64xbf16>, vector<16x64xf32> -> vector<16x64xf32>
    %317 = vector.broadcast %315 : vector<1x64xf32> to vector<16x64xf32>
    %318 = arith.addf %316, %317 : vector<16x64xf32>
    %cst_164 = arith.constant 0.000000e+00 : f32
    %319 = vector.broadcast %cst_164 : f32 to vector<16x64xf32>
    %320 = arith.maximumf %318, %319 : vector<16x64xf32>
    %321 = arith.truncf %320 : vector<16x64xf32> to vector<16x64xbf16>
    %c0_165 = arith.constant 0 : index
    %c0_166 = arith.constant 0 : index
    %c0_167 = arith.constant 0 : index
    %322 = vector.load %arg14[%c0_165, %c0_166, %c0_167] : memref<1x64x32xbf16, #tpu.memory_space<vmem>>, vector<1x64x32xbf16>
    %323 = vector.shape_cast %322 : vector<1x64x32xbf16> to vector<64x32xbf16>
    %c0_168 = arith.constant 0 : index
    %c0_169 = arith.constant 0 : index
    %c0_170 = arith.constant 0 : index
    %324 = vector.load %arg15[%c0_168, %c0_169, %c0_170] : memref<1x1x32xf32, #tpu.memory_space<vmem>>, vector<1x1x32xf32>
    %325 = vector.shape_cast %324 : vector<1x1x32xf32> to vector<1x32xf32>
    %cst_171 = arith.constant dense<0.000000e+00> : vector<16x32xf32>
    %326 = tpu.matmul %321, %323, %cst_171 {dimension_numbers = #tpu.dot_dimension_numbers<[1], [0], [0], [1], [0, 0, 1, 1], [], []>} : vector<16x64xbf16>, vector<64x32xbf16>, vector<16x32xf32> -> vector<16x32xf32>
    %327 = vector.broadcast %325 : vector<1x32xf32> to vector<16x32xf32>
    %328 = arith.addf %326, %327 : vector<16x32xf32>
    %329 = arith.addf %310, %328 : vector<16x32xf32>
    %330 = vector.extract_strided_slice %9 {offsets = [2, 0], sizes = [1, 32], strides = [1, 1]} : vector<3x32xf32> to vector<1x32xf32>
    %331 = vector.extract_strided_slice %11 {offsets = [2, 0], sizes = [1, 32], strides = [1, 1]} : vector<3x32xf32> to vector<1x32xf32>
    %cst_172 = arith.constant dense<0.000000e+00> : vector<16xf32>
    %332 = vector.multi_reduction <add>, %329, %cst_172 [1] : vector<16x32xf32> to vector<16xf32>
    %333 = vector.shape_cast %332 : vector<16xf32> to vector<16x1xf32>
    %cst_173 = arith.constant 3.200000e+01 : f32
    %334 = vector.broadcast %cst_173 : f32 to vector<16x1xf32>
    %335 = arith.divf %333, %334 : vector<16x1xf32>
    %336 = vector.broadcast %335 : vector<16x1xf32> to vector<16x32xf32>
    %337 = arith.subf %329, %336 : vector<16x32xf32>
    %338 = arith.mulf %337, %337 : vector<16x32xf32>
    %cst_174 = arith.constant dense<0.000000e+00> : vector<16xf32>
    %339 = vector.multi_reduction <add>, %338, %cst_174 [1] : vector<16x32xf32> to vector<16xf32>
    %340 = vector.shape_cast %339 : vector<16xf32> to vector<16x1xf32>
    %cst_175 = arith.constant 3.200000e+01 : f32
    %341 = vector.broadcast %cst_175 : f32 to vector<16x1xf32>
    %342 = arith.divf %340, %341 : vector<16x1xf32>
    %cst_176 = arith.constant 9.99999974E-6 : f32
    %343 = vector.broadcast %cst_176 : f32 to vector<16x1xf32>
    %344 = arith.addf %342, %343 : vector<16x1xf32>
    %345 = math.rsqrt %344 : vector<16x1xf32>
    %346 = vector.broadcast %345 : vector<16x1xf32> to vector<16x32xf32>
    %347 = arith.mulf %337, %346 : vector<16x32xf32>
    %348 = vector.broadcast %330 : vector<1x32xf32> to vector<16x32xf32>
    %349 = arith.mulf %347, %348 : vector<16x32xf32>
    %350 = vector.broadcast %331 : vector<1x32xf32> to vector<16x32xf32>
    %351 = arith.addf %349, %350 : vector<16x32xf32>
    %c0_177 = arith.constant 0 : index
    %c0_178 = arith.constant 0 : index
    %352 = vector.load %arg19[%c0_177, %c0_178] : memref<16x32xf32, #tpu.memory_space<vmem>>, vector<16x32xf32>
    tpu.vector_store %arg19[%c0_177, %c0_178], %351 {strides = array<i32>} : memref<16x32xf32, #tpu.memory_space<vmem>>, vector<16x32xf32>,
    %c1_i32 = arith.constant 1 : i32
    %353 = arith.cmpi eq, %arg1, %c1_i32 : i32
    %354 = arith.extui %353 : i1 to i32
    %c0_i32_179 = arith.constant 0 : i32
    %355 = arith.cmpi ne, %354, %c0_i32_179 : i32
    scf.if %355 {
      %356 = vector.shape_cast %351 : vector<16x32xf32> to vector<2x8x32xf32>
      %c0_180 = arith.constant 0 : index
      %c0_181 = arith.constant 0 : index
      %c0_182 = arith.constant 0 : index
      %357 = vector.load %arg18[%c0_180, %c0_181, %c0_182] : memref<2x8x32xf32, #tpu.memory_space<vmem>>, vector<2x8x32xf32>
      tpu.vector_store %arg18[%c0_180, %c0_181, %c0_182], %356 {strides = array<i32>} : memref<2x8x32xf32, #tpu.memory_space<vmem>>, vector<2x8x32xf32>,
    } else {
    }
    return
  }
  func.func @transform_0(%arg0: i32, %arg1: i32) -> (i32, i32, i32) {
    %c0_i32 = arith.constant 0 : i32
    %c0_i32_0 = arith.constant 0 : i32
    %c0_i32_1 = arith.constant 0 : i32
    return %arg0, %c0_i32, %c0_i32_0 : i32, i32, i32
  }
  func.func @transform_1(%arg0: i32, %arg1: i32) -> (i32, i32, i32) {
    %c0_i32 = arith.constant 0 : i32
    %c0_i32_0 = arith.constant 0 : i32
    %c0_i32_1 = arith.constant 0 : i32
    return %arg0, %c0_i32, %c0_i32_0 : i32, i32, i32
  }
  func.func @transform_2(%arg0: i32, %arg1: i32) -> (i32, i32, i32, i32) {
    %c0_i32 = arith.constant 0 : i32
    %c0_i32_0 = arith.constant 0 : i32
    %c0_i32_1 = arith.constant 0 : i32
    %c0_i32_2 = arith.constant 0 : i32
    return %arg1, %c0_i32, %c0_i32_0, %c0_i32_1 : i32, i32, i32, i32
  }
  func.func @transform_3(%arg0: i32, %arg1: i32) -> (i32, i32, i32, i32) {
    %c0_i32 = arith.constant 0 : i32
    %c0_i32_0 = arith.constant 0 : i32
    %c0_i32_1 = arith.constant 0 : i32
    %c0_i32_2 = arith.constant 0 : i32
    return %arg1, %c0_i32, %c0_i32_0, %c0_i32_1 : i32, i32, i32, i32
  }
  func.func @transform_4(%arg0: i32, %arg1: i32) -> (i32, i32, i32, i32) {
    %c0_i32 = arith.constant 0 : i32
    %c0_i32_0 = arith.constant 0 : i32
    %c0_i32_1 = arith.constant 0 : i32
    %c0_i32_2 = arith.constant 0 : i32
    return %arg1, %c0_i32, %c0_i32_0, %c0_i32_1 : i32, i32, i32, i32
  }
  func.func @transform_5(%arg0: i32, %arg1: i32) -> (i32, i32, i32) {
    %c0_i32 = arith.constant 0 : i32
    %c0_i32_0 = arith.constant 0 : i32
    %c0_i32_1 = arith.constant 0 : i32
    return %arg1, %c0_i32, %c0_i32_0 : i32, i32, i32
  }
  func.func @transform_6(%arg0: i32, %arg1: i32) -> (i32, i32, i32, i32) {
    %c0_i32 = arith.constant 0 : i32
    %c0_i32_0 = arith.constant 0 : i32
    %c0_i32_1 = arith.constant 0 : i32
    %c0_i32_2 = arith.constant 0 : i32
    return %arg1, %c0_i32, %c0_i32_0, %c0_i32_1 : i32, i32, i32, i32
  }
  func.func @transform_7(%arg0: i32, %arg1: i32) -> (i32, i32, i32, i32) {
    %c0_i32 = arith.constant 0 : i32
    %c0_i32_0 = arith.constant 0 : i32
    %c0_i32_1 = arith.constant 0 : i32
    %c0_i32_2 = arith.constant 0 : i32
    return %arg1, %c0_i32, %c0_i32_0, %c0_i32_1 : i32, i32, i32, i32
  }
  func.func @transform_8(%arg0: i32, %arg1: i32) -> (i32, i32, i32, i32) {
    %c0_i32 = arith.constant 0 : i32
    %c0_i32_0 = arith.constant 0 : i32
    %c0_i32_1 = arith.constant 0 : i32
    %c0_i32_2 = arith.constant 0 : i32
    return %arg1, %c0_i32, %c0_i32_0, %c0_i32_1 : i32, i32, i32, i32
  }
  func.func @transform_9(%arg0: i32, %arg1: i32) -> (i32, i32, i32) {
    %c0_i32 = arith.constant 0 : i32
    %c0_i32_0 = arith.constant 0 : i32
    %c0_i32_1 = arith.constant 0 : i32
    return %arg1, %c0_i32, %c0_i32_0 : i32, i32, i32
  }
  func.func @transform_10(%arg0: i32, %arg1: i32) -> (i32, i32, i32) {
    %c0_i32 = arith.constant 0 : i32
    %c0_i32_0 = arith.constant 0 : i32
    %c0_i32_1 = arith.constant 0 : i32
    return %arg1, %c0_i32, %c0_i32_0 : i32, i32, i32
  }
  func.func @transform_11(%arg0: i32, %arg1: i32) -> (i32, i32, i32) {
    %c0_i32 = arith.constant 0 : i32
    %c0_i32_0 = arith.constant 0 : i32
    %c0_i32_1 = arith.constant 0 : i32
    return %arg1, %c0_i32, %c0_i32_0 : i32, i32, i32
  }
  func.func @transform_12(%arg0: i32, %arg1: i32) -> (i32, i32, i32) {
    %c0_i32 = arith.constant 0 : i32
    %c0_i32_0 = arith.constant 0 : i32
    %c0_i32_1 = arith.constant 0 : i32
    return %arg1, %c0_i32, %c0_i32_0 : i32, i32, i32
  }
  func.func @transform_13(%arg0: i32, %arg1: i32) -> (i32, i32, i32) {
    %c0_i32 = arith.constant 0 : i32
    %c0_i32_0 = arith.constant 0 : i32
    %c0_i32_1 = arith.constant 0 : i32
    return %arg1, %c0_i32, %c0_i32_0 : i32, i32, i32
  }
  func.func @transform_14(%arg0: i32, %arg1: i32) -> (i32, i32, i32) {
    %c0_i32 = arith.constant 0 : i32
    %c0_i32_0 = arith.constant 0 : i32
    %c0_i32_1 = arith.constant 0 : i32
    return %arg1, %c0_i32, %c0_i32_0 : i32, i32, i32
  }
  func.func @transform_15(%arg0: i32, %arg1: i32) -> (i32, i32, i32) {
    %c0_i32 = arith.constant 0 : i32
    %c0_i32_0 = arith.constant 0 : i32
    %c0_i32_1 = arith.constant 0 : i32
    return %arg1, %c0_i32, %c0_i32_0 : i32, i32, i32
  }
  func.func @transform_16(%arg0: i32, %arg1: i32) -> (i32, i32, i32) {
    %c0_i32 = arith.constant 0 : i32
    %c0_i32_0 = arith.constant 0 : i32
    %c0_i32_1 = arith.constant 0 : i32
    return %arg0, %c0_i32, %c0_i32_0 : i32, i32, i32
  }
}

</mosaic_0001>

<bundles_post_ra>
// kernel: tpu_custom_call.1
= control target key start
LH: loop header
LB: loop body
LE: loop exit
PB: predicated region body
PF: predicated region fallthrough
CT: control target
= control target key end

     0   :  { %s6585_s0 = inlined_call_operand.hbm [shape: f32[2,8,32], index: 0, kind: input, shape index: {}]   ;;  %s6586_s1 = inlined_call_operand.vmem [shape: f32[2,12,32], index: 1, kind: input, shape index: {}]   ;;  %s6587_s2 = inlined_call_operand.vmem [shape: bf16[2,3,32,32], index: 2, kind: input, shape index: {}]   ;;  %s6588_s3 = inlined_call_operand.hbm [shape: f32[2,3,1,32], index: 3, kind: input, shape index: {}]   ;;  %s6589_s4 = inlined_call_operand.hbm [shape: bf16[2,4,8,32], index: 4, kind: input, shape index: {}]   ;;  %s6590_s5 = inlined_call_operand.hbm [shape: f32[2,1,32], index: 5, kind: input, shape index: {}]   ;;  %s6591_s6 = inlined_call_operand.vmem [shape: bf16[2,3,32,32], index: 6, kind: input, shape index: {}]   ;;  %s6592_s7 = inlined_call_operand.hbm [shape: f32[2,3,1,32], index: 7, kind: input, shape index: {}]   ;;  %s6593_s8 = inlined_call_operand.hbm [shape: bf16[2,4,8,32], index: 8, kind: input, shape index: {}]   ;;  %s6594_s9 = inlined_call_operand.hbm [shape: f32[2,1,32], index: 9, kind: input, shape index: {}]   ;;  %s6595_s10 = inlined_call_operand.hbm [shape: bf16[2,32,64], index: 10, kind: input, shape index: {}]   ;;  %s6596_s11 = inlined_call_operand.hbm [shape: f32[2,1,64], index: 11, kind: input, shape index: {}]   ;;  %s6597_s12 = inlined_call_operand.vmem [shape: bf16[2,64,32], index: 12, kind: input, shape index: {}]   ;;  %s6598_s13 = inlined_call_operand.hbm [shape: f32[2,1,32], index: 13, kind: input, shape index: {}]   ;;  %s6599_s14 = inlined_call_operand.vmem [shape: f32[2,3,32], index: 14, kind: input, shape index: {}]   ;;  %s6600_s15 = inlined_call_operand.vmem [shape: f32[2,3,32], index: 15, kind: input, shape index: {}]   ;;  %s6601_s16 = inlined_call_operand.hbm [shape: f32[2,8,32], index: 16, kind: output, shape index: {}]  }
   0x1   :  { %6626 = sst [smem:[#allocation32_spill]] %s6585_s0 }
   0x2   :  { %6627 = sst [smem:[#allocation33_spill]] %s6586_s1 }
   0x3   :  { %6628 = sst [smem:[#allocation34_spill]] %s6587_s2 }
   0x4   :  { %6629 = sst [smem:[#allocation35_spill]] %s6588_s3 }
   0x5   :  { %6630 = sst [smem:[#allocation36_spill]] %s6589_s4 }
   0x6   :  { %6631 = sst [smem:[#allocation37_spill]] %s6590_s5 }
   0x7   :  { %6632 = sst [smem:[#allocation38_spill]] %s6591_s6 }
   0x8   :  { %6633 = sst [smem:[#allocation39_spill]] %s6592_s7 }
   0x9   :  { %6634 = sst [smem:[#allocation40_spill]] %s6593_s8 }
   0xa   :  { %6635 = sst [smem:[#allocation41_spill]] %s6594_s9 }
   0xb   :  { %6636 = sst [smem:[#allocation42_spill]] %s6595_s10 }
   0xc   :  { %6637 = sst [smem:[#allocation43_spill]] %s6596_s11 }
   0xd   :  { %6638 = sst [smem:[#allocation44_spill]] %s6597_s12 }
   0xe   :  { %6639 = sst [smem:[#allocation45_spill]] %s6598_s13 }
   0xf   :  { %6640 = sst [smem:[#allocation46_spill]] %s6599_s14 }
  0x10   :  { %6641 = sst [smem:[#allocation47_spill]] %s6600_s15 }
  0x11   :  { %6642 = sst [smem:[#allocation48_spill]] %s6601_s16 }
  0x12   :  { %21 = vsyncpa [#allocation4], 0 }
  0x13   :  { %22 = vsyncpa [#allocation7], 0 }
  0x14   :  { %24 = vsyncpa [#allocation7 + $0x1], 0 }
  0x15   :  { %25 = vsyncpa [#allocation10], 0 }
  0x16   :  { %27 = vsyncpa [#allocation10 + $0x1], 0 }
  0x17   :  { %28 = vsyncpa [#allocation13], 0 }
  0x18   :  { %30 = vsyncpa [#allocation13 + $0x1], 0 }
  0x19   :  { %31 = vsyncpa [#allocation16], 0 }
  0x1a   :  { %33 = vsyncpa [#allocation16 + $0x1], 0 }
  0x1b   :  { %34 = vsyncpa [#allocation19], 0 }
  0x1c   :  { %36 = vsyncpa [#allocation19 + $0x1], 0 }
  0x1d   :  { %37 = vsyncpa [#allocation5], 0  ;;  %s5561_s21 = smov 0   ;;  %s5563_s22 = smov 0  }
  0x1e   :  { %s5565_s23 = smov 0   ;;  %s5567_s24 = smov 0  }
  0x1f   :  { %s5569_s25 = smov 0   ;;  %s5571_s26 = smov 0  }
  0x20 LB: > { %6643 = sst [smem:[#allocation28_spill]] %s5438_s23  ;;  %s52_s27 = sadd.s32 1, %s5446_s25  ;;  %s5450_s26 = sphi %s5571_s26, %s43_s26   ;;  %s5446_s25 = sphi %s5569_s25, %s6703_s25   ;;  %s5442_s24 = sphi %s5567_s24, %s6702_s24   ;;  %s5438_s23 = sphi %s5565_s23, %s6698_s23   ;;  %s5434_s22 = sphi %s5563_s22, %s6701_s22   ;;  %s5430_s21 = sphi %s5561_s21, %s6700_s21  }
  0x21   : > { %6644 = sst [smem:[#allocation29_spill]] %s5450_s26  ;;  %s140_s28 = sadd.s32 1, %s5438_s23 }
  0x22   : > { %p53_p0 = scmp.ge.s32.totalorder %s52_s27, 2  ;;  %p147_p1 = scmp.ne.s32.totalorder %s5438_s23, %s5434_s22 }
  0x23   : > { %p148_p2 = scmp.eq.s32.totalorder %s5450_s26, 0  ;;  %p4884_p4 = scmp.lt.s32.totalorder %s5450_s26, 2 }
  0x24   : > { %s6705_s27 = smov (%p53_p0, %s52_s27), 0  ;;  %s5602_s30 = sand.u32 1, %s5450_s26  }
  0x25   : > { %6645 = sst [smem:[#allocation30_spill]] %s6705_s27  ;;  %p149_p3 = por %p148_p2, %p147_p1 }
  0x26   : > { %s137_s29 = ssub.s32 %s5446_s25, %s6705_s27  ;;  %s5605_s0 = sand.u32 1, %s5438_s23  }
  0x27   : > { %p138_p5 = scmp.eq.s32.totalorder %s137_s29, 0  ;;  %s6607_s17 = smul.u32 48, %s5446_s25 }
  0x28   : > { %s6608_s19 = smul.u32 3, %s5605_s0  ;;  %s6647_s3 = sld [smem:[#allocation35_spill]] }
  0x29   : > { %s5609_s18 = scalar_select %p138_p5, %s5438_s23, %s140_s28  }
  0x2a   : > { %p5619_p6 = pnand %p4884_p4, %p149_p3  ;;  %s553_s27 = scalar_lea.vmem [#allocation6], %s6608_s19 }
  0x2b   : > { %6646 = sst [smem:[#allocation31_spill]] %s5609_s18  ;;  %s560_s28 = sshll.u32 %s553_s27, 4  ;;  %s5625_s28 = int_to_ptr.vmem [resolvable:$true] %s560_s28 }
  0x2c   : > { %s6648_s29 = scalar_select %p5619_p6, 1, 0 }
  0x2d   : > { %p5632_p8 = pneg %p5619_p6 }
  0x2e   : > { %s5617_s1 = scalar_lea.hbm %s6647_s3, %s6607_s17  ;;  %s5057_s15 = scalar_lea.hbm %s6647_s3, 96 }
  0x2f   : > { %s5052_s23 = scalar_lea.hbm %s5617_s1, 48  ;;  %p5058_p11 = scmp.lt.u32.totalorder %s5617_s1, %s6647_s3 }
  0x30   : > { %p5053_p7 = scmp.ne.s32.totalorder %s5617_s1, %s5052_s23  ;;  %p5059_p12 = scmp.lt.u32.totalorder %s5057_s15, %s5052_s23 }
  0x31   : > { %s6649_s16 = scalar_select %p5632_p8, 1, 0 }
  0x32   : > { %p5055_p9 = pnand %p5632_p8, %p5053_p7  ;;  %p5060_p13 = por %p5059_p12, %p5058_p11 }
  0x33   : > { %p5061_p0 = scmp.lt.u32.totalorder %s5052_s23, %s5617_s1 }
  0x34   : > { %p5056_p10 = pneg %p5055_p9 }
  0x35   : > { %p5062_p1 = por %p5061_p0, %p5060_p13 }
  0x37   : > { %p5063_p2 = pnand %p5062_p1, %p5056_p10 }
  0x39   : > { %5066 = shalt.err (!%p5063_p2)
}
  0x3a   : > { %s5067_s18 = scalar_lea.vmem %s5625_s28, 48  ;;  %s5452_s17 = smov [#allocation6]  }
  0x3b   : > { %p5068_p3 = scmp.ne.s32.totalorder %s5625_s28, %s5067_s18  ;;  %s5072_s20 = sshll.u32 %s5452_s17, 4  ;;  %s5073_s20 = int_to_ptr.vmem [resolvable:$false] %s5072_s20 }
  0x3c   : > { %s5074_s19 = scalar_lea.vmem %s5073_s20, 96  ;;  %p5075_p7 = scmp.lt.s32.totalorder %s5625_s28, %s5073_s20 }
  0x3d   : > { %p5070_p4 = pnand %p5068_p3, %p5632_p8  ;;  %p5076_p9 = scmp.lt.s32.totalorder %s5074_s19, %s5067_s18 }
  0x3f   : > { %p5071_p5 = pneg %p5070_p4  ;;  %p5077_p11 = por %p5076_p9, %p5075_p7 }
  0x41   : > { %p5078_p12 = pnand %p5077_p11, %p5071_p5 }
  0x43   : > { %5081 = shalt.err (!%p5078_p12)
}
  0x44   : > { %s6609_s15 = smov 16   ;;  %s6610_s23 = smov 1  }
  0x45   : > { %s6650_s27 = scalar_lea.sflag [#allocation7], %s5602_s30  ;;  %s5661_s18 = sshll.u32 %s5446_s25, 4 }
  0x46   : > { %4858 = dma.hbm_to_vmem [thread:$0]  (!%p5619_p6), %s5617_s1, 48, %s5625_s28, %s6650_s27, %s6609_s15, %s6609_s15, %s6610_s23  }
  0x47   : > { %s6651_s5 = sld [smem:[#allocation37_spill]]  ;;  %s594_s3 = scalar_lea.vmem [#allocation9], %s5605_s0 }
  0x48   : > { %s601_s14 = sshll.u32 %s594_s3, 4  ;;  %s5673_s6 = sshll.u32 %s5605_s0, 4  ;;  %s5670_s14 = int_to_ptr.vmem [resolvable:$true] %s601_s14 }
  0x49   : > { %s6611_s2 = scalar_lea.sflag [#allocation10], %s5602_s30 }
  0x4d   : > { %s5667_s19 = scalar_lea.hbm %s6651_s5, %s5661_s18  ;;  %s5087_s17 = scalar_lea.hbm %s6651_s5, 32 }
  0x4e   : > { %s5082_s1 = scalar_lea.hbm %s5667_s19, 16  ;;  %p5088_p1 = scmp.lt.u32.totalorder %s5667_s19, %s6651_s5 }
  0x4f   : > { %p5083_p10 = scmp.ne.s32.totalorder %s5667_s19, %s5082_s1  ;;  %p5089_p2 = scmp.lt.u32.totalorder %s5087_s17, %s5082_s1 }
  0x50   : > { %p5091_p4 = scmp.lt.u32.totalorder %s5082_s1, %s5667_s19 }
  0x51   : > { %p5085_p13 = pnand %p5083_p10, %p5632_p8  ;;  %p5090_p3 = por %p5089_p2, %p5088_p1 }
  0x53   : > { %p5086_p0 = pneg %p5085_p13  ;;  %p5092_p5 = por %p5091_p4, %p5090_p3 }
  0x55   : > { %p5093_p7 = pnand %p5092_p5, %p5086_p0 }
  0x57   : > { %5096 = shalt.err (!%p5093_p7)
}
  0x58   : > { %s5097_s3 = scalar_lea.vmem %s5670_s14, 16  ;;  %s5455_s28 = smov [#allocation9]  }
  0x59   : > { %p5098_p9 = scmp.ne.s32.totalorder %s5670_s14, %s5097_s3  ;;  %s5102_s27 = sshll.u32 %s5455_s28, 4  ;;  %s5103_s27 = int_to_ptr.vmem [resolvable:$false] %s5102_s27 }
  0x5a   : > { %s5104_s15 = scalar_lea.vmem %s5103_s27, 32  ;;  %p5105_p10 = scmp.lt.s32.totalorder %s5670_s14, %s5103_s27 }
  0x5b   : > { %p5100_p11 = pnand %p5098_p9, %p5632_p8  ;;  %p5106_p13 = scmp.lt.s32.totalorder %s5104_s15, %s5097_s3 }
  0x5d   : > { %p5101_p12 = pneg %p5100_p11  ;;  %p5107_p1 = por %p5106_p13, %p5105_p10 }
  0x5f   : > { %p5108_p2 = pnand %p5107_p1, %p5101_p12 }
  0x61   : > { %5111 = shalt.err (!%p5108_p2)
}
  0x62   : > { %4864 = dma.hbm_to_vmem [thread:$0]  (!%p5619_p6), %s5667_s19, 16, %s5670_s14, %s6611_s2  }
  0x63   : > { %s5700_s1 = sshll.u32 %s5446_s25, 8  ;;  %s6652_s8 = sld [smem:[#allocation40_spill]] }
  0x64   : > { %s641_s28 = scalar_lea.vmem [#allocation12], %s5673_s6  ;;  %s6612_s15 = scalar_lea.sflag [#allocation13], %s5602_s30 }
  0x65   : > { %s648_s27 = sshll.u32 %s641_s28, 4  ;;  %s5709_s27 = int_to_ptr.vmem [resolvable:$true] %s648_s27 }
  0x69   : > { %s5706_s3 = scalar_lea.hbm %s6652_s8, %s5700_s1  ;;  %s5117_s17 = scalar_lea.hbm %s6652_s8, 512 }
  0x6a   : > { %s5112_s23 = scalar_lea.hbm %s5706_s3, 256  ;;  %p5118_p5 = scmp.lt.u32.totalorder %s5706_s3, %s6652_s8 }
  0x6b   : > { %p5113_p0 = scmp.ne.s32.totalorder %s5706_s3, %s5112_s23  ;;  %p5119_p7 = scmp.lt.u32.totalorder %s5117_s17, %s5112_s23 }
  0x6c   : > { %p5121_p11 = scmp.lt.u32.totalorder %s5112_s23, %s5706_s3 }
  0x6d   : > { %p5115_p3 = pnand %p5113_p0, %p5632_p8  ;;  %p5120_p9 = por %p5119_p7, %p5118_p5 }
  0x6f   : > { %p5116_p4 = pneg %p5115_p3  ;;  %p5122_p12 = por %p5121_p11, %p5120_p9 }
  0x71   : > { %p5123_p10 = pnand %p5122_p12, %p5116_p4 }
  0x73   : > { %5126 = shalt.err (!%p5123_p10)
}
  0x74   : > { %s5127_s28 = scalar_lea.vmem %s5709_s27, 256  ;;  %s5456_s14 = smov [#allocation12]  }
  0x75   : > { %p5128_p13 = scmp.ne.s32.totalorder %s5709_s27, %s5127_s28  ;;  %s5132_s19 = sshll.u32 %s5456_s14, 4  ;;  %s5133_s19 = int_to_ptr.vmem [resolvable:$false] %s5132_s19 }
  0x76   : > { %s5134_s2 = scalar_lea.vmem %s5133_s19, 512  ;;  %p5135_p0 = scmp.lt.s32.totalorder %s5709_s27, %s5133_s19 }
  0x77   : > { %p5130_p1 = pnand %p5128_p13, %p5632_p8  ;;  %p5136_p3 = scmp.lt.s32.totalorder %s5134_s2, %s5127_s28 }
  0x79   : > { %p5131_p2 = pneg %p5130_p1  ;;  %p5137_p5 = por %p5136_p3, %p5135_p0 }
  0x7b   : > { %p5138_p7 = pnand %p5137_p5, %p5131_p2 }
  0x7d   : > { %5141 = shalt.err (!%p5138_p7)
}
  0x7e   : > { %s6614_s23 = smov 64   ;;  %s6615_s17 = smov 4  }
  0x7f   : > { %4870 = dma.hbm_to_vmem [thread:$0]  (!%p5619_p6), %s5706_s3, 256, %s5709_s27, %s6612_s15, %s6614_s23, %s6614_s23, %s6615_s17  }
  0x80   : > { %s6653_s10 = sld [smem:[#allocation42_spill]]  ;;  %s679_s19 = scalar_lea.vmem [#allocation15], %s5673_s6 }
  0x81   : > { %s686_s2 = sshll.u32 %s679_s19, 4  ;;  %s6613_s5 = scalar_lea.sflag [#allocation16], %s5602_s30  ;;  %s5745_s2 = int_to_ptr.vmem [resolvable:$true] %s686_s2 }
  0x86   : > { %s5742_s14 = scalar_lea.hbm %s6653_s10, %s5700_s1  ;;  %s5147_s20 = scalar_lea.hbm %s6653_s10, 512 }
  0x87   : > { %s5142_s8 = scalar_lea.hbm %s5742_s14, 256  ;;  %p5148_p12 = scmp.lt.u32.totalorder %s5742_s14, %s6653_s10 }
  0x88   : > { %p5143_p4 = scmp.ne.s32.totalorder %s5742_s14, %s5142_s8  ;;  %p5149_p10 = scmp.lt.u32.totalorder %s5147_s20, %s5142_s8 }
  0x89   : > { %p5151_p1 = scmp.lt.u32.totalorder %s5142_s8, %s5742_s14 }
  0x8a   : > { %p5145_p9 = pnand %p5143_p4, %p5632_p8  ;;  %p5150_p13 = por %p5149_p10, %p5148_p12 }
  0x8c   : > { %p5146_p11 = pneg %p5145_p9  ;;  %p5152_p2 = por %p5151_p1, %p5150_p13 }
  0x8e   : > { %p5153_p0 = pnand %p5152_p2, %p5146_p11 }
  0x90   : > { %5156 = shalt.err (!%p5153_p0)
}
  0x91   : > { %s5157_s19 = scalar_lea.vmem %s5745_s2, 256  ;;  %s5459_s3 = smov [#allocation15]  }
  0x92   : > { %p5158_p3 = scmp.ne.s32.totalorder %s5745_s2, %s5157_s19  ;;  %s5162_s27 = sshll.u32 %s5459_s3, 4  ;;  %s5163_s27 = int_to_ptr.vmem [resolvable:$false] %s5162_s27 }
  0x93   : > { %s5164_s15 = scalar_lea.vmem %s5163_s27, 512  ;;  %p5165_p4 = scmp.lt.s32.totalorder %s5745_s2, %s5163_s27 }
  0x94   : > { %p5160_p5 = pnand %p5158_p3, %p5632_p8  ;;  %p5166_p9 = scmp.lt.s32.totalorder %s5164_s15, %s5157_s19 }
  0x96   : > { %p5161_p7 = pneg %p5160_p5  ;;  %p5167_p12 = por %p5166_p9, %p5165_p4 }
  0x98   : > { %p5168_p10 = pnand %p5167_p12, %p5161_p7 }
  0x9a   : > { %5171 = shalt.err (!%p5168_p10)
}
  0x9b   : > { %4876 = dma.hbm_to_vmem [thread:$0]  (!%p5619_p6), %s5742_s14, 256, %s5745_s2, %s6613_s5, %s6614_s23, %s6614_s23, %s6615_s17  }
  0x9c   : > { %s5775_s8 = sadd.s32 4294967295, %s5450_s26   ;;  %p153_p11 = scmp.ne.s32.totalorder %s5434_s22, %s5430_s21 }
  0x9d   : > { %p6617_p13 = scmp.eq.s32.totalorder %s5775_s8, 0  ;;  %p4259_p1 = scmp.ge.s32.totalorder %s5450_s26, 1 }
  0x9e   : > { %p502_p2 = scmp.lt.s32.totalorder %s5450_s26, 3  ;;  %s5460_s14 = smov [#allocation3]  }
  0x9f   : > { %p5784_p0 = por %p6617_p13, %p153_p11  ;;  %s517_s2 = sshll.u32 %s5460_s14, 4  ;;  %s518_s2 = int_to_ptr.vmem [resolvable:$true] %s517_s2 }
  0xa0   : > { %p5788_p3 = pnand %p4259_p1, %p502_p2  ;;  %s6657_s4 = sld [smem:[#allocation36_spill]] }
  0xa1   : > { %s6654_s20 = scalar_select %p5784_p0, 1, 0 }
  0xa2   : > { %s6655_s28 = scalar_select %p5788_p3, 1, 0 }
  0xa3   : > { %p4851_p5 = pneg %p5788_p3  ;;  %s574_s15 = scalar_lea.vmem [#allocation8], %s5673_s6 }
  0xa4   : > { %s581_s5 = sshll.u32 %s574_s15, 4  ;;  %s6658_s17 = sld [smem:[#allocation32_spill]]  ;;  %s5807_s5 = int_to_ptr.vmem [resolvable:$true] %s581_s5 }
  0xa5   : > { %p5796_p7 = pnand %p4851_p5, %p6617_p13 }
  0xa6   : > { %s5804_s27 = scalar_lea.hbm %s6657_s4, %s5700_s1 }
  0xa7   : > { %p5174_p9 = pneg %p5796_p7 }
  0xaa   : > { %s5172_s10 = scalar_lea.hbm %s6658_s17, 256 }
  0xab   : > { %p5173_p4 = scmp.ne.s32.totalorder %s6658_s17, %s5172_s10  ;;  %p5179_p11 = scmp.lt.u32.totalorder %s5172_s10, %s6658_s17 }
  0xad   : > { %p5175_p12 = pnand %p5174_p9, %p5173_p4 }
  0xaf   : > { %p5176_p10 = pneg %p5175_p12 }
  0xb1   : > { %p5181_p1 = pnand %p5179_p11, %p5176_p10 }
  0xb3   : > { %5184 = shalt.err (!%p5181_p1)
}
  0xb4   : > { %s5185_s6 = scalar_lea.vmem %s518_s2, 256  ;;  %p5193_p0 = scmp.lt.s32.totalorder %s518_s2, %s518_s2 }
  0xb5   : > { %p5186_p2 = scmp.ne.s32.totalorder %s518_s2, %s5185_s6  ;;  %p5194_p3 = scmp.lt.s32.totalorder %s5185_s6, %s5185_s6 }
  0xb7   : > { %p5188_p5 = pnand %p5186_p2, %p5174_p9  ;;  %p5195_p6 = por %p5194_p3, %p5193_p0 }
  0xb9   : > { %p5189_p13 = pneg %p5188_p5 }
  0xbb   : > { %p5196_p8 = pnand %p5195_p6, %p5189_p13 }
  0xbd   : > { %5199 = shalt.err (!%p5196_p8)
}
  0xbe   : > { %s5461_s12 = smov 128   ;;  %s5462_s26 = smov 8  }
  0xbf   : > { %4854 = dma.hbm_to_vmem [thread:$0]  (!%p5796_p7), %s6658_s17, 256, %s518_s2, [#allocation4], %s5461_s12, %s5461_s12, %s5462_s26  }
  0xc0   : > { %s5200_s23 = scalar_lea.hbm %s5804_s27, 256  ;;  %p6659_p9 = scmp.ne.s32.totalorder %s6649_s16, 0 }
  0xc1   : > { %p5201_p4 = scmp.ne.s32.totalorder %s5804_s27, %s5200_s23  ;;  %s5205_s19 = scalar_lea.hbm %s6657_s4, 512 }
  0xc2   : > { %p5206_p6 = scmp.lt.u32.totalorder %s5804_s27, %s6657_s4  ;;  %p5207_p8 = scmp.lt.u32.totalorder %s5205_s19, %s5200_s23 }
  0xc3   : > { %p5203_p12 = pnand %p5201_p4, %p6659_p9  ;;  %p5209_p3 = scmp.lt.u32.totalorder %s5200_s23, %s5804_s27 }
  0xc4   : > { %p5208_p13 = por %p5207_p8, %p5206_p6 }
  0xc5   : > { %p5204_p0 = pneg %p5203_p12 }
  0xc6   : > { %p5210_p10 = por %p5209_p3, %p5208_p13 }
  0xc8   : > { %p5211_p11 = pnand %p5210_p10, %p5204_p0 }
  0xca   : > { %5214 = shalt.err (!%p5211_p11)
}
  0xcb   : > { %s5215_s2 = scalar_lea.vmem %s5807_s5, 256  ;;  %s5463_s21 = smov [#allocation8]  }
  0xcc   : > { %p5216_p7 = scmp.ne.s32.totalorder %s5807_s5, %s5215_s2  ;;  %s5220_s12 = sshll.u32 %s5463_s21, 4  ;;  %s5221_s12 = int_to_ptr.vmem [resolvable:$false] %s5220_s12 }
  0xcd   : > { %s5222_s26 = scalar_lea.vmem %s5221_s12, 512  ;;  %p5223_p5 = scmp.lt.s32.totalorder %s5807_s5, %s5221_s12 }
  0xce   : > { %p5218_p1 = pnand %p5216_p7, %p6659_p9  ;;  %p5224_p4 = scmp.lt.s32.totalorder %s5222_s26, %s5215_s2 }
  0xd0   : > { %p5219_p2 = pneg %p5218_p1  ;;  %p5225_p12 = por %p5224_p4, %p5223_p5 }
  0xd2   : > { %p5226_p6 = pnand %p5225_p12, %p5219_p2 }
  0xd4   : > { %5229 = shalt.err (!%p5226_p6)
}
  0xd5   : > { %p6660_p0 = scmp.ne.s32.totalorder %s6648_s29, 0  ;;  %s6661_s10 = smov 4  }
  0xd6   : > { %s6662_s1 = smov 64   ;;  %s6663_s23 = scalar_lea.sflag [#allocation7], %s5602_s30 }
  0xd7   : > { %4861 = dma.hbm_to_vmem [thread:$0]  (!%p6660_p0), %s5804_s27, 256, %s5807_s5, %s6663_s23, %s6662_s1, %s6662_s1, %s6661_s10  }
  0xd8   : > { %s6664_s15 = smul.u32 48, %s5446_s25  ;;  %s6665_s7 = sld [smem:[#allocation39_spill]] }
  0xd9   : > { %s6666_s6 = smul.u32 3, %s5605_s0 }
  0xdb   : > { %s620_s2 = scalar_lea.vmem [#allocation11], %s6666_s6 }
  0xdc   : > { %s627_s21 = sshll.u32 %s620_s2, 4  ;;  %s5860_s21 = int_to_ptr.vmem [resolvable:$true] %s627_s21 }
  0xde   : > { %s5856_s3 = scalar_lea.hbm %s6665_s7, %s6664_s15  ;;  %s5235_s26 = scalar_lea.hbm %s6665_s7, 96 }
  0xdf   : > { %s5230_s12 = scalar_lea.hbm %s5856_s3, 48  ;;  %p5236_p10 = scmp.lt.u32.totalorder %s5856_s3, %s6665_s7 }
  0xe0   : > { %p5231_p8 = scmp.ne.s32.totalorder %s5856_s3, %s5230_s12  ;;  %p5237_p11 = scmp.lt.u32.totalorder %s5235_s26, %s5230_s12 }
  0xe1   : > { %p5239_p1 = scmp.lt.u32.totalorder %s5230_s12, %s5856_s3 }
  0xe2   : > { %p5233_p13 = pnand %p5231_p8, %p6659_p9  ;;  %p5238_p7 = por %p5237_p11, %p5236_p10 }
  0xe4   : > { %p5234_p3 = pneg %p5233_p13  ;;  %p5240_p2 = por %p5239_p1, %p5238_p7 }
  0xe6   : > { %p5241_p5 = pnand %p5240_p2, %p5234_p3 }
  0xe8   : > { %5244 = shalt.err (!%p5241_p5)
}
  0xe9   : > { %s5245_s23 = scalar_lea.vmem %s5860_s21, 48  ;;  %s5464_s15 = smov [#allocation11]  }
  0xea   : > { %p5246_p4 = scmp.ne.s32.totalorder %s5860_s21, %s5245_s23  ;;  %s5250_s14 = sshll.u32 %s5464_s15, 4  ;;  %s5251_s14 = int_to_ptr.vmem [resolvable:$false] %s5250_s14 }
  0xeb   : > { %s5252_s19 = scalar_lea.vmem %s5251_s14, 96  ;;  %p5253_p8 = scmp.lt.s32.totalorder %s5860_s21, %s5251_s14 }
  0xec   : > { %p5248_p12 = pnand %p5246_p4, %p6659_p9  ;;  %p5254_p13 = scmp.lt.s32.totalorder %s5252_s19, %s5245_s23 }
  0xee   : > { %p5249_p6 = pneg %p5248_p12  ;;  %p5255_p10 = por %p5254_p13, %p5253_p8 }
  0xf0   : > { %p5256_p11 = pnand %p5255_p10, %p5249_p6 }
  0xf2   : > { %5259 = shalt.err (!%p5256_p11)
}
  0xf3   : > { %s6667_s6 = smov 1   ;;  %s6668_s2 = smov 16  }
  0xf4   : > { %s6669_s12 = scalar_lea.sflag [#allocation10], %s5602_s30  ;;  %s6670_s9 = sld [smem:[#allocation41_spill]] }
  0xf5   : > { %4867 = dma.hbm_to_vmem [thread:$0]  (!%p6660_p0), %s5856_s3, 48, %s5860_s21, %s6669_s12, %s6668_s2, %s6668_s2, %s6667_s6  }
  0xf6   : > { %s661_s10 = scalar_lea.vmem [#allocation14], %s5605_s0 }
  0xf7   : > { %s668_s1 = sshll.u32 %s661_s10, 4  ;;  %s669_s1 = int_to_ptr.vmem [resolvable:$true] %s668_s1 }
  0xfa   : > { %s5892_s26 = scalar_lea.hbm %s6670_s9, %s5661_s18  ;;  %s5265_s3 = scalar_lea.hbm %s6670_s9, 32 }
  0xfb   : > { %s5260_s23 = scalar_lea.hbm %s5892_s26, 16  ;;  %p5266_p2 = scmp.lt.u32.totalorder %s5892_s26, %s6670_s9 }
  0xfc   : > { %p5261_p3 = scmp.ne.s32.totalorder %s5892_s26, %s5260_s23  ;;  %p5267_p5 = scmp.lt.u32.totalorder %s5265_s3, %s5260_s23 }
  0xfd   : > { %p5269_p12 = scmp.lt.u32.totalorder %s5260_s23, %s5892_s26 }
  0xfe   : > { %p5263_p7 = pnand %p5261_p3, %p6659_p9  ;;  %p5268_p4 = por %p5267_p5, %p5266_p2 }
 0x100   : > { %p5264_p1 = pneg %p5263_p7  ;;  %p5270_p6 = por %p5269_p12, %p5268_p4 }
 0x102   : > { %p5271_p8 = pnand %p5270_p6, %p5264_p1 }
 0x104   : > { %5274 = shalt.err (!%p5271_p8)
}
 0x105   : > { %s5275_s6 = scalar_lea.vmem %s669_s1, 16  ;;  %s5465_s2 = smov [#allocation14]  }
 0x106   : > { %p5276_p13 = scmp.ne.s32.totalorder %s669_s1, %s5275_s6  ;;  %s5280_s12 = sshll.u32 %s5465_s2, 4  ;;  %s5281_s12 = int_to_ptr.vmem [resolvable:$false] %s5280_s12 }
 0x107   : > { %s5282_s5 = scalar_lea.vmem %s5281_s12, 32  ;;  %p5283_p3 = scmp.lt.s32.totalorder %s669_s1, %s5281_s12 }
 0x108   : > { %p5278_p10 = pnand %p5276_p13, %p6659_p9  ;;  %p5284_p7 = scmp.lt.s32.totalorder %s5282_s5, %s5275_s6 }
 0x10a   : > { %p5279_p11 = pneg %p5278_p10  ;;  %p5285_p0 = por %p5284_p7, %p5283_p3 }
 0x10c   : > { %p5286_p2 = pnand %p5285_p0, %p5279_p11 }
 0x10e   : > { %5289 = shalt.err (!%p5286_p2)
}
 0x10f   : > { %p6671_p5 = scmp.ne.s32.totalorder %s6648_s29, 0  ;;  %s6672_s27 = scalar_lea.sflag [#allocation13], %s5602_s30 }
 0x110   : > { %s6673_s11 = sld [smem:[#allocation43_spill]]  ;;  %s699_s14 = scalar_lea.vmem [#allocation17], %s5605_s0 }
 0x111   : > { %4873 = dma.hbm_to_vmem [thread:$0]  (!%p6671_p5), %s5892_s26, 16, %s669_s1, %s6672_s27  }
 0x112   : > { %s706_s3 = sshll.u32 %s699_s14, 4  ;;  %s707_s3 = int_to_ptr.vmem [resolvable:$true] %s706_s3 }
 0x116   : > { %s5918_s15 = scalar_lea.hbm %s6673_s11, %s5661_s18  ;;  %s5295_s26 = scalar_lea.hbm %s6673_s11, 32 }
 0x117   : > { %s5290_s21 = scalar_lea.hbm %s5918_s15, 16  ;;  %p5296_p12 = scmp.lt.u32.totalorder %s5918_s15, %s6673_s11 }
 0x118   : > { %p5291_p0 = scmp.ne.s32.totalorder %s5918_s15, %s5290_s21  ;;  %p5297_p6 = scmp.lt.u32.totalorder %s5295_s26, %s5290_s21 }
 0x119   : > { %p5299_p13 = scmp.lt.u32.totalorder %s5290_s21, %s5918_s15 }
 0x11a   : > { %p5293_p1 = pnand %p5291_p0, %p6659_p9  ;;  %p5298_p8 = por %p5297_p6, %p5296_p12 }
 0x11c   : > { %p5294_p4 = pneg %p5293_p1  ;;  %p5300_p10 = por %p5299_p13, %p5298_p8 }
 0x11e   : > { %p5301_p11 = pnand %p5300_p10, %p5294_p4 }
 0x120   : > { %5304 = shalt.err (!%p5301_p11)
}
 0x121   : > { %s5305_s12 = scalar_lea.vmem %s707_s3, 16  ;;  %s5466_s5 = smov [#allocation17]  }
 0x122   : > { %p5306_p3 = scmp.ne.s32.totalorder %s707_s3, %s5305_s12  ;;  %s5310_s27 = sshll.u32 %s5466_s5, 4  ;;  %s5311_s27 = int_to_ptr.vmem [resolvable:$false] %s5310_s27 }
 0x123   : > { %s5312_s10 = scalar_lea.vmem %s5311_s27, 32  ;;  %p5313_p0 = scmp.lt.s32.totalorder %s707_s3, %s5311_s27 }
 0x124   : > { %p5308_p7 = pnand %p5306_p3, %p6659_p9  ;;  %p5314_p1 = scmp.lt.s32.totalorder %s5312_s10, %s5305_s12 }
 0x126   : > { %p5309_p2 = pneg %p5308_p7  ;;  %p5315_p5 = por %p5314_p1, %p5313_p0 }
 0x128   : > { %p5316_p6 = pnand %p5315_p5, %p5309_p2 }
 0x12a   : > { %5319 = shalt.err (!%p5316_p6)
}
 0x12b   : > { %p6674_p12 = scmp.ne.s32.totalorder %s6648_s29, 0  ;;  %s6675_s23 = scalar_lea.sflag [#allocation16], %s5602_s30 }
 0x12c   : > { %s6676_s13 = sld [smem:[#allocation45_spill]]  ;;  %s724_s6 = scalar_lea.vmem [#allocation18], %s5605_s0 }
 0x12d   : > { %4879 = dma.hbm_to_vmem [thread:$0]  (!%p6674_p12), %s5918_s15, 16, %s707_s3, %s6675_s23  }
 0x12e   : > { %s731_s26 = sshll.u32 %s724_s6, 4  ;;  %s722_s1 = scalar_lea.sflag [#allocation19], %s5605_s0  ;;  %s732_s26 = int_to_ptr.vmem [resolvable:$true] %s731_s26 }
 0x132   : > { %s5944_s19 = scalar_lea.hbm %s6676_s13, %s5661_s18  ;;  %s5325_s3 = scalar_lea.hbm %s6676_s13, 32 }
 0x133   : > { %s5320_s30 = scalar_lea.hbm %s5944_s19, 16  ;;  %p5326_p13 = scmp.lt.u32.totalorder %s5944_s19, %s6676_s13 }
 0x134   : > { %p5321_p5 = scmp.ne.s32.totalorder %s5944_s19, %s5320_s30  ;;  %p5327_p10 = scmp.lt.u32.totalorder %s5325_s3, %s5320_s30 }
 0x135   : > { %p5329_p3 = scmp.lt.u32.totalorder %s5320_s30, %s5944_s19 }
 0x136   : > { %p5323_p4 = pnand %p5321_p5, %p6659_p9  ;;  %p5328_p11 = por %p5327_p10, %p5326_p13 }
 0x138   : > { %p5324_p8 = pneg %p5323_p4  ;;  %p5330_p7 = por %p5329_p3, %p5328_p11 }
 0x13a   : > { %p5331_p2 = pnand %p5330_p7, %p5324_p8 }
 0x13c   : > { %5334 = shalt.err (!%p5331_p2)
}
 0x13d   : > { %s5335_s0 = scalar_lea.vmem %s732_s26, 16  ;;  %s5467_s5 = smov [#allocation18]  }
 0x13e   : > { %p5336_p0 = scmp.ne.s32.totalorder %s732_s26, %s5335_s0  ;;  %s5340_s27 = sshll.u32 %s5467_s5, 4  ;;  %s5341_s27 = int_to_ptr.vmem [resolvable:$false] %s5340_s27 }
 0x13f   : > { %s5342_s10 = scalar_lea.vmem %s5341_s27, 32  ;;  %p5343_p5 = scmp.lt.s32.totalorder %s732_s26, %s5341_s27 }
 0x140   : > { %p5338_p1 = pnand %p5336_p0, %p6659_p9  ;;  %p5344_p4 = scmp.lt.s32.totalorder %s5342_s10, %s5335_s0 }
 0x142   : > { %p5339_p6 = pneg %p5338_p1  ;;  %p5345_p12 = por %p5344_p4, %p5343_p5 }
 0x144   : > { %p5346_p10 = pnand %p5345_p12, %p5339_p6 }
 0x146   : > { %5349 = shalt.err (!%p5346_p10)
}
 0x147   : > { %p6677_p13 = scmp.ne.s32.totalorder %s6648_s29, 0  ;;  %p6678_p8 = scmp.ne.s32.totalorder %s6655_s28, 0 }
 0x148   : > { %p6679_p11 = scmp.eq.s32.totalorder (!%p6678_p8), %s5775_s8, 0 }
 0x149   : > { %4882 = dma.hbm_to_vmem [thread:$0]  (!%p6677_p13), %s5944_s19, 16, %s732_s26, %s722_s1  }
 0x14a   : > { %754 = sbr.rel (%p6678_p8) target bundleno = 8251 (0x203b), region = 84 }
 0x151   : > { %5401 = dma.done.wait (%p6679_p11), [#allocation4], 256   ;;  %p6680_p9 = pmov %p6679_p11 }
 0x152   : > { %s760_s16 = sand.u32 1, %s5775_s8   ;;  %s5973_s23 = sand.u32 1, %s5434_s22  }
 0x153   : > { %5403 = vsyncadd (%p6680_p9), [#allocation4], 4294967040  ;;  %s4823_s14 = smul.u32 3, %s5973_s23  ;;  %s761_s29 = scalar_lea.sflag [#allocation7], %s760_s16 }
 0x154   : > { %p6681_p12 = scmp.ne.s32.totalorder %s6654_s20, 0 }
 0x155   : > { %s5976_s21 = scalar_lea.vmem [#allocation6], %s4823_s14 }
 0x156   : > { %5405 = dma.done.wait (%p6681_p12), %s761_s29, 304  }
 0x157   : > { %5407 = vsyncadd (%p6681_p12), %s761_s29, 4294966992  ;;  %s5983_s28 = sshll.u32 %s5973_s23, 4  ;;  %s779_s6 = scalar_lea.sflag [#allocation10], %s760_s16 }
 0x158   : > { %s5986_s19 = scalar_lea.vmem [#allocation8], %s5983_s28 }
 0x159   : > { %5409 = dma.done.wait (%p6681_p12), %s779_s6, 64  }
 0x15a   : > { %5411 = vsyncadd (%p6681_p12), %s779_s6, 4294967232  ;;  %s5993_s1 = scalar_lea.vmem [#allocation11], %s4823_s14  ;;  %s796_s30 = scalar_lea.sflag [#allocation13], %s760_s16 }
 0x15b   : > { %s5996_s2 = scalar_lea.vmem [#allocation12], %s5983_s28 }
 0x15c   : > { %5413 = dma.done.wait (%p6681_p12), %s796_s30, 272  }
 0x15d   : > { %5415 = vsyncadd (%p6681_p12), %s796_s30, 4294967024  ;;  %s813_s3 = scalar_lea.sflag [#allocation16], %s760_s16 }
 0x15e   : > { %5417 = dma.done.wait (%p6681_p12), %s813_s3, 272  }
 0x15f   : > { %5419 = vsyncadd (%p6681_p12), %s813_s3, 4294967024  ;;  %s830_s0 = scalar_lea.sflag [#allocation19], %s5973_s23 }
 0x160   : > { %5421 = dma.done.wait (%p6681_p12), %s830_s0, 16  }
 0x161   : > { %5423 = vsyncadd (%p6681_p12), %s830_s0, 4294967280  ;;  %p949_p3 = scmp.lt.s32.totalorder %s5442_s24, 1  ;;  %s6682_s6 = sld [smem:[#allocation44_spill]] }
 0x162   : > { %s6683_s5 = sld [smem:[#allocation34_spill]]  ;;  %s6684_s0 = sld [smem:[#allocation38_spill]] }
 0x163   : > { %s950_s27 = scalar_select %p949_p3, %s5442_s24, 1 }
 0x164   : > { %s6685_s11 = sld [smem:[#allocation46_spill]]  ;;  %p4289_p7 = scmp.ne.s32.totalorder %s5442_s24, 0 }
 0x165   : > { %s4824_s10 = smul.u32 48, %s950_s27  ;;  %s4402_s16 = sshll.u32 %s950_s27, 5  ;;  %v978_v0 = vld [vmem:[#allocation3] sm:$0xff] (!%p4289_p7)  ;;  %vm980_vm0 = vcmask (!%p4289_p7), 261120   ;;  %v979_v1 = vld [vmem:[#allocation3 + $0x8] sm:$0xff] (!%p4289_p7) }
 0x166   : > { %s4287_s3 = sshll.u32 %s950_s27, 2  ;;  %981 = vst.msk [vmem:[#allocation2] sm:$0xff] (!%p4289_p7), %vm980_vm0, %v978_v0  ;;  %982 = vst.msk [vmem:[#allocation2 + $0x8] sm:$0xff] (!%p4289_p7), %vm980_vm0, %v979_v1 }
 0x167   : > { %s6020_s30 = scalar_lea.vmem %s6682_s6, %s4402_s16  ;;  %s6686_s16 = sld [smem:[#allocation47_spill]] }
 0x168   : > { %s6025_s15 = scalar_lea.vmem %s6683_s5, %s4824_s10  ;;  %s6030_s4 = scalar_lea.vmem %s6684_s0, %s4824_s10 }
 0x169   : > { %977 = sbr.rel (%p4289_p7) target bundleno = 368 (0x170), region = 128 }
 0x16a   : > { %s6035_s13 = scalar_lea.vmem %s6685_s11, %s4287_s3 }
 0x16d   : > { %s6040_s29 = scalar_lea.vmem %s6686_s16, %s4287_s3 }
 0x170 PF: > { %v4951_v2 = vld [vmem:[%s6025_s15 + $0x10] sm:$0xff]   ;;  %v5468_v3 = vmov 0.0   ;;  %v4952_v4 = vld [vmem:[%s6025_s15 + $0x18] sm:$0xff]   ;;  %v4953_v5 = vld [vmem:[%s6025_s15] sm:$0xff]   ;;  %vm5469_vm1 = vmmov 0   ;;  %vm1029_vm2 = vcmask 261120  }
 0x171   : > { %4519 = vmatprep.subr.bf16.mxu1 %v5468_v3  ;;  %4511 = vmatprep.subr.bf16.mxu0 %v5468_v3  ;;  %v6051_v6 = vld [vmem:[#allocation2] sm:$0xff]  ;;  %v6053_v7 = vld [vmem:[#allocation2 + $0x8] sm:$0xff]  ;;  %vm1212_vm3 = vcmask 64512   ;;  %s5470_s7 = smov 120   ;;  %vm1334_vm4 = vcmask 1043456   ;;  %s5471_s9 = smov 112  }
 0x172   : > { %4520 = vmatpush3.bf16.msra.mxu1 %v4951_v2  ;;  %4523 = vmatprep.mubr.msk.bf16.mxu1 %vm5469_vm1, %v5468_v3  ;;  %v4954_v8 = vld [vmem:[%s6025_s15 + $0x8] sm:$0xff]   ;;  %v985_v9 = vpack.c.bf16 %v6053_v7, %v6051_v6  ;;  %v4955_v10 = vld [vmem:[%s6025_s15 + $0x20] sm:$0xff]   ;;  %s5472_s11 = smov 104   ;;  %s6687_s17 = scalar_lea.vmem [#allocation9], %s5973_s23  ;;  %vm2719_vm5 = vcmask 1045504   ;;  %vm2691_vm6 = vcmask 97280  }
 0x173   : > { %4521 = vmatprep.subr.bf16.mxu1 %v5468_v3  ;;  %4515 = vmatprep.mubr.msk.bf16.mxu0 %vm5469_vm1, %v5468_v3  ;;  %v4956_v11 = vld [vmem:[%s6025_s15 + $0x28] sm:$0xff]   ;;  %v4299_v12 = vld [vmem:[%s5976_s21 + $0x1] ss:$0 sm:$0xff]  ;;  %v4290_v17 = vld [vmem:[%s5976_s21] ss:$0 sm:$0xff]  ;;  %s6688_s26 = sld [smem:[#allocation33_spill]] }
 0x174   : > { %4512 = vmatpush3.bf16.msra.mxu0 %v4953_v5  ;;  %v4308_v36 = vld [vmem:[%s5976_s21 + $0x2] ss:$0 sm:$0xff]  ;;  %vm3843_vm7 = vcmask 523264   ;;  %s6694_s3 = scalar_lea.vmem [#allocation18], %s5973_s23  ;;  %p4394_p2 = scmp.ne.s32.totalorder %s5442_s24, 1 }
 0x175   : > { %4513 = vmatprep.subr.bf16.mxu0 %v5468_v3 }
 0x176   : > { %4522 = vmatpush3.bf16.msra.mxu1 %v4952_v4 }
 0x177   : > { %4535 = vmatprep.subr.bf16.mxu1 %v5468_v3 }
 0x178   : > { %4514 = vmatpush3.bf16.msra.mxu0 %v4954_v8 }
 0x179   : > { %4524 = vmatmul.mubr.msk.bf16.vlgmr.msra.gmra.mrb[0].mxu1 %vm1029_vm2, %v985_v9  ;;  %4527 = vmatprep.subr.bf16.mxu0 %v5468_v3  ;;  %s6689_s15 = smov %s6688_s26 }
 0x17a   : > { %4537 = vmatprep.mubr.msk.bf16.mxu1 %vm5469_vm1, %v5468_v3 }
 0x17b   : > { %4516 = vmatmul.mubr.msk.bf16.vlgmr.msra.gmra.mrb[0].mxu0 %vm1029_vm2, %v985_v9 }
 0x17c   : > { %4528 = vmatpush3.bf16.msra.mxu0 %v4955_v10  ;;  %4531 = vmatprep.mubr.msk.bf16.mxu0 %vm5469_vm1, %v5468_v3 }
 0x17d   : > { %4529 = vmatprep.subr.bf16.mxu0 %v5468_v3 }
 0x180   : > { %4530 = vmatpush3.bf16.msra.mxu0 %v4956_v11 }
 0x181   : > { %4541 = vmatprep.subr.bf16.mxu0 %v5468_v3 }
 0x183   : > { %4532 = vmatmul.mubr.msk.bf16.vlgmr.msra.gmra.mrb[4].mxu0 %vm1029_vm2, %v985_v9 }
 0x184   : > { %4543 = vmatprep.mubr.msk.bf16.mxu0 %vm5469_vm1, %v5468_v3 }
 0x24c   : > { %v1133_v13 = vpop.f32.mrb[0].mxu1 }
 0x24d   : > { %v1134_v14 = vadd.f32 %v4299_v12, %v1133_v13  ;;  %v4525_v15 = vpop.f32.mrb[1].mxu1 }
 0x24e   : > { %v1136_v16 = vpop.f32.mrb[2].mxu1  ;;  %v1067_v18 = vpop.f32.mrb[0].mxu0 }
 0x24f   : > { %v6078_v19 = vpack.c.bf16 %v1134_v14, %v1134_v14  ;;  %v1137_v20 = vadd.f32 %v4299_v12, %v1136_v16  ;;  %v4526_v21 = vpop.f32.mrb[3].mxu1  ;;  %v4517_v22 = vpop.f32.mrb[1].mxu0  ;;  %v1068_v25 = vadd.f32 %v4290_v17, %v1067_v18 }
 0x250   : > { %v1070_v23 = vpop.f32.mrb[2].mxu0 }
 0x251   : > { %v6080_v24 = vpack.c.bf16 %v1137_v20, %v1137_v20  ;;  %v1217_v26 = vsel %vm1212_vm3, %v6078_v19, 0  ;;  %v4518_v27 = vpop.f32.mrb[3].mxu0  ;;  %v6089_v29 = vpack.c.bf16 %v1068_v25, %v1068_v25  ;;  %v1071_v30 = vadd.f32 %v4290_v17, %v1070_v23 }
 0x252   : > { %4536 = vmatpush3.bf16.xpose.msra.mxu1 %v1217_v26 }
 0x253   : > { %1482 = vrot.lane.b32.xlu1 %v6080_v24, %s5470_s7  ;;  %v1263_v28 = vsel %vm1212_vm3, %v6080_v24, 0  ;;  %4547 = vmatprep.subr.bf16.mxu1 %v5468_v3  ;;  %v6092_v34 = vpack.c.bf16 %v1071_v30, %v1071_v30 }
 0x254   : > { %4542 = vmatpush3.bf16.xpose.msra.mxu0 %v1263_v28 }
 0x255   : > { %4553 = vmatprep.subr.bf16.mxu0 %v5468_v3 }
 0x256   : > { %v1199_v31 = vpop.f32.mrb[4].mxu0 }
 0x257   : > { %v4533_v32 = vpop.f32.mrb[5].mxu0  ;;  %v1200_v37 = vadd.f32 %v4308_v36, %v1199_v31 }
 0x258   : > { %v1202_v33 = vpop.f32.mrb[6].mxu0 }
 0x259   : > { %4538 = vmatmul.mubr.msk.bf16.vlgmr.msra.gmra.mrb[4].mxu1 %vm1212_vm3, %v6089_v29  ;;  %v4534_v35 = vpop.f32.mrb[7].mxu0  ;;  %v1203_v38 = vadd.f32 %v4308_v36, %v1202_v33  ;;  %v6103_v39 = vpack.c.bf16 %v1200_v37, %v1200_v37 }
 0x25a   : > { %4549 = vmatprep.mubr.msk.bf16.mxu1 %vm5469_vm1, %v5468_v3 }
 0x25b   : > { %4544 = vmatmul.mubr.msk.bf16.vlgmr.msra.gmra.mrb[8].mxu0 %vm1212_vm3, %v6092_v34  ;;  %v6105_v40 = vpack.c.bf16 %v1203_v38, %v1203_v38  ;;  %v1336_v41 = vsel %vm1334_vm4, %v6103_v39, 0 }
 0x25c   : > { %4555 = vmatprep.mubr.msk.bf16.mxu0 %vm5469_vm1, %v5468_v3  ;;  %4548 = vmatpush3.bf16.msra.mxu1 %v1336_v41 }
 0x25d   : > { %v1382_v42 = vsel %vm1334_vm4, %v6105_v40, 0  ;;  %4559 = vmatprep.subr.bf16.mxu1 %v5468_v3 }
 0x25e   : > { %4554 = vmatpush3.bf16.msra.mxu0 %v1382_v42 }
 0x25f   : > { %4565 = vmatprep.subr.bf16.mxu0 %v5468_v3 }
 0x2c5   : > { %v1483_v1 = vpop.permute.xlu1 %1482 }
 0x2c6   : > { %v1488_v15 = vsel %vm1212_vm3, %v1483_v1, 0 }
 0x32c   : > { %v1253_v43 = vpop.f32.mrb[4].mxu1 }
 0x32d   : > { %v1305_v44 = vmul.f32 0.35355338, %v1253_v43  ;;  %v4539_v45 = vpop.f32.mrb[5].mxu1 }
 0x32e   : > { %v1256_v46 = vpop.f32.mrb[6].mxu1  ;;  %v1299_v47 = vpop.f32.mrb[8].mxu0 }
 0x32f   : > { %v1306_v48 = vmul.f32 0.35355338, %v1299_v47  ;;  %v4540_v49 = vpop.f32.mrb[7].mxu1  ;;  %v4545_v50 = vpop.f32.mrb[9].mxu0  ;;  %v1307_v51 = vsel %vm1212_vm3, %v1305_v44, -inf }
 0x330   : > { %1308 = vmax.xlane.f32.xlu0 %v1307_v51  ;;  %v1302_v52 = vpop.f32.mrb[10].mxu0 }
 0x331   : > { %v4546_v53 = vpop.f32.mrb[11].mxu0  ;;  %v1310_v54 = vsel %vm1212_vm3, %v1306_v48, -inf }
 0x334   : > { %1311 = vmax.xlane.f32.xlu0 %v1310_v54 }
 0x34a   : > { %1430 = vrot.lane.b32.xlu0 %v6078_v19, %s5470_s7 }
 0x3bd   : > { %v1309_v55 = vpop.xlane.xlu0 %1308 }
 0x3be   : > { %v1313_v56 = vsub.f32 %v1305_v44, %v1309_v55 }
 0x3c0   : > { %v1315_v57 = vmul.f32 1.442695, %v1313_v56 }
 0x3c1   : > { %v1312_v58 = vpop.xlane.xlu0 %1311 }
 0x3c2   : > { %4972 = vpow2.f32 %v1315_v57  ;;  %v1314_v59 = vsub.f32 %v1306_v48, %v1312_v58 }
 0x3c4   : > { %v1317_v60 = vmul.f32 1.442695, %v1314_v59 }
 0x3c5   : > { %v1431_v9 = vpop.permute.xlu0 %1430 }
 0x3c6   : > { %4974 = vpow2.f32 %v1317_v60  ;;  %v1436_v12 = vsel %vm1212_vm3, %v1431_v9, 0 }
 0x3cc   : > { %v4973_v61 = vpop.eup %4972 }
 0x3cd   : > { %v1319_v62 = vsel %vm1212_vm3, %v4973_v61, 0.0 }
 0x3ce   : > { %1320 = vadd.xlane.f32.xlu1 %v1319_v62  ;;  %v4320_v62 = vld [vmem:[%s5986_s19 + $0x4] sm:$0xf] }
 0x3cf   : > { %v1661_v1 = vsel %vm1334_vm4, %v4320_v62, 0 }
 0x3d0   : > { %v4975_v63 = vpop.eup %4974 }
 0x3d1   : > { %v1322_v0 = vsel %vm1212_vm3, %v4975_v63, 0.0 }
 0x3d2   : > { %1323 = vadd.xlane.f32.xlu1 %v1322_v0 }
 0x3e3   : > { %1427 = vrot.lane.b32.xlu1 %v6089_v29, %s5470_s7 }
 0x3e7   : > { %1479 = vrot.lane.b32.xlu1 %v6092_v34, %s5470_s7 }
 0x45b   : > { %v1321_v2 = vpop.xlane.xlu1 %1320 }
 0x45c   : > { %4976 = vrcp.f32 %v1321_v2 }
 0x45f   : > { %v1324_v4 = vpop.xlane.xlu1 %1323 }
 0x460   : > { %4978 = vrcp.f32 %v1324_v4  ;;  %v1425_v4 = vld [vmem:[%s5986_s19] sm:$0xf] }
 0x461   : > { %v1708_v9 = vsel %vm1334_vm4, %v1425_v4, 0 }
 0x463   : > { %v1428_v16 = vpop.permute.xlu1 %1427 }
 0x466   : > { %v4977_v5 = vpop.eup %4976 }
 0x467   : > { %v1327_v8 = vmul.f32 %v4977_v5, %v4973_v61  ;;  %v1480_v17 = vpop.permute.xlu1 %1479 }
 0x469   : > { %v1329_v10 = vpack.c.bf16 %v1327_v8, %v1327_v8 }
 0x46a   : > { %v4979_v11 = vpop.eup %4978 }
 0x46b   : > { %v1328_v13 = vmul.f32 %v4979_v11, %v4975_v63  ;;  %4550 = vmatmul.mubr.msk.bf16.vlgmr.msra.gmra.mrb[8].mxu1 %vm1212_vm3, %v1329_v10 }
 0x46c   : > { %4560 = vmatpush3.bf16.xpose.msra.mxu1 %v1436_v12  ;;  %4561 = vmatprep.mubr.msk.bf16.mxu1 %vm5469_vm1, %v5468_v3 }
 0x46d   : > { %v1330_v14 = vpack.c.bf16 %v1328_v13, %v1328_v13  ;;  %4571 = vmatprep.subr.bf16.mxu1 %v5468_v3 }
 0x46f   : > { %4556 = vmatmul.mubr.msk.bf16.vlgmr.msra.gmra.mrb[12].mxu0 %vm1212_vm3, %v1330_v14 }
 0x470   : > { %4566 = vmatpush3.bf16.xpose.msra.mxu0 %v1488_v15  ;;  %4567 = vmatprep.mubr.msk.bf16.mxu0 %vm5469_vm1, %v5468_v3 }
 0x471   : > { %4577 = vmatprep.subr.bf16.mxu0 %v5468_v3 }
 0x473   : > { %4562 = vmatmul.mubr.msk.bf16.vlgmr.msra.gmra.mrb[12].mxu1 %vm1212_vm3, %v1428_v16 }
 0x474   : > { %4573 = vmatprep.mubr.msk.bf16.mxu1 %vm5469_vm1, %v5468_v3 }
 0x477   : > { %4568 = vmatmul.mubr.msk.bf16.vlgmr.msra.gmra.mrb[16].mxu0 %vm1212_vm3, %v1480_v17 }
 0x478   : > { %4579 = vmatprep.mubr.msk.bf16.mxu0 %vm5469_vm1, %v5468_v3 }
 0x53e   : > { %v6139_v18 = vpop.f32.mrb[8].mxu1 }
 0x53f   : > { %v4551_v20 = vpop.f32.mrb[9].mxu1 }
 0x540   : > { %v1375_v21 = vpop.f32.mrb[10].mxu1 }
 0x541   : > { %v4552_v22 = vpop.f32.mrb[11].mxu1 }
 0x542   : > { %v6141_v23 = vpop.f32.mrb[12].mxu0 }
 0x543   : > { %v1424_v25 = vpack.c.bf16 %v6141_v23, %v6139_v18  ;;  %v4557_v26 = vpop.f32.mrb[13].mxu0 }
 0x544   : > { %v1421_v27 = vpop.f32.mrb[14].mxu0 }
 0x545   : > { %v4558_v28 = vpop.f32.mrb[15].mxu0 }
 0x546   : > { %v1472_v30 = vpop.f32.mrb[12].mxu1 }
 0x547   : > { %v1530_v31 = vmul.f32 0.35355338, %v1472_v30  ;;  %v4563_v32 = vpop.f32.mrb[13].mxu1 }
 0x548   : > { %v1475_v33 = vpop.f32.mrb[14].mxu1 }
 0x549   : > { %v4564_v35 = vpop.f32.mrb[15].mxu1  ;;  %v1532_v36 = vsel %vm1212_vm3, %v1530_v31, -inf }
 0x54a   : > { %1533 = vmax.xlane.f32.xlu0 %v1532_v36  ;;  %v1524_v37 = vpop.f32.mrb[16].mxu0 }
 0x54b   : > { %v1531_v38 = vmul.f32 0.35355338, %v1524_v37  ;;  %v4569_v41 = vpop.f32.mrb[17].mxu0 }
 0x54c   : > { %v1527_v42 = vpop.f32.mrb[18].mxu0 }
 0x54d   : > { %v4570_v43 = vpop.f32.mrb[19].mxu0  ;;  %v1535_v44 = vsel %vm1212_vm3, %v1531_v38, -inf }
 0x54e   : > { %1536 = vmax.xlane.f32.xlu1 %v1535_v44 }
 0x55f   : > { %1606 = vrot.lane.b32.xlu1 %v6105_v40, %s5470_s7 }
 0x563   : > { %1753 = vrot.lane.b32.xlu1 %v6078_v19, %s5471_s9 }
 0x567   : > { %1803 = vrot.lane.b32.xlu1 %v6080_v24, %s5471_s9 }
 0x56b   : > { %1801 = vrot.lane.b32.xlu1 %v6092_v34, %s5471_s9 }
 0x5d7   : > { %v1534_v45 = vpop.xlane.xlu0 %1533 }
 0x5d8   : > { %v1538_v46 = vsub.f32 %v1530_v31, %v1534_v45 }
 0x5da   : > { %v1540_v47 = vmul.f32 1.442695, %v1538_v46 }
 0x5db   : > { %v1537_v48 = vpop.xlane.xlu1 %1536 }
 0x5dc   : > { %4980 = vpow2.f32 %v1540_v47  ;;  %v1539_v49 = vsub.f32 %v1531_v38, %v1537_v48 }
 0x5de   : > { %v1542_v50 = vmul.f32 1.442695, %v1539_v49 }
 0x5df   : > { %v1607_v51 = vpop.permute.xlu1 %1606 }
 0x5e0   : > { %4982 = vpow2.f32 %v1542_v50  ;;  %v1612_v52 = vsel %vm1334_vm4, %v1607_v51, 0 }
 0x5e1   : > { %4578 = vmatpush3.bf16.msra.mxu0 %v1612_v52 }
 0x5e2   : > { %4589 = vmatprep.subr.bf16.mxu0 %v5468_v3 }
 0x5e3   : > { %v1754_v10 = vpop.permute.xlu1 %1753 }
 0x5e4   : > { %v1759_v23 = vsel %vm1212_vm3, %v1754_v10, 0 }
 0x5e6   : > { %v4981_v53 = vpop.eup %4980 }
 0x5e7   : > { %v1544_v54 = vsel %vm1212_vm3, %v4981_v53, 0.0  ;;  %v1804_v11 = vpop.permute.xlu1 %1803 }
 0x5e8   : > { %1545 = vadd.xlane.f32.xlu0 %v1544_v54  ;;  %v1809_v12 = vsel %vm1212_vm3, %v1804_v11, 0 }
 0x5ea   : > { %v4983_v55 = vpop.eup %4982 }
 0x5eb   : > { %v1547_v56 = vsel %vm1212_vm3, %v4983_v55, 0.0  ;;  %v1802_v13 = vpop.permute.xlu1 %1801 }
 0x5ec   : > { %1548 = vadd.xlane.f32.xlu0 %v1547_v56 }
 0x602   : > { %1557 = vrot.lane.b32.xlu0 %v6103_v39, %s5470_s7 }
 0x606   : > { %1751 = vrot.lane.b32.xlu0 %v6089_v29, %s5471_s9 }
 0x675   : > { %v1546_v57 = vpop.xlane.xlu0 %1545 }
 0x676   : > { %4984 = vrcp.f32 %v1546_v57 }
 0x679   : > { %v1549_v58 = vpop.xlane.xlu0 %1548 }
 0x67a   : > { %4986 = vrcp.f32 %v1549_v58 }
 0x67d   : > { %v1558_v59 = vpop.permute.xlu0 %1557 }
 0x67e   : > { %v1563_v60 = vsel %vm1334_vm4, %v1558_v59, 0 }
 0x67f   : > { %4572 = vmatpush3.bf16.msra.mxu1 %v1563_v60 }
 0x680   : > { %v4985_v61 = vpop.eup %4984  ;;  %4583 = vmatprep.subr.bf16.mxu1 %v5468_v3 }
 0x681   : > { %v1552_v63 = vmul.f32 %v4985_v61, %v4981_v53  ;;  %v1752_v28 = vpop.permute.xlu0 %1751 }
 0x683   : > { %v1554_v0 = vpack.c.bf16 %v1552_v63, %v1552_v63 }
 0x684   : > { %v4987_v2 = vpop.eup %4986 }
 0x685   : > { %v1553_v5 = vmul.f32 %v4987_v2, %v4983_v55  ;;  %4574 = vmatmul.mubr.msk.bf16.vlgmr.msra.gmra.mrb[16].mxu1 %vm1212_vm3, %v1554_v0 }
 0x686   : > { %4584 = vmatpush3.bf16.msra.mxu1 %v1661_v1  ;;  %4585 = vmatprep.mubr.msk.bf16.mxu1 %vm5469_vm1, %v5468_v3 }
 0x687   : > { %v1555_v8 = vpack.c.bf16 %v1553_v5, %v1553_v5  ;;  %4595 = vmatprep.subr.bf16.mxu1 %v5468_v3 }
 0x689   : > { %4580 = vmatmul.mubr.msk.bf16.vlgmr.msra.gmra.mrb[20].mxu0 %vm1212_vm3, %v1555_v8 }
 0x68a   : > { %4590 = vmatpush3.bf16.msra.mxu0 %v1708_v9  ;;  %4591 = vmatprep.mubr.msk.bf16.mxu0 %vm5469_vm1, %v5468_v3 }
 0x68b   : > { %4601 = vmatprep.subr.bf16.mxu0 %v5468_v3 }
 0x691   : > { %4592 = vmatmul.mubr.msk.bf16.vlgmr.msra.gmra.mrb[24].mxu0 %vm1212_vm3, %v1424_v25 }
 0x692   : > { %4603 = vmatprep.mubr.msk.bf16.mxu0 %vm5469_vm1, %v5468_v3 }
 0x693   : > { %4602 = vmatpush3.bf16.xpose.msra.mxu0 %v1809_v12 }
 0x694   : > { %4613 = vmatprep.subr.bf16.mxu0 %v5468_v3 }
 0x69a   : > { %4604 = vmatmul.mubr.msk.bf16.vlgmr.msra.gmra.mrb[28].mxu0 %vm1212_vm3, %v1802_v13 }
 0x69b   : > { %4615 = vmatprep.mubr.msk.bf16.mxu0 %vm5469_vm1, %v5468_v3 }
 0x758   : > { %v1599_v14 = vpop.f32.mrb[16].mxu1 }
 0x759   : > { %v4575_v15 = vpop.f32.mrb[17].mxu1 }
 0x75a   : > { %v1602_v16 = vpop.f32.mrb[18].mxu1 }
 0x75b   : > { %v4576_v17 = vpop.f32.mrb[19].mxu1 }
 0x75c   : > { %v1648_v18 = vpop.f32.mrb[20].mxu0  ;;  %v4327_v17 = vld [vmem:[%s5986_s19 + $0x8] sm:$0xf] }
 0x75d   : > { %v1654_v20 = vpack.c.bf16 %v1648_v18, %v1599_v14  ;;  %v4581_v21 = vpop.f32.mrb[21].mxu0  ;;  %v1980_v18 = vsel %vm1334_vm4, %v4327_v17, 0 }
 0x75e   : > { %v1651_v22 = vpop.f32.mrb[22].mxu0 }
 0x75f   : > { %v4582_v25 = vpop.f32.mrb[23].mxu0  ;;  %4586 = vmatmul.mubr.msk.bf16.vlgmr.msra.gmra.mrb[20].mxu1 %vm1212_vm3, %v1654_v20 }
 0x760   : > { %4596 = vmatpush3.bf16.xpose.msra.mxu1 %v1759_v23  ;;  %4597 = vmatprep.mubr.msk.bf16.mxu1 %vm5469_vm1, %v5468_v3 }
 0x761   : > { %4607 = vmatprep.subr.bf16.mxu1 %v5468_v3 }
 0x764   : > { %v1744_v26 = vpop.f32.mrb[24].mxu0 }
 0x765   : > { %v4593_v27 = vpop.f32.mrb[25].mxu0 }
 0x766   : > { %v1747_v30 = vpop.f32.mrb[26].mxu0 }
 0x767   : > { %v4594_v31 = vpop.f32.mrb[27].mxu0  ;;  %4598 = vmatmul.mubr.msk.bf16.vlgmr.msra.gmra.mrb[24].mxu1 %vm1212_vm3, %v1752_v28 }
 0x768   : > { %4609 = vmatprep.mubr.msk.bf16.mxu1 %vm5469_vm1, %v5468_v3 }
 0x76d   : > { %v1845_v32 = vpop.f32.mrb[28].mxu0 }
 0x76e   : > { %v1852_v33 = vmul.f32 0.35355338, %v1845_v32  ;;  %v4605_v35 = vpop.f32.mrb[29].mxu0 }
 0x76f   : > { %v1848_v36 = vpop.f32.mrb[30].mxu0 }
 0x770   : > { %v4606_v37 = vpop.f32.mrb[31].mxu0  ;;  %v1856_v38 = vsel %vm1212_vm3, %v1852_v33, -inf }
 0x771   : > { %1857 = vmax.xlane.f32.xlu1 %v1856_v38 }
 0x782   : > { %1925 = vrot.lane.b32.xlu1 %v6105_v40, %s5471_s9 }
 0x786   : > { %2027 = vrot.lane.b32.xlu1 %v6078_v19, %s5472_s11 }
 0x78a   : > { %2077 = vrot.lane.b32.xlu1 %v6080_v24, %s5472_s11 }
 0x78e   : > { %2075 = vrot.lane.b32.xlu1 %v6092_v34, %s5472_s11 }
 0x7fe   : > { %v1858_v41 = vpop.xlane.xlu1 %1857 }
 0x7ff   : > { %v1860_v44 = vsub.f32 %v1852_v33, %v1858_v41 }
 0x801   : > { %v1863_v45 = vmul.f32 1.442695, %v1860_v44 }
 0x802   : > { %v1926_v42 = vpop.permute.xlu1 %1925 }
 0x803   : > { %v1931_v43 = vsel %vm1334_vm4, %v1926_v42, 0  ;;  %4988 = vpow2.f32 %v1863_v45 }
 0x804   : > { %4614 = vmatpush3.bf16.msra.mxu0 %v1931_v43 }
 0x805   : > { %4625 = vmatprep.subr.bf16.mxu0 %v5468_v3 }
 0x806   : > { %v2028_v1 = vpop.permute.xlu1 %2027 }
 0x807   : > { %v2033_v4 = vsel %vm1212_vm3, %v2028_v1, 0 }
 0x80a   : > { %v2078_v27 = vpop.permute.xlu1 %2077 }
 0x80b   : > { %v2083_v33 = vsel %vm1212_vm3, %v2078_v27, 0 }
 0x80d   : > { %v4989_v55 = vpop.eup %4988 }
 0x80e   : > { %v1868_v56 = vsel %vm1212_vm3, %v4989_v55, 0.0  ;;  %v2076_v36 = vpop.permute.xlu1 %2075 }
 0x832   : > { %v1697_v46 = vpop.f32.mrb[20].mxu1 }
 0x833   : > { %v6207_v47 = vadd.f32 %v1744_v26, %v1697_v46  ;;  %v4587_v48 = vpop.f32.mrb[21].mxu1 }
 0x834   : > { %v1700_v19 = vpop.f32.mrb[22].mxu1 }
 0x835   : > { %v6209_v49 = vadd.f32 %v1747_v30, %v1700_v19  ;;  %v4588_v24 = vpop.f32.mrb[23].mxu1 }
 0x83a   : > { %v1795_v50 = vpop.f32.mrb[24].mxu1 }
 0x83b   : > { %v1851_v34 = vmul.f32 0.35355338, %v1795_v50  ;;  %v4599_v51 = vpop.f32.mrb[25].mxu1 }
 0x83c   : > { %v1798_v52 = vpop.f32.mrb[26].mxu1 }
 0x83d   : > { %v4600_v53 = vpop.f32.mrb[27].mxu1  ;;  %v1853_v54 = vsel %vm1212_vm3, %v1851_v34, -inf }
 0x83e   : > { %1854 = vmax.xlane.f32.xlu0 %v1853_v54 }
 0x842   : > { %1869 = vadd.xlane.f32.xlu0 %v1868_v56 }
 0x8cb   : > { %v1855_v57 = vpop.xlane.xlu0 %1854 }
 0x8cc   : > { %v1859_v58 = vsub.f32 %v1851_v34, %v1855_v57 }
 0x8ce   : > { %v1861_v59 = vmul.f32 1.442695, %v1859_v58 }
 0x8cf   : > { %v1870_v60 = vpop.xlane.xlu0 %1869 }
 0x8d0   : > { %4990 = vpow2.f32 %v1861_v59 }
 0x8d1   : > { %4992 = vrcp.f32 %v1870_v60 }
 0x8da   : > { %v4991_v61 = vpop.eup %4990 }
 0x8db   : > { %v4993_v62 = vpop.eup %4992  ;;  %v1865_v63 = vsel %vm1212_vm3, %v4991_v61, 0.0 }
 0x8dc   : > { %v1874_v0 = vmul.f32 %v4993_v62, %v4989_v55  ;;  %1866 = vadd.xlane.f32.xlu0 %v1865_v63 }
 0x8de   : > { %v1876_v2 = vpack.c.bf16 %v1874_v0, %v1874_v0 }
 0x8e0   : > { %4616 = vmatmul.mubr.msk.bf16.vlgmr.msra.gmra.mrb[32].mxu0 %vm1212_vm3, %v1876_v2 }
 0x8e1   : > { %4626 = vmatpush3.bf16.xpose.msra.mxu0 %v2033_v4  ;;  %4627 = vmatprep.mubr.msk.bf16.mxu0 %vm5469_vm1, %v5468_v3 }
 0x8e2   : > { %4637 = vmatprep.subr.bf16.mxu0 %v5468_v3 }
 0x8f2   : > { %1877 = vrot.lane.b32.xlu0 %v6103_v39, %s5471_s9 }
 0x8f6   : > { %2025 = vrot.lane.b32.xlu0 %v6089_v29, %s5472_s11 }
 0x969   : > { %v1867_v5 = vpop.xlane.xlu0 %1866 }
 0x96a   : > { %4994 = vrcp.f32 %v1867_v5  ;;  %v4333_v5 = vld [vmem:[%s5986_s19 + $0xc] sm:$0xf] }
 0x96d   : > { %v1878_v8 = vpop.permute.xlu0 %1877 }
 0x96e   : > { %v1883_v9 = vsel %vm1334_vm4, %v1878_v8, 0  ;;  %v2254_v8 = vsel %vm1334_vm4, %v4333_v5, 0 }
 0x96f   : > { %4608 = vmatpush3.bf16.msra.mxu1 %v1883_v9 }
 0x970   : > { %4619 = vmatprep.subr.bf16.mxu1 %v5468_v3 }
 0x971   : > { %v2026_v10 = vpop.permute.xlu0 %2025 }
 0x972   : > { %4628 = vmatmul.mubr.msk.bf16.vlgmr.msra.gmra.mrb[36].mxu0 %vm1212_vm3, %v2026_v10 }
 0x973   : > { %4639 = vmatprep.mubr.msk.bf16.mxu0 %vm5469_vm1, %v5468_v3 }
 0x974   : > { %v4995_v11 = vpop.eup %4994 }
 0x975   : > { %v1873_v12 = vmul.f32 %v4995_v11, %v4991_v61 }
 0x977   : > { %v1875_v13 = vpack.c.bf16 %v1873_v12, %v1873_v12 }
 0x979   : > { %4610 = vmatmul.mubr.msk.bf16.vlgmr.msra.gmra.mrb[28].mxu1 %vm1212_vm3, %v1875_v13 }
 0x97a   : > { %4621 = vmatprep.mubr.msk.bf16.mxu1 %vm5469_vm1, %v5468_v3  ;;  %4620 = vmatpush3.bf16.msra.mxu1 %v1980_v18  ;;  %v4335_v18 = vld [vmem:[%s6687_s17] ss:$0 sm:$0xff] }
 0x97b   : > { %4631 = vmatprep.subr.bf16.mxu1 %v5468_v3 }
 0x9b3   : > { %v1967_v29 = vpop.f32.mrb[32].mxu0 }
 0x9b4   : > { %v4617_v14 = vpop.f32.mrb[33].mxu0 }
 0x9b5   : > { %v1970_v15 = vpop.f32.mrb[34].mxu0 }
 0x9b6   : > { %v4618_v16 = vpop.f32.mrb[35].mxu0 }
 0xa45   : > { %v2069_v20 = vpop.f32.mrb[36].mxu0 }
 0xa46   : > { %v2125_v21 = vmul.f32 0.35355338, %v2069_v20  ;;  %v4629_v22 = vpop.f32.mrb[37].mxu0 }
 0xa47   : > { %v2072_v23 = vpop.f32.mrb[38].mxu0 }
 0xa48   : > { %v4630_v25 = vpop.f32.mrb[39].mxu0  ;;  %v2127_v26 = vsel %vm1212_vm3, %v2125_v21, -inf }
 0xa49   : > { %2128 = vmax.xlane.f32.xlu0 %v2127_v26 }
 0xa4c   : > { %v1919_v28 = vpop.f32.mrb[28].mxu1 }
 0xa4d   : > { %v1973_v30 = vpack.c.bf16 %v1967_v29, %v1919_v28  ;;  %v4611_v31 = vpop.f32.mrb[29].mxu1 }
 0xa4e   : > { %v1922_v32 = vpop.f32.mrb[30].mxu1 }
 0xa4f   : > { %v4612_v35 = vpop.f32.mrb[31].mxu1  ;;  %4622 = vmatmul.mubr.msk.bf16.vlgmr.msra.gmra.mrb[32].mxu1 %vm1212_vm3, %v1973_v30 }
 0xa50   : > { %4632 = vmatpush3.bf16.xpose.msra.mxu1 %v2083_v33  ;;  %4633 = vmatprep.mubr.msk.bf16.mxu1 %vm5469_vm1, %v5468_v3  ;;  %v4957_v33 = vld [vmem:[%s6030_s4 + $0x10] sm:$0xff]  }
 0xa51   : > { %4643 = vmatprep.subr.bf16.mxu1 %v5468_v3 }
 0xa57   : > { %4634 = vmatmul.mubr.msk.bf16.vlgmr.msra.gmra.mrb[36].mxu1 %vm1212_vm3, %v2076_v36 }
 0xa58   : > { %4645 = vmatprep.mubr.msk.bf16.mxu1 %vm5469_vm1, %v5468_v3 }
 0xad6   : > { %v2129_v37 = vpop.xlane.xlu0 %2128 }
 0xad7   : > { %v2133_v38 = vsub.f32 %v2125_v21, %v2129_v37 }
 0xad9   : > { %v2135_v41 = vmul.f32 1.442695, %v2133_v38 }
 0xadb   : > { %4996 = vpow2.f32 %v2135_v41 }
 0xae5   : > { %v4997_v42 = vpop.eup %4996 }
 0xae6   : > { %v2139_v43 = vsel %vm1212_vm3, %v4997_v42, 0.0 }
 0xae7   : > { %2140 = vadd.xlane.f32.xlu0 %v2139_v43 }
 0xb22   : > { %v2016_v44 = vpop.f32.mrb[32].mxu1 }
 0xb23   : > { %v2023_v45 = vadd.f32 %v2016_v44, %v6207_v47  ;;  %v4623_v46 = vpop.f32.mrb[33].mxu1 }
 0xb24   : > { %v2019_v48 = vpop.f32.mrb[34].mxu1  ;;  %v988_v46 = vld [vmem:[%s6689_s15 + $0x10] sm:$0xff] }
 0xb25   : > { %v2024_v19 = vadd.f32 %v2019_v48, %v6209_v49  ;;  %v4624_v24 = vpop.f32.mrb[35].mxu1 }
 0xb26   : > { %v987_v24 = vld [vmem:[%s6689_s15 + $0x8] sm:$0xf] }
 0xb2a   : > { %v2119_v50 = vpop.f32.mrb[36].mxu1 }
 0xb2b   : > { %v2126_v34 = vmul.f32 0.35355338, %v2119_v50  ;;  %v4635_v51 = vpop.f32.mrb[37].mxu1  ;;  %v995_v50 = vcombine.high %v988_v46, %v988_v46 }
 0xb2c   : > { %v2122_v52 = vpop.f32.mrb[38].mxu1  ;;  %v997_v51 = vcombine.low %v987_v24, %v988_v46  ;;  %v4355_v46 = vld [vmem:[%s5993_s1 + $0x2] ss:$0 sm:$0xff] }
 0xb2d   : > { %v4636_v53 = vpop.f32.mrb[39].mxu1  ;;  %v2130_v54 = vsel %vm1212_vm3, %v2126_v34, -inf  ;;  %v989_v52 = vld [vmem:[%s6689_s15 + $0x18] sm:$0xf] }
 0xb2e   : > { %2131 = vmax.xlane.f32.xlu1 %v2130_v54  ;;  %v998_v53 = vcombine.low %v995_v50, %v989_v52 }
 0xb3f   : > { %2199 = vrot.lane.b32.xlu1 %v6105_v40, %s5472_s11 }
 0xb74   : > { %v2141_v60 = vpop.xlane.xlu0 %2140 }
 0xbbb   : > { %v2132_v55 = vpop.xlane.xlu1 %2131 }
 0xbbc   : > { %v2134_v56 = vsub.f32 %v2126_v34, %v2132_v55  ;;  %v1003_v55 = vpack.c.bf16 %v998_v53, %v998_v53 }
 0xbbe   : > { %v2137_v57 = vmul.f32 1.442695, %v2134_v56  ;;  %v4962_v56 = vld [vmem:[%s6030_s4] sm:$0xff]  }
 0xbbf   : > { %v2200_v47 = vpop.permute.xlu1 %2199 }
 0xbc0   : > { %4998 = vpow2.f32 %v2137_v57  ;;  %v2205_v58 = vsel %vm1334_vm4, %v2200_v47, 0  ;;  %v4963_v57 = vld [vmem:[%s6030_s4 + $0x8] sm:$0xff]   ;;  %v4964_v47 = vld [vmem:[%s6030_s4 + $0x20] sm:$0xff]  }
 0xbc1   : > { %4644 = vmatpush3.bf16.msra.mxu1 %v2205_v58  ;;  %5000 = vrcp.f32 %v2141_v60 }
 0xbc2   : > { %4655 = vmatprep.subr.bf16.mxu1 %v5468_v3 }
 0xbca   : > { %v4999_v49 = vpop.eup %4998 }
 0xbcb   : > { %v2142_v59 = vsel %vm1212_vm3, %v4999_v49, 0.0  ;;  %v5001_v40 = vpop.eup %5000 }
 0xbcc   : > { %2143 = vadd.xlane.f32.xlu0 %v2142_v59  ;;  %v2147_v62 = vmul.f32 %v5001_v40, %v4997_v42  ;;  %v2337_v59 = vlaneseq }
 0xbce   : > { %v2149_v1 = vpack.c.bf16 %v2147_v62, %v2147_v62 }
 0xbe2   : > { %2151 = vrot.lane.b32.xlu0 %v6103_v39, %s5472_s11 }
 0xc59   : > { %v2144_v61 = vpop.xlane.xlu0 %2143 }
 0xc5a   : > { %5002 = vrcp.f32 %v2144_v61 }
 0xc5d   : > { %v2152_v63 = vpop.permute.xlu0 %2151 }
 0xc5e   : > { %v2157_v0 = vsel %vm1334_vm4, %v2152_v63, 0  ;;  %v6296_v63 = vshrl.u32 %v2337_v59, 7 }
 0xc5f   : > { %4638 = vmatpush3.bf16.msra.mxu0 %v2157_v0 }
 0xc60   : > { %4649 = vmatprep.subr.bf16.mxu0 %v5468_v3  ;;  %v2339_v0 = vsub.s32 0, %v6296_v63 }
 0xc62   : > { %4640 = vmatmul.mubr.msk.bf16.vlgmr.msra.gmra.mrb[40].mxu0 %vm1212_vm3, %v2149_v1  ;;  %v6300_v1 = vld [vmem:[%s6035_s13] sm:$0x7] }
 0xc63   : > { %4651 = vmatprep.mubr.msk.bf16.mxu0 %vm5469_vm1, %v5468_v3  ;;  %4650 = vmatpush3.bf16.msra.mxu0 %v2254_v8 }
 0xc64   : > { %v5003_v39 = vpop.eup %5002  ;;  %4663 = vmatprep.subr.bf16.mxu0 %v4957_v33 }
 0xc65   : > { %v2148_v2 = vmul.f32 %v5003_v39, %v4999_v49  ;;  %v2340_v39 = vrot.slane %v6300_v1, %v2339_v0 }
 0xc67   : > { %v2150_v4 = vpack.c.bf16 %v2148_v2, %v2148_v2 }
 0xc69   : > { %4646 = vmatmul.mubr.msk.bf16.vlgmr.msra.gmra.mrb[40].mxu1 %vm1212_vm3, %v2150_v4  ;;  %v6304_v4 = vld [vmem:[%s6040_s29] sm:$0x7] }
 0xc6a   : > { %4659 = vmatprep.mubr.msk.bf16.mxu1 %vm5469_vm1, %v5468_v3  ;;  %4656 = vmatpush3.bf16.msra.mxu1 %v4962_v56 }
 0xc6b   : > { %4657 = vmatprep.subr.bf16.mxu1 %v5468_v3 }
 0xc6e   : > { %4658 = vmatpush3.bf16.msra.mxu1 %v4963_v57 }
 0xc6f   : > { %4671 = vmatprep.subr.bf16.mxu1 %v4964_v47 }
 0xd35   : > { %v2193_v9 = vpop.f32.mrb[40].mxu0 }
 0xd36   : > { %v4641_v10 = vpop.f32.mrb[41].mxu0 }
 0xd37   : > { %v2196_v11 = vpop.f32.mrb[42].mxu0 }
 0xd38   : > { %v4642_v12 = vpop.f32.mrb[43].mxu0  ;;  %v2346_v11 = vrot.slane %v6304_v4, %v2339_v0 }
 0xd3c   : > { %v2241_v13 = vpop.f32.mrb[40].mxu1 }
 0xd3d   : > { %v2247_v29 = vpack.c.bf16 %v2241_v13, %v2193_v9  ;;  %v4647_v14 = vpop.f32.mrb[41].mxu1 }
 0xd3e   : > { %v2244_v15 = vpop.f32.mrb[42].mxu1 }
 0xd3f   : > { %v4648_v16 = vpop.f32.mrb[43].mxu1  ;;  %4652 = vmatmul.mubr.msk.bf16.vlgmr.msra.gmra.mrb[44].mxu0 %vm1212_vm3, %v2247_v29  ;;  %v4965_v15 = vld [vmem:[%s6030_s4 + $0x28] sm:$0xff]  }
 0xd40   : > { %4664 = vmatpush3.bf16.msra.mxu0 %v4957_v33  ;;  %v4345_v16 = vld [vmem:[%s5993_s1 + $0x1] ss:$0 sm:$0xff] }
 0xe12   : > { %v2290_v17 = vpop.f32.mrb[44].mxu0 }
 0xe13   : > { %v2297_v20 = vadd.f32 %v2290_v17, %v2023_v45  ;;  %v4653_v21 = vpop.f32.mrb[45].mxu0  ;;  %v986_v45 = vld [vmem:[%s6688_s26] sm:$0xff] }
 0xe14   : > { %v2293_v22 = vpop.f32.mrb[46].mxu0  ;;  %v994_v48 = vcombine.high %v986_v45, %v986_v45 }
 0xe15   : > { %v2306_v23 = vadd.f32 %v4335_v18, %v2297_v20  ;;  %v2298_v25 = vadd.f32 %v2293_v22, %v2024_v19  ;;  %v4654_v26 = vpop.f32.mrb[47].mxu0  ;;  %v4958_v19 = vld [vmem:[%s6030_s4 + $0x18] sm:$0xff]   ;;  %s6690_s4 = scalar_lea.vmem [#allocation14], %s5973_s23 }
 0xe16   : > { %v996_v34 = vcombine.low %v986_v45, %v994_v48  ;;  %4665 = vmatprep.subr.bf16.mxu0 %v4958_v19 }
 0xe17   : > { %v2307_v27 = vadd.f32 %v4335_v18, %v2298_v25  ;;  %v2308_v28 = vadd.f32 %v2306_v23, %v6051_v6  ;;  %4666 = vmatpush3.bf16.msra.mxu0 %v4958_v19 }
 0xe18   : > { %v1002_v54 = vpack.c.bf16 %v997_v51, %v996_v34  ;;  %4679 = vmatprep.subr.bf16.mxu0 %v5468_v3 }
 0xe19   : > { %v2310_v30 = vsel %vm1029_vm2, %v2308_v28, 0.0  ;;  %v2309_v31 = vadd.f32 %v2307_v27, %v6053_v7 }
 0xe1a   : > { %2311 = vadd.xlane.f32.xlu1 %v2310_v30  ;;  %4667 = vmatprep.mubr.msk.bf16.mxu0 %vm1029_vm2, %v1002_v54 }
 0xe1b   : > { %v2313_v32 = vsel %vm1029_vm2, %v2309_v31, 0.0  ;;  %4668 = vmatmul.mubr.msk.bf16.vlgmr.msra.gmra.mrb[48].mxu0 %vm1029_vm2, %v1003_v55 }
 0xe1c   : > { %2314 = vadd.xlane.f32.xlu0 %v2313_v32  ;;  %4681 = vmatprep.mubr.msk.bf16.mxu0 %vm5469_vm1, %v5468_v3 }
 0xea7   : > { %v2312_v35 = vpop.xlane.xlu1 %2311 }
 0xea8   : > { %v2317_v36 = vmul.f32 0.03125, %v2312_v35 }
 0xea9   : > { %v2315_v37 = vpop.xlane.xlu0 %2314 }
 0xeaa   : > { %v2319_v38 = vsub.f32 %v2308_v28, %v2317_v36  ;;  %v2318_v41 = vmul.f32 0.03125, %v2315_v37  ;;  %v4336_v37 = vld [vmem:[%s5993_s1] ss:$0 sm:$0xff]  ;;  %s6691_s1 = scalar_lea.vmem [#allocation15], %s5983_s28  ;;  %s6693_s28 = scalar_lea.vmem [#allocation17], %s5973_s23 }
 0xeac   : > { %v2320_v42 = vsub.f32 %v2309_v31, %v2318_v41  ;;  %v2321_v43 = vmul.f32 %v2319_v38, %v2319_v38 }
 0xeae   : > { %v2323_v6 = vsel %vm1029_vm2, %v2321_v43, 0.0  ;;  %v2322_v44 = vmul.f32 %v2320_v42, %v2320_v42 }
 0xeaf   : > { %2324 = vadd.xlane.f32.xlu0 %v2323_v6 }
 0xeb0   : > { %v2326_v7 = vsel %vm1029_vm2, %v2322_v44, 0.0 }
 0xeb1   : > { %2327 = vadd.xlane.f32.xlu1 %v2326_v7 }
 0xeee   : > { %v4669_v17 = vpop.f32.mrb[48].mxu0 }
 0xeef   : > { %v2482_v18 = vpop.f32.mrb[49].mxu0  ;;  %v2491_v20 = vadd.f32 %v4669_v17, %v4345_v16 }
 0xef0   : > { %v2483_v21 = vadd.f32 %v4345_v16, %v2482_v18  ;;  %v4670_v22 = vpop.f32.mrb[50].mxu0 }
 0xef1   : > { %v2485_v23 = vpop.f32.mrb[51].mxu0  ;;  %v2576_v27 = vcombine.high %v2491_v20, %v2491_v20 }
 0xef2   : > { %v2574_v25 = vcombine.high %v2483_v21, %v2483_v21  ;;  %v2486_v26 = vadd.f32 %v4345_v16, %v2485_v23 }
 0xef4   : > { %v2578_v28 = vcombine.low %v2483_v21, %v2574_v25  ;;  %v2575_v30 = vcombine.high %v2486_v26, %v2486_v26 }
 0xef6   : > { %v2579_v31 = vcombine.low %v2575_v30, %v2491_v20  ;;  %v6315_v32 = vpack.c.bf16 %v2486_v26, %v2578_v28 }
 0xef8   : > { %v6317_v33 = vpack.c.bf16 %v2576_v27, %v2579_v31  ;;  %v2601_v35 = vsel %vm1212_vm3, %v6315_v32, 0 }
 0xef9   : > { %4680 = vmatpush3.bf16.xpose.msra.mxu0 %v2601_v35 }
 0xefa   : > { %v2647_v36 = vsel %vm1212_vm3, %v6317_v33, 0  ;;  %4691 = vmatprep.subr.bf16.mxu0 %v5468_v3 }
 0xf3c   : > { %v2325_v58 = vpop.xlane.xlu0 %2324 }
 0xf3d   : > { %v2329_v49 = vmul.f32 0.03125, %v2325_v58 }
 0xf3e   : > { %v2328_v60 = vpop.xlane.xlu1 %2327 }
 0xf3f   : > { %v2331_v40 = vadd.f32 1e-05, %v2329_v49  ;;  %v2330_v61 = vmul.f32 0.03125, %v2328_v60 }
 0xf41   : > { %5004 = vrsqrt.f32 %v2331_v40  ;;  %v2332_v62 = vadd.f32 1e-05, %v2330_v61 }
 0xf43   : > { %5006 = vrsqrt.f32 %v2332_v62 }
 0xf4b   : > { %v5005_v2 = vpop.eup %5004 }
 0xf4c   : > { %v2335_v5 = vmul.f32 %v5005_v2, %v2319_v38 }
 0xf4d   : > { %v5007_v8 = vpop.eup %5006 }
 0xf4e   : > { %v2341_v9 = vmul.f32 %v2340_v39, %v2335_v5  ;;  %v2336_v10 = vmul.f32 %v5007_v8, %v2320_v42 }
 0xf50   : > { %v2342_v12 = vmul.f32 %v2340_v39, %v2336_v10  ;;  %v2347_v13 = vadd.f32 %v2346_v11, %v2341_v9 }
 0xf52   : > { %v2348_v29 = vadd.f32 %v2346_v11, %v2342_v12 }
 0xf54   : > { %v2349_v14 = vpack.c.bf16 %v2348_v29, %v2347_v13 }
 0xf56   : > { %4660 = vmatmul.mubr.msk.bf16.vlgmr.msra.gmra.mrb[44].mxu1 %vm1029_vm2, %v2349_v14 }
 0xf57   : > { %4672 = vmatpush3.bf16.msra.mxu1 %v4964_v47  ;;  %4675 = vmatprep.mubr.msk.bf16.mxu1 %vm1029_vm2, %v1002_v54 }
 0xf58   : > { %4673 = vmatprep.subr.bf16.mxu1 %v4965_v15 }
 0xf5b   : > { %4674 = vmatpush3.bf16.msra.mxu1 %v4965_v15 }
 0xf5c   : > { %4685 = vmatprep.subr.bf16.mxu1 %v5468_v3 }
 0xf5e   : > { %4676 = vmatmul.mubr.msk.bf16.vlgmr.msra.gmra.mrb[48].mxu1 %vm1029_vm2, %v1003_v55 }
 0xf5f   : > { %4687 = vmatprep.mubr.msk.bf16.mxu1 %vm5469_vm1, %v5468_v3 }
 0xf64   : > { %4686 = vmatpush3.bf16.xpose.msra.mxu1 %v2647_v36 }
 0xf65   : > { %4697 = vmatprep.subr.bf16.mxu1 %v5468_v3 }
0x1029   : > { %v2410_v38 = vpop.f32.mrb[44].mxu1 }
0x102a   : > { %v2411_v41 = vadd.f32 %v4336_v37, %v2410_v38  ;;  %v4661_v42 = vpop.f32.mrb[45].mxu1 }
0x102b   : > { %v2413_v43 = vpop.f32.mrb[46].mxu1 }
0x102c   : > { %v6326_v6 = vpack.c.bf16 %v2411_v41, %v2411_v41  ;;  %v2414_v44 = vadd.f32 %v4336_v37, %v2413_v43  ;;  %v4662_v7 = vpop.f32.mrb[47].mxu1 }
0x102e   : > { %v6328_v45 = vpack.c.bf16 %v2414_v44, %v2414_v44  ;;  %4682 = vmatmul.mubr.msk.bf16.vlgmr.msra.gmra.mrb[52].mxu0 %vm1212_vm3, %v6326_v6 }
0x102f   : > { %4693 = vmatprep.mubr.msk.bf16.mxu0 %vm5469_vm1, %v5468_v3 }
0x1030   : > { %4688 = vmatmul.mubr.msk.bf16.vlgmr.msra.gmra.mrb[52].mxu1 %vm1212_vm3, %v6328_v45 }
0x1031   : > { %v4677_v48 = vpop.f32.mrb[48].mxu1  ;;  %4699 = vmatprep.mubr.msk.bf16.mxu1 %vm5469_vm1, %v5468_v3 }
0x1032   : > { %v2555_v19 = vpop.f32.mrb[49].mxu1  ;;  %v2564_v24 = vadd.f32 %v4677_v48, %v4355_v46 }
0x1033   : > { %v2556_v50 = vadd.f32 %v4355_v46, %v2555_v19  ;;  %v4678_v34 = vpop.f32.mrb[50].mxu1 }
0x1034   : > { %v2558_v51 = vpop.f32.mrb[51].mxu1  ;;  %v2589_v54 = vcombine.high %v2564_v24, %v2564_v24 }
0x1035   : > { %v2587_v52 = vcombine.high %v2556_v50, %v2556_v50  ;;  %v2559_v53 = vadd.f32 %v4355_v46, %v2558_v51 }
0x1037   : > { %v2591_v55 = vcombine.low %v2556_v50, %v2587_v52  ;;  %v2588_v56 = vcombine.high %v2559_v53, %v2559_v53 }
0x1039   : > { %v2592_v57 = vcombine.low %v2588_v56, %v2564_v24  ;;  %v6339_v47 = vpack.c.bf16 %v2559_v53, %v2591_v55 }
0x103b   : > { %v6341_v58 = vpack.c.bf16 %v2589_v54, %v2592_v57  ;;  %v2721_v49 = vsel %vm2719_vm5, %v6339_v47, 0 }
0x103c   : > { %4692 = vmatpush3.bf16.msra.mxu0 %v2721_v49 }
0x103d   : > { %v2767_v59 = vsel %vm2719_vm5, %v6341_v58, 0  ;;  %4703 = vmatprep.subr.bf16.mxu0 %v5468_v3 }
0x103e   : > { %4698 = vmatpush3.bf16.msra.mxu1 %v2767_v59 }
0x103f   : > { %4709 = vmatprep.subr.bf16.mxu1 %v5468_v3 }
0x1101   : > { %v2637_v60 = vpop.f32.mrb[52].mxu0 }
0x1102   : > { %v2689_v40 = vmul.f32 0.35355338, %v2637_v60  ;;  %v4683_v61 = vpop.f32.mrb[53].mxu0 }
0x1103   : > { %v2640_v62 = vpop.f32.mrb[54].mxu0  ;;  %v2683_v0 = vpop.f32.mrb[52].mxu1 }
0x1104   : > { %v2690_v39 = vmul.f32 0.35355338, %v2683_v0  ;;  %v4684_v2 = vpop.f32.mrb[55].mxu0  ;;  %v4689_v5 = vpop.f32.mrb[53].mxu1  ;;  %v2692_v8 = vsel %vm2691_vm6, %v2689_v40, -inf }
0x1105   : > { %v2686_v9 = vpop.f32.mrb[54].mxu1  ;;  %2693 = vmax.xlane.f32.xlu0 %v2692_v8 }
0x1106   : > { %v4690_v10 = vpop.f32.mrb[55].mxu1  ;;  %v2695_v11 = vsel %vm2691_vm6, %v2690_v39, -inf }
0x1107   : > { %2696 = vmax.xlane.f32.xlu1 %v2695_v11 }
0x1118   : > { %2867 = vrot.lane.b32.xlu1 %v6317_v33, %s5470_s7 }
0x1192   : > { %v2694_v12 = vpop.xlane.xlu0 %2693 }
0x1193   : > { %v2698_v13 = vsub.f32 %v2689_v40, %v2694_v12 }
0x1194   : > { %v2697_v29 = vpop.xlane.xlu1 %2696 }
0x1195   : > { %v2700_v14 = vmul.f32 1.442695, %v2698_v13  ;;  %v2699_v15 = vsub.f32 %v2690_v39, %v2697_v29 }
0x1197   : > { %5008 = vpow2.f32 %v2700_v14  ;;  %v2702_v16 = vmul.f32 1.442695, %v2699_v15 }
0x1198   : > { %v2868_v22 = vpop.permute.xlu1 %2867 }
0x1199   : > { %5010 = vpow2.f32 %v2702_v16  ;;  %v2873_v38 = vsel %vm1212_vm3, %v2868_v22, 0 }
0x11a1   : > { %v5009_v17 = vpop.eup %5008 }
0x11a2   : > { %v2704_v18 = vsel %vm2691_vm6, %v5009_v17, 0.0 }
0x11a3   : > { %v5011_v20 = vpop.eup %5010  ;;  %2705 = vadd.xlane.f32.xlu0 %v2704_v18 }
0x11a4   : > { %v2707_v21 = vsel %vm2691_vm6, %v5011_v20, 0.0 }
0x11a5   : > { %2708 = vadd.xlane.f32.xlu1 %v2707_v21 }
0x11b6   : > { %2812 = vrot.lane.b32.xlu1 %v6326_v6, %s5470_s7 }
0x11b9   : > { %2815 = vrot.lane.b32.xlu0 %v6315_v32, %s5470_s7 }
0x11ba   : > { %2864 = vrot.lane.b32.xlu1 %v6328_v45, %s5470_s7 }
0x1230   : > { %v2706_v23 = vpop.xlane.xlu0 %2705 }
0x1231   : > { %5012 = vrcp.f32 %v2706_v23 }
0x1232   : > { %v2709_v25 = vpop.xlane.xlu1 %2708 }
0x1233   : > { %5014 = vrcp.f32 %v2709_v25 }
0x1234   : > { %v2816_v30 = vpop.permute.xlu0 %2815 }
0x1235   : > { %v2821_v36 = vsel %vm1212_vm3, %v2816_v30, 0 }
0x1236   : > { %v2813_v41 = vpop.permute.xlu1 %2812 }
0x123a   : > { %v2865_v42 = vpop.permute.xlu1 %2864 }
0x123b   : > { %v5013_v26 = vpop.eup %5012 }
0x123c   : > { %v2712_v27 = vmul.f32 %v5013_v26, %v5009_v17  ;;  %v2810_v26 = vld [vmem:[%s5996_s2] sm:$0xf] }
0x123d   : > { %v5015_v28 = vpop.eup %5014  ;;  %v3093_v30 = vsel %vm1334_vm4, %v2810_v26, 0 }
0x123e   : > { %v2713_v31 = vmul.f32 %v5015_v28, %v5011_v20  ;;  %v2714_v35 = vpack.c.bf16 %v2712_v27, %v2712_v27  ;;  %v4368_v20 = vld [vmem:[%s5996_s2 + $0x4] sm:$0xf] }
0x123f   : > { %v3046_v23 = vsel %vm1334_vm4, %v4368_v20, 0 }
0x1240   : > { %4694 = vmatmul.mubr.msk.bf16.vlgmr.msra.gmra.mrb[56].mxu0 %vm2691_vm6, %v2714_v35  ;;  %v2715_v37 = vpack.c.bf16 %v2713_v31, %v2713_v31 }
0x1241   : > { %4704 = vmatpush3.bf16.xpose.msra.mxu0 %v2821_v36  ;;  %4705 = vmatprep.mubr.msk.bf16.mxu0 %vm5469_vm1, %v5468_v3 }
0x1242   : > { %4700 = vmatmul.mubr.msk.bf16.vlgmr.msra.gmra.mrb[56].mxu1 %vm2691_vm6, %v2715_v37  ;;  %4715 = vmatprep.subr.bf16.mxu0 %v5468_v3 }
0x1243   : > { %4710 = vmatpush3.bf16.xpose.msra.mxu1 %v2873_v38  ;;  %4711 = vmatprep.mubr.msk.bf16.mxu1 %vm5469_vm1, %v5468_v3 }
0x1244   : > { %4721 = vmatprep.subr.bf16.mxu1 %v5468_v3 }
0x1248   : > { %4706 = vmatmul.mubr.msk.bf16.vlgmr.msra.gmra.mrb[60].mxu0 %vm1212_vm3, %v2813_v41 }
0x1249   : > { %4717 = vmatprep.mubr.msk.bf16.mxu0 %vm5469_vm1, %v5468_v3 }
0x124a   : > { %4712 = vmatmul.mubr.msk.bf16.vlgmr.msra.gmra.mrb[60].mxu1 %vm1212_vm3, %v2865_v42 }
0x124b   : > { %4723 = vmatprep.mubr.msk.bf16.mxu1 %vm5469_vm1, %v5468_v3 }
0x1313   : > { %v6377_v43 = vpop.f32.mrb[56].mxu0 }
0x1314   : > { %v4695_v44 = vpop.f32.mrb[57].mxu0 }
0x1315   : > { %v2760_v7 = vpop.f32.mrb[58].mxu0  ;;  %v6379_v46 = vpop.f32.mrb[56].mxu1 }
0x1316   : > { %v2809_v48 = vpack.c.bf16 %v6379_v46, %v6377_v43  ;;  %v4696_v19 = vpop.f32.mrb[59].mxu0  ;;  %v4701_v24 = vpop.f32.mrb[57].mxu1 }
0x1317   : > { %v2806_v50 = vpop.f32.mrb[58].mxu1 }
0x1318   : > { %v4702_v34 = vpop.f32.mrb[59].mxu1 }
0x131b   : > { %v2857_v51 = vpop.f32.mrb[60].mxu0 }
0x131c   : > { %v2915_v52 = vmul.f32 0.35355338, %v2857_v51  ;;  %v4707_v53 = vpop.f32.mrb[61].mxu0 }
0x131d   : > { %v2860_v54 = vpop.f32.mrb[62].mxu0  ;;  %v2909_v55 = vpop.f32.mrb[60].mxu1 }
0x131e   : > { %v2916_v56 = vmul.f32 0.35355338, %v2909_v55  ;;  %v4708_v57 = vpop.f32.mrb[63].mxu0  ;;  %v4713_v49 = vpop.f32.mrb[61].mxu1  ;;  %v2917_v59 = vsel %vm2691_vm6, %v2915_v52, -inf }
0x131f   : > { %v2912_v60 = vpop.f32.mrb[62].mxu1  ;;  %2918 = vmax.xlane.f32.xlu0 %v2917_v59 }
0x1320   : > { %v4714_v40 = vpop.f32.mrb[63].mxu1  ;;  %v2920_v61 = vsel %vm2691_vm6, %v2916_v56, -inf }
0x1321   : > { %2921 = vmax.xlane.f32.xlu1 %v2920_v61 }
0x1332   : > { %2991 = vrot.lane.b32.xlu1 %v6341_v58, %s5470_s7 }
0x1336   : > { %3138 = vrot.lane.b32.xlu1 %v6315_v32, %s5471_s9 }
0x133a   : > { %3188 = vrot.lane.b32.xlu1 %v6317_v33, %s5471_s9 }
0x133e   : > { %3186 = vrot.lane.b32.xlu1 %v6328_v45, %s5471_s9 }
0x13ac   : > { %v2919_v62 = vpop.xlane.xlu0 %2918 }
0x13ad   : > { %v2923_v0 = vsub.f32 %v2915_v52, %v2919_v62 }
0x13ae   : > { %v2922_v39 = vpop.xlane.xlu1 %2921 }
0x13af   : > { %v2925_v2 = vmul.f32 1.442695, %v2923_v0  ;;  %v2924_v5 = vsub.f32 %v2916_v56, %v2922_v39 }
0x13b1   : > { %5016 = vpow2.f32 %v2925_v2  ;;  %v2927_v8 = vmul.f32 1.442695, %v2924_v5 }
0x13b2   : > { %v2992_v9 = vpop.permute.xlu1 %2991 }
0x13b3   : > { %5018 = vpow2.f32 %v2927_v8  ;;  %v2997_v10 = vsel %vm2719_vm5, %v2992_v9, 0 }
0x13b4   : > { %4722 = vmatpush3.bf16.msra.mxu1 %v2997_v10 }
0x13b5   : > { %4733 = vmatprep.subr.bf16.mxu1 %v5468_v3 }
0x13b6   : > { %v3139_v31 = vpop.permute.xlu1 %3138 }
0x13b7   : > { %v3144_v19 = vsel %vm1212_vm3, %v3139_v31, 0 }
0x13ba   : > { %v3189_v35 = vpop.permute.xlu1 %3188 }
0x13bb   : > { %v5017_v11 = vpop.eup %5016  ;;  %v3194_v36 = vsel %vm1212_vm3, %v3189_v35, 0 }
0x13bc   : > { %v2929_v12 = vsel %vm2691_vm6, %v5017_v11, 0.0 }
0x13bd   : > { %v5019_v13 = vpop.eup %5018  ;;  %2930 = vadd.xlane.f32.xlu0 %v2929_v12 }
0x13be   : > { %v2932_v29 = vsel %vm2691_vm6, %v5019_v13, 0.0  ;;  %v3187_v37 = vpop.permute.xlu1 %3186 }
0x13c1   : > { %2933 = vadd.xlane.f32.xlu0 %v2932_v29 }
0x13d7   : > { %2942 = vrot.lane.b32.xlu0 %v6339_v47, %s5470_s7 }
0x13db   : > { %3136 = vrot.lane.b32.xlu0 %v6326_v6, %s5471_s9 }
0x144a   : > { %v2931_v14 = vpop.xlane.xlu0 %2930 }
0x144b   : > { %5020 = vrcp.f32 %v2931_v14 }
0x144e   : > { %v2934_v15 = vpop.xlane.xlu0 %2933 }
0x144f   : > { %5022 = vrcp.f32 %v2934_v15 }
0x1452   : > { %v2943_v16 = vpop.permute.xlu0 %2942 }
0x1453   : > { %v2948_v17 = vsel %vm2719_vm5, %v2943_v16, 0 }
0x1454   : > { %4716 = vmatpush3.bf16.msra.mxu0 %v2948_v17 }
0x1455   : > { %v5021_v18 = vpop.eup %5020  ;;  %4727 = vmatprep.subr.bf16.mxu0 %v5468_v3 }
0x1456   : > { %v2937_v21 = vmul.f32 %v5021_v18, %v5017_v11  ;;  %v3137_v51 = vpop.permute.xlu0 %3136 }
0x1458   : > { %v2939_v22 = vpack.c.bf16 %v2937_v21, %v2937_v21 }
0x1459   : > { %v5023_v25 = vpop.eup %5022 }
0x145a   : > { %v2938_v27 = vmul.f32 %v5023_v25, %v5019_v13  ;;  %4718 = vmatmul.mubr.msk.bf16.vlgmr.msra.gmra.mrb[64].mxu0 %vm2691_vm6, %v2939_v22 }
0x145b   : > { %4728 = vmatpush3.bf16.msra.mxu0 %v3046_v23  ;;  %4729 = vmatprep.mubr.msk.bf16.mxu0 %vm5469_vm1, %v5468_v3 }
0x145c   : > { %v2940_v28 = vpack.c.bf16 %v2938_v27, %v2938_v27  ;;  %4739 = vmatprep.subr.bf16.mxu0 %v5468_v3 }
0x145e   : > { %4724 = vmatmul.mubr.msk.bf16.vlgmr.msra.gmra.mrb[64].mxu1 %vm2691_vm6, %v2940_v28 }
0x145f   : > { %4734 = vmatpush3.bf16.msra.mxu1 %v3093_v30  ;;  %4735 = vmatprep.mubr.msk.bf16.mxu1 %vm5469_vm1, %v5468_v3 }
0x1460   : > { %4745 = vmatprep.subr.bf16.mxu1 %v5468_v3 }
0x1466   : > { %4736 = vmatmul.mubr.msk.bf16.vlgmr.msra.gmra.mrb[68].mxu1 %vm1212_vm3, %v2809_v48 }
0x1467   : > { %4747 = vmatprep.mubr.msk.bf16.mxu1 %vm5469_vm1, %v5468_v3 }
0x1468   : > { %4746 = vmatpush3.bf16.xpose.msra.mxu1 %v3194_v36 }
0x1469   : > { %4757 = vmatprep.subr.bf16.mxu1 %v5468_v3 }
0x146f   : > { %4748 = vmatmul.mubr.msk.bf16.vlgmr.msra.gmra.mrb[72].mxu1 %vm1212_vm3, %v3187_v37 }
0x1470   : > { %4759 = vmatprep.mubr.msk.bf16.mxu1 %vm5469_vm1, %v5468_v3 }
0x152d   : > { %v2984_v38 = vpop.f32.mrb[64].mxu0 }
0x152e   : > { %v4719_v41 = vpop.f32.mrb[65].mxu0 }
0x152f   : > { %v2987_v42 = vpop.f32.mrb[66].mxu0 }
0x1530   : > { %v4720_v43 = vpop.f32.mrb[67].mxu0 }
0x1531   : > { %v3033_v44 = vpop.f32.mrb[64].mxu1 }
0x1532   : > { %v3039_v7 = vpack.c.bf16 %v3033_v44, %v2984_v38  ;;  %v4725_v46 = vpop.f32.mrb[65].mxu1  ;;  %v4375_v44 = vld [vmem:[%s5996_s2 + $0x8] sm:$0xf] }
0x1533   : > { %v3036_v48 = vpop.f32.mrb[66].mxu1 }
0x1534   : > { %v4726_v24 = vpop.f32.mrb[67].mxu1  ;;  %4730 = vmatmul.mubr.msk.bf16.vlgmr.msra.gmra.mrb[68].mxu0 %vm1212_vm3, %v3039_v7  ;;  %v3365_v7 = vsel %vm1334_vm4, %v4375_v44, 0 }
0x1535   : > { %4740 = vmatpush3.bf16.xpose.msra.mxu0 %v3144_v19  ;;  %4741 = vmatprep.mubr.msk.bf16.mxu0 %vm5469_vm1, %v5468_v3 }
0x1536   : > { %4751 = vmatprep.subr.bf16.mxu0 %v5468_v3 }
0x1539   : > { %v3129_v50 = vpop.f32.mrb[68].mxu1 }
0x153a   : > { %v4737_v34 = vpop.f32.mrb[69].mxu1 }
0x153b   : > { %v3132_v52 = vpop.f32.mrb[70].mxu1 }
0x153c   : > { %v4738_v53 = vpop.f32.mrb[71].mxu1  ;;  %4742 = vmatmul.mubr.msk.bf16.vlgmr.msra.gmra.mrb[72].mxu0 %vm1212_vm3, %v3137_v51 }
0x153d   : > { %4753 = vmatprep.mubr.msk.bf16.mxu0 %vm5469_vm1, %v5468_v3 }
0x1542   : > { %v3230_v54 = vpop.f32.mrb[72].mxu1 }
0x1543   : > { %v3237_v55 = vmul.f32 0.35355338, %v3230_v54  ;;  %v4749_v56 = vpop.f32.mrb[73].mxu1 }
0x1544   : > { %v3233_v57 = vpop.f32.mrb[74].mxu1 }
0x1545   : > { %v4750_v49 = vpop.f32.mrb[75].mxu1  ;;  %v3241_v59 = vsel %vm2691_vm6, %v3237_v55, -inf }
0x1546   : > { %3242 = vmax.xlane.f32.xlu1 %v3241_v59 }
0x1557   : > { %3310 = vrot.lane.b32.xlu1 %v6341_v58, %s5471_s9 }
0x155b   : > { %3412 = vrot.lane.b32.xlu1 %v6315_v32, %s5472_s11 }
0x155f   : > { %3462 = vrot.lane.b32.xlu1 %v6317_v33, %s5472_s11 }
0x1563   : > { %3460 = vrot.lane.b32.xlu1 %v6328_v45, %s5472_s11 }
0x15d3   : > { %v3243_v60 = vpop.xlane.xlu1 %3242 }
0x15d4   : > { %v3245_v62 = vsub.f32 %v3237_v55, %v3243_v60 }
0x15d6   : > { %v3248_v0 = vmul.f32 1.442695, %v3245_v62 }
0x15d7   : > { %v3311_v40 = vpop.permute.xlu1 %3310 }
0x15d8   : > { %v3316_v61 = vsel %vm2719_vm5, %v3311_v40, 0  ;;  %5024 = vpow2.f32 %v3248_v0 }
0x15d9   : > { %4758 = vmatpush3.bf16.msra.mxu1 %v3316_v61 }
0x15da   : > { %4769 = vmatprep.subr.bf16.mxu1 %v5468_v3 }
0x15db   : > { %v3413_v25 = vpop.permute.xlu1 %3412 }
0x15dc   : > { %v3418_v27 = vsel %vm1212_vm3, %v3413_v25, 0 }
0x15df   : > { %v3463_v51 = vpop.permute.xlu1 %3462 }
0x15e0   : > { %v3468_v56 = vsel %vm1212_vm3, %v3463_v51, 0 }
0x15e2   : > { %v5025_v29 = vpop.eup %5024 }
0x15e3   : > { %v3253_v14 = vsel %vm2691_vm6, %v5025_v29, 0.0  ;;  %v3461_v49 = vpop.permute.xlu1 %3460 }
0x1607   : > { %v3082_v39 = vpop.f32.mrb[68].mxu0 }
0x1608   : > { %v6445_v2 = vadd.f32 %v3129_v50, %v3082_v39  ;;  %v4731_v5 = vpop.f32.mrb[69].mxu0 }
0x1609   : > { %v3085_v32 = vpop.f32.mrb[70].mxu0 }
0x160a   : > { %v6447_v8 = vadd.f32 %v3132_v52, %v3085_v32  ;;  %v4732_v33 = vpop.f32.mrb[71].mxu0 }
0x160f   : > { %v3180_v9 = vpop.f32.mrb[72].mxu0 }
0x1610   : > { %v3236_v45 = vmul.f32 0.35355338, %v3180_v9  ;;  %v4743_v10 = vpop.f32.mrb[73].mxu0 }
0x1611   : > { %v3183_v11 = vpop.f32.mrb[74].mxu0 }
0x1612   : > { %v4744_v12 = vpop.f32.mrb[75].mxu0  ;;  %v3238_v13 = vsel %vm2691_vm6, %v3236_v45, -inf }
0x1613   : > { %3239 = vmax.xlane.f32.xlu0 %v3238_v13 }
0x1617   : > { %3254 = vadd.xlane.f32.xlu0 %v3253_v14 }
0x16a0   : > { %v3240_v15 = vpop.xlane.xlu0 %3239 }
0x16a1   : > { %v3244_v16 = vsub.f32 %v3236_v45, %v3240_v15 }
0x16a3   : > { %v3246_v17 = vmul.f32 1.442695, %v3244_v16 }
0x16a4   : > { %v3255_v18 = vpop.xlane.xlu0 %3254 }
0x16a5   : > { %5026 = vpow2.f32 %v3246_v17 }
0x16a6   : > { %5028 = vrcp.f32 %v3255_v18 }
0x16af   : > { %v5027_v20 = vpop.eup %5026 }
0x16b0   : > { %v5029_v21 = vpop.eup %5028  ;;  %v3250_v22 = vsel %vm2691_vm6, %v5027_v20, 0.0 }
0x16b1   : > { %v3259_v23 = vmul.f32 %v5029_v21, %v5025_v29  ;;  %3251 = vadd.xlane.f32.xlu0 %v3250_v22 }
0x16b3   : > { %v3261_v26 = vpack.c.bf16 %v3259_v23, %v3259_v23 }
0x16b5   : > { %4760 = vmatmul.mubr.msk.bf16.vlgmr.msra.gmra.mrb[76].mxu1 %vm2691_vm6, %v3261_v26 }
0x16b6   : > { %4770 = vmatpush3.bf16.xpose.msra.mxu1 %v3418_v27  ;;  %4771 = vmatprep.mubr.msk.bf16.mxu1 %vm5469_vm1, %v5468_v3 }
0x16b7   : > { %4781 = vmatprep.subr.bf16.mxu1 %v5468_v3 }
0x16c7   : > { %3262 = vrot.lane.b32.xlu0 %v6339_v47, %s5471_s9 }
0x16cb   : > { %3410 = vrot.lane.b32.xlu0 %v6326_v6, %s5472_s11 }
0x173e   : > { %v3252_v28 = vpop.xlane.xlu0 %3251 }
0x173f   : > { %5030 = vrcp.f32 %v3252_v28 }
0x1742   : > { %v3263_v30 = vpop.permute.xlu0 %3262 }
0x1743   : > { %v3268_v31 = vsel %vm2719_vm5, %v3263_v30, 0  ;;  %v4381_v30 = vld [vmem:[%s5996_s2 + $0xc] sm:$0xf]  ;;  %s6692_s2 = smov %s6691_s1 }
0x1744   : > { %4752 = vmatpush3.bf16.msra.mxu0 %v3268_v31  ;;  %v3639_v31 = vsel %vm1334_vm4, %v4381_v30, 0 }
0x1745   : > { %4763 = vmatprep.subr.bf16.mxu0 %v5468_v3 }
0x1746   : > { %v3411_v35 = vpop.permute.xlu0 %3410 }
0x1747   : > { %4772 = vmatmul.mubr.msk.bf16.vlgmr.msra.gmra.mrb[80].mxu1 %vm1212_vm3, %v3411_v35 }
0x1748   : > { %4783 = vmatprep.mubr.msk.bf16.mxu1 %vm5469_vm1, %v5468_v3 }
0x1749   : > { %v5031_v36 = vpop.eup %5030 }
0x174a   : > { %v3258_v37 = vmul.f32 %v5031_v36, %v5027_v20 }
0x174c   : > { %v3260_v38 = vpack.c.bf16 %v3258_v37, %v3258_v37 }
0x174e   : > { %4754 = vmatmul.mubr.msk.bf16.vlgmr.msra.gmra.mrb[76].mxu0 %vm2691_vm6, %v3260_v38 }
0x174f   : > { %4765 = vmatprep.mubr.msk.bf16.mxu0 %vm5469_vm1, %v5468_v3  ;;  %4764 = vmatpush3.bf16.msra.mxu0 %v3365_v7 }
0x1750   : > { %4775 = vmatprep.subr.bf16.mxu0 %v5468_v3 }
0x1788   : > { %v3352_v6 = vpop.f32.mrb[76].mxu1 }
0x1789   : > { %v4761_v41 = vpop.f32.mrb[77].mxu1 }
0x178a   : > { %v3355_v42 = vpop.f32.mrb[78].mxu1 }
0x178b   : > { %v4762_v43 = vpop.f32.mrb[79].mxu1 }
0x181a   : > { %v3454_v46 = vpop.f32.mrb[80].mxu1 }
0x181b   : > { %v3510_v48 = vmul.f32 0.35355338, %v3454_v46  ;;  %v4773_v19 = vpop.f32.mrb[81].mxu1  ;;  %v4383_v46 = vld [vmem:[%s6690_s4] ss:$0 sm:$0xff] }
0x181c   : > { %v3457_v24 = vpop.f32.mrb[82].mxu1 }
0x181d   : > { %v4774_v50 = vpop.f32.mrb[83].mxu1  ;;  %v3512_v34 = vsel %vm2691_vm6, %v3510_v48, -inf }
0x181e   : > { %3513 = vmax.xlane.f32.xlu0 %v3512_v34 }
0x1821   : > { %v3304_v52 = vpop.f32.mrb[76].mxu0 }
0x1822   : > { %v3358_v53 = vpack.c.bf16 %v3352_v6, %v3304_v52  ;;  %v4755_v54 = vpop.f32.mrb[77].mxu0 }
0x1823   : > { %v3307_v55 = vpop.f32.mrb[78].mxu0 }
0x1824   : > { %v4756_v57 = vpop.f32.mrb[79].mxu0  ;;  %4766 = vmatmul.mubr.msk.bf16.vlgmr.msra.gmra.mrb[80].mxu0 %vm1212_vm3, %v3358_v53  ;;  %v5048_v53 = vld [vmem:[#allocation2] sm:$0xff] }
0x1825   : > { %4776 = vmatpush3.bf16.xpose.msra.mxu0 %v3468_v56  ;;  %4777 = vmatprep.mubr.msk.bf16.mxu0 %vm5469_vm1, %v5468_v3  ;;  %v5049_v56 = vld [vmem:[#allocation2 + $0x8] sm:$0xff] }
0x1826   : > { %4787 = vmatprep.subr.bf16.mxu0 %v5468_v3 }
0x182c   : > { %4778 = vmatmul.mubr.msk.bf16.vlgmr.msra.gmra.mrb[84].mxu0 %vm1212_vm3, %v3461_v49 }
0x182d   : > { %4789 = vmatprep.mubr.msk.bf16.mxu0 %vm5469_vm1, %v5468_v3 }
0x18ab   : > { %v3514_v59 = vpop.xlane.xlu0 %3513 }
0x18ac   : > { %v3518_v60 = vsub.f32 %v3510_v48, %v3514_v59 }
0x18ae   : > { %v3520_v40 = vmul.f32 1.442695, %v3518_v60 }
0x18b0   : > { %5032 = vpow2.f32 %v3520_v40 }
0x18ba   : > { %v5033_v61 = vpop.eup %5032 }
0x18bb   : > { %v3524_v62 = vsel %vm2691_vm6, %v5033_v61, 0.0 }
0x18bc   : > { %3525 = vadd.xlane.f32.xlu0 %v3524_v62 }
0x18f7   : > { %v3401_v0 = vpop.f32.mrb[80].mxu0 }
0x18f8   : > { %v3408_v39 = vadd.f32 %v3401_v0, %v6445_v2  ;;  %v4767_v5 = vpop.f32.mrb[81].mxu0 }
0x18f9   : > { %v3404_v32 = vpop.f32.mrb[82].mxu0 }
0x18fa   : > { %v3409_v33 = vadd.f32 %v3404_v32, %v6447_v8  ;;  %v4768_v9 = vpop.f32.mrb[83].mxu0 }
0x18fb   : > { %v4966_v9 = vld [vmem:[%s6691_s1] sm:$0xff]  }
0x18ff   : > { %v3504_v45 = vpop.f32.mrb[84].mxu0 }
0x1900   : > { %v3511_v10 = vmul.f32 0.35355338, %v3504_v45  ;;  %v4779_v11 = vpop.f32.mrb[85].mxu0  ;;  %v4967_v45 = vld [vmem:[%s6692_s2 + $0x8] sm:$0xff]  }
0x1901   : > { %v3507_v12 = vpop.f32.mrb[86].mxu0  ;;  %v4969_v11 = vld [vmem:[%s6020_s30 + $0x8] sm:$0xff]  }
0x1902   : > { %v4780_v13 = vpop.f32.mrb[87].mxu0  ;;  %v3515_v29 = vsel %vm2691_vm6, %v3511_v10, -inf }
0x1903   : > { %3516 = vmax.xlane.f32.xlu1 %v3515_v29 }
0x1914   : > { %3584 = vrot.lane.b32.xlu1 %v6341_v58, %s5472_s11 }
0x1949   : > { %v3526_v20 = vpop.xlane.xlu0 %3525 }
0x1990   : > { %v3517_v14 = vpop.xlane.xlu1 %3516 }
0x1991   : > { %v3519_v15 = vsub.f32 %v3511_v10, %v3517_v14  ;;  %v4968_v10 = vld [vmem:[%s6020_s30] sm:$0xff]  }
0x1993   : > { %v3522_v16 = vmul.f32 1.442695, %v3519_v15 }
0x1994   : > { %v3585_v2 = vpop.permute.xlu1 %3584 }
0x1995   : > { %5034 = vpow2.f32 %v3522_v16  ;;  %v3590_v17 = vsel %vm2719_vm5, %v3585_v2, 0  ;;  %v3723_v2 = vsub.s32 1, %v6296_v63 }
0x1996   : > { %4788 = vmatpush3.bf16.msra.mxu0 %v3590_v17  ;;  %5036 = vrcp.f32 %v3526_v20 }
0x1997   : > { %4799 = vmatprep.subr.bf16.mxu0 %v5468_v3  ;;  %v3724_v17 = vrot.slane %v6300_v1, %v3723_v2  ;;  %v4971_v1 = vld [vmem:[%s6020_s30 + $0x18] sm:$0xff]  }
0x199f   : > { %v5035_v8 = vpop.eup %5034 }
0x19a0   : > { %v3527_v18 = vsel %vm2691_vm6, %v5035_v8, 0.0  ;;  %v5037_v58 = vpop.eup %5036 }
0x19a1   : > { %3528 = vadd.xlane.f32.xlu0 %v3527_v18  ;;  %v3532_v22 = vmul.f32 %v5037_v58, %v5033_v61 }
0x19a3   : > { %v3534_v26 = vpack.c.bf16 %v3532_v22, %v3532_v22  ;;  %v3730_v22 = vrot.slane %v6304_v4, %v3723_v2 }
0x19b7   : > { %3536 = vrot.lane.b32.xlu0 %v6339_v47, %s5472_s11 }
0x1a2e   : > { %v3529_v21 = vpop.xlane.xlu0 %3528 }
0x1a2f   : > { %5038 = vrcp.f32 %v3529_v21 }
0x1a32   : > { %v3537_v23 = vpop.permute.xlu0 %3536 }
0x1a33   : > { %v3542_v25 = vsel %vm2719_vm5, %v3537_v23, 0 }
0x1a34   : > { %4782 = vmatpush3.bf16.msra.mxu1 %v3542_v25 }
0x1a35   : > { %4793 = vmatprep.subr.bf16.mxu1 %v5468_v3 }
0x1a37   : > { %4784 = vmatmul.mubr.msk.bf16.vlgmr.msra.gmra.mrb[84].mxu1 %vm2691_vm6, %v3534_v26 }
0x1a38   : > { %4795 = vmatprep.mubr.msk.bf16.mxu1 %vm5469_vm1, %v5468_v3  ;;  %4794 = vmatpush3.bf16.msra.mxu1 %v3639_v31 }
0x1a39   : > { %v5039_v47 = vpop.eup %5038  ;;  %4807 = vmatprep.subr.bf16.mxu1 %v5468_v3 }
0x1a3a   : > { %v3533_v27 = vmul.f32 %v5039_v47, %v5035_v8 }
0x1a3c   : > { %v3535_v28 = vpack.c.bf16 %v3533_v27, %v3533_v27  ;;  %v4970_v27 = vld [vmem:[%s6020_s30 + $0x10] sm:$0xff]  }
0x1a3e   : > { %4790 = vmatmul.mubr.msk.bf16.vlgmr.msra.gmra.mrb[88].mxu0 %vm2691_vm6, %v3535_v28  ;;  %v4384_v28 = vld [vmem:[%s6693_s28] ss:$0 sm:$0xff] }
0x1a3f   : > { %4803 = vmatprep.mubr.msk.bf16.mxu0 %vm5469_vm1, %v5468_v3  ;;  %4800 = vmatpush3.bf16.msra.mxu0 %v4966_v9 }
0x1a40   : > { %4801 = vmatprep.subr.bf16.mxu0 %v5468_v3 }
0x1a43   : > { %4802 = vmatpush3.bf16.msra.mxu0 %v4967_v45 }
0x1b0a   : > { %v3578_v35 = vpop.f32.mrb[84].mxu1 }
0x1b0b   : > { %v4785_v36 = vpop.f32.mrb[85].mxu1 }
0x1b0c   : > { %v3581_v37 = vpop.f32.mrb[86].mxu1 }
0x1b0d   : > { %v4786_v38 = vpop.f32.mrb[87].mxu1 }
0x1b11   : > { %v3626_v6 = vpop.f32.mrb[88].mxu0 }
0x1b12   : > { %v3632_v41 = vpack.c.bf16 %v3626_v6, %v3578_v35  ;;  %v4791_v42 = vpop.f32.mrb[89].mxu0 }
0x1b13   : > { %v3629_v43 = vpop.f32.mrb[90].mxu0  ;;  %v4388_v42 = vld [vmem:[%s6694_s3] ss:$0 sm:$0xff] }
0x1b14   : > { %v4792_v44 = vpop.f32.mrb[91].mxu0  ;;  %4796 = vmatmul.mubr.msk.bf16.vlgmr.msra.gmra.mrb[88].mxu1 %vm1212_vm3, %v3632_v41 }
0x1b15   : > { %4815 = vmatprep.mubr.msk.bf16.mxu1 %vm5469_vm1, %v5468_v3  ;;  %4808 = vmatpush3.bf16.msra.mxu1 %v4968_v10  ;;  %v5051_v10 = vld [vmem:[%s6040_s29] sm:$0x7] }
0x1b16   : > { %4809 = vmatprep.subr.bf16.mxu1 %v5468_v3 }
0x1b19   : > { %4810 = vmatpush3.bf16.msra.mxu1 %v4969_v11 }
0x1b1a   : > { %4811 = vmatprep.subr.bf16.mxu1 %v5468_v3 }
0x1b1d   : > { %4812 = vmatpush3.bf16.msra.mxu1 %v4970_v27 }
0x1b1e   : > { %4813 = vmatprep.subr.bf16.mxu1 %v5468_v3 }
0x1b21   : > { %4814 = vmatpush3.bf16.msra.mxu1 %v4971_v1 }
0x1be7   : > { %v3675_v7 = vpop.f32.mrb[88].mxu1 }
0x1be8   : > { %v3682_v48 = vadd.f32 %v3675_v7, %v3408_v39  ;;  %v4797_v19 = vpop.f32.mrb[89].mxu1 }
0x1be9   : > { %v3678_v24 = vpop.f32.mrb[90].mxu1 }
0x1bea   : > { %v3691_v50 = vadd.f32 %v4383_v46, %v3682_v48  ;;  %v3683_v34 = vadd.f32 %v3678_v24, %v3409_v33  ;;  %v4798_v51 = vpop.f32.mrb[91].mxu1 }
0x1bec   : > { %v3692_v52 = vadd.f32 %v4383_v46, %v3683_v34  ;;  %v3693_v54 = vadd.f32 %v5048_v53, %v3691_v50 }
0x1bee   : > { %v3695_v55 = vsel %vm1029_vm2, %v3693_v54, 0.0  ;;  %v3694_v57 = vadd.f32 %v5049_v56, %v3692_v52 }
0x1bef   : > { %3696 = vadd.xlane.f32.xlu1 %v3695_v55 }
0x1bf0   : > { %v3698_v49 = vsel %vm1029_vm2, %v3694_v57, 0.0 }
0x1bf1   : > { %3699 = vadd.xlane.f32.xlu0 %v3698_v49 }
0x1c7c   : > { %v3697_v59 = vpop.xlane.xlu1 %3696 }
0x1c7d   : > { %v3701_v60 = vmul.f32 0.03125, %v3697_v59 }
0x1c7e   : > { %v3700_v40 = vpop.xlane.xlu0 %3699 }
0x1c7f   : > { %v3703_v61 = vsub.f32 %v3693_v54, %v3701_v60  ;;  %v3702_v62 = vmul.f32 0.03125, %v3700_v40 }
0x1c81   : > { %v3704_v0 = vsub.f32 %v3694_v57, %v3702_v62  ;;  %v3705_v39 = vmul.f32 %v3703_v61, %v3703_v61 }
0x1c83   : > { %v3707_v5 = vsel %vm1029_vm2, %v3705_v39, 0.0  ;;  %v3706_v32 = vmul.f32 %v3704_v0, %v3704_v0 }
0x1c84   : > { %3708 = vadd.xlane.f32.xlu0 %v3707_v5 }
0x1c85   : > { %v3710_v33 = vsel %vm1029_vm2, %v3706_v32, 0.0  ;;  %v3918_v32 = vsub.s32 2, %v6296_v63 }
0x1c86   : > { %3711 = vadd.xlane.f32.xlu1 %v3710_v33  ;;  %v5050_v33 = vld [vmem:[%s6035_s13] sm:$0x7] }
0x1c87   : > { %v3919_v9 = vrot.slane %v5050_v33, %v3918_v32  ;;  %v3925_v11 = vrot.slane %v5051_v10, %v3918_v32 }
0x1d11   : > { %v3709_v12 = vpop.xlane.xlu0 %3708 }
0x1d12   : > { %v3713_v13 = vmul.f32 0.03125, %v3709_v12 }
0x1d13   : > { %v3712_v29 = vpop.xlane.xlu1 %3711 }
0x1d14   : > { %v3715_v14 = vadd.f32 1e-05, %v3713_v13  ;;  %v3714_v15 = vmul.f32 0.03125, %v3712_v29 }
0x1d16   : > { %5040 = vrsqrt.f32 %v3715_v14  ;;  %v3716_v16 = vadd.f32 1e-05, %v3714_v15 }
0x1d18   : > { %5042 = vrsqrt.f32 %v3716_v16 }
0x1d20   : > { %v5041_v8 = vpop.eup %5040 }
0x1d21   : > { %v3719_v18 = vmul.f32 %v5041_v8, %v3703_v61 }
0x1d22   : > { %v5043_v20 = vpop.eup %5042 }
0x1d23   : > { %v3725_v58 = vmul.f32 %v3724_v17, %v3719_v18  ;;  %v3720_v21 = vmul.f32 %v5043_v20, %v3704_v0 }
0x1d25   : > { %v3726_v23 = vmul.f32 %v3724_v17, %v3720_v21  ;;  %v3731_v25 = vadd.f32 %v3730_v22, %v3725_v58 }
0x1d27   : > { %v3732_v26 = vadd.f32 %v3730_v22, %v3726_v23 }
0x1d29   : > { %v3733_v47 = vpack.c.bf16 %v3732_v26, %v3731_v25 }
0x1d2b   : > { %4804 = vmatmul.mubr.msk.bf16.vlgmr.msra.gmra.mrb[92].mxu0 %vm1029_vm2, %v3733_v47 }
0x1dfe   : > { %v3794_v30 = vpop.f32.mrb[92].mxu0 }
0x1dff   : > { %v3795_v31 = vadd.f32 %v4384_v28, %v3794_v30  ;;  %v4805_v35 = vpop.f32.mrb[93].mxu0 }
0x1e00   : > { %v3797_v36 = vpop.f32.mrb[94].mxu0 }
0x1e01   : > { %v3798_v4 = vadd.f32 %v4384_v28, %v3797_v36  ;;  %v4806_v37 = vpop.f32.mrb[95].mxu0  ;;  %v3801_v38 = vmax.f32 %v3795_v31, 0.0 }
0x1e03   : > { %v3802_v6 = vmax.f32 %v3798_v4, 0.0 }
0x1e05   : > { %v3803_v41 = vpack.c.bf16 %v3802_v6, %v3801_v38 }
0x1e07   : > { %4816 = vmatmul.mubr.msk.bf16.vlgmr.msra.gmra.mrb[92].mxu1 %vm3843_vm7, %v3803_v41 }
0x1eda   : > { %v3881_v43 = vpop.f32.mrb[92].mxu1 }
0x1edb   : > { %v3882_v44 = vadd.f32 %v4388_v42, %v3881_v43  ;;  %v4817_v3 = vpop.f32.mrb[93].mxu1 }
0x1edc   : > { %v3884_v7 = vpop.f32.mrb[94].mxu1 }
0x1edd   : > { %v3885_v46 = vadd.f32 %v4388_v42, %v3884_v7  ;;  %v4818_v48 = vpop.f32.mrb[95].mxu1  ;;  %v3888_v19 = vadd.f32 %v3882_v44, %v3731_v25 }
0x1edf   : > { %v3890_v24 = vsel %vm1029_vm2, %v3888_v19, 0.0  ;;  %v3889_v50 = vadd.f32 %v3885_v46, %v3732_v26 }
0x1ee0   : > { %3891 = vadd.xlane.f32.xlu0 %v3890_v24 }
0x1ee1   : > { %v3893_v34 = vsel %vm1029_vm2, %v3889_v50, 0.0 }
0x1ee2   : > { %3894 = vadd.xlane.f32.xlu1 %v3893_v34 }
0x1f6d   : > { %v3892_v51 = vpop.xlane.xlu0 %3891 }
0x1f6e   : > { %v3896_v52 = vmul.f32 0.03125, %v3892_v51 }
0x1f6f   : > { %v3895_v53 = vpop.xlane.xlu1 %3894 }
0x1f70   : > { %v3898_v54 = vsub.f32 %v3888_v19, %v3896_v52  ;;  %v3897_v55 = vmul.f32 0.03125, %v3895_v53 }
0x1f72   : > { %v3899_v56 = vsub.f32 %v3889_v50, %v3897_v55  ;;  %v3900_v57 = vmul.f32 %v3898_v54, %v3898_v54 }
0x1f74   : > { %v3902_v49 = vsel %vm1029_vm2, %v3900_v57, 0.0  ;;  %v3901_v59 = vmul.f32 %v3899_v56, %v3899_v56 }
0x1f75   : > { %3903 = vadd.xlane.f32.xlu0 %v3902_v49 }
0x1f76   : > { %v3905_v60 = vsel %vm1029_vm2, %v3901_v59, 0.0 }
0x1f77   : > { %3906 = vadd.xlane.f32.xlu1 %v3905_v60 }
0x2002   : > { %v3904_v40 = vpop.xlane.xlu0 %3903 }
0x2003   : > { %v3908_v61 = vmul.f32 0.03125, %v3904_v40 }
0x2004   : > { %v3907_v62 = vpop.xlane.xlu1 %3906 }
0x2005   : > { %v3910_v0 = vadd.f32 1e-05, %v3908_v61  ;;  %v3909_v39 = vmul.f32 0.03125, %v3907_v62 }
0x2007   : > { %5044 = vrsqrt.f32 %v3910_v0  ;;  %v3911_v5 = vadd.f32 1e-05, %v3909_v39 }
0x2009   : > { %5046 = vrsqrt.f32 %v3911_v5 }
0x2011   : > { %v5045_v45 = vpop.eup %5044 }
0x2012   : > { %v3914_v12 = vmul.f32 %v5045_v45, %v3898_v54 }
0x2013   : > { %v5047_v13 = vpop.eup %5046 }
0x2014   : > { %v3920_v29 = vmul.f32 %v3919_v9, %v3914_v12  ;;  %v3915_v14 = vmul.f32 %v5047_v13, %v3899_v56  ;;  %3933 = sbr.rel (%p4394_p2) target bundleno = 8219 (0x201b), region = 132 }
0x2016   : > { %v3926_v15 = vadd.f32 %v3925_v11, %v3920_v29  ;;  %v3921_v16 = vmul.f32 %v3919_v9, %v3915_v14 }
0x2018   : > { %3928 = vst.msk [vmem:[#allocation2] sm:$0xff] %vm1029_vm2, %v3926_v15  ;;  %v3927_v2 = vadd.f32 %v3925_v11, %v3921_v16  ;;  %3934 = vst.msk [vmem:[#allocation20] sm:$0xff] (!%p4394_p2), %vm1029_vm2, %v3926_v15 }
0x201a   : > { %3929 = vst.msk [vmem:[#allocation2 + $0x8] sm:$0xff] %vm1029_vm2, %v3927_v2  ;;  %3935 = vst.msk [vmem:[#allocation20 + $0x8] sm:$0xff] (!%p4394_p2), %vm1029_vm2, %v3927_v2 }
0x201b PF: > { %p4886_p0 = scmp.eq.s32.totalorder %s5775_s8, 1  ;;  %s5473_s13 = smov [#allocation20]  }
0x201c   : > { %s3945_s23 = sshll.u32 %s5473_s13, 4  ;;  %s3946_s23 = int_to_ptr.vmem [resolvable:$true] %s3945_s23 }
0x201d   : > { %s5350_s30 = scalar_lea.vmem %s3946_s23, 256  ;;  %p5357_p4 = scmp.lt.s32.totalorder %s3946_s23, %s3946_s23 }
0x201e   : > { %p5351_p1 = scmp.ne.s32.totalorder %s3946_s23, %s5350_s30  ;;  %p5358_p10 = scmp.lt.s32.totalorder %s5350_s30, %s5350_s30 }
0x2020   : > { %p5352_p6 = pnand %p5351_p1, %p4886_p0  ;;  %p5359_p13 = por %p5358_p10, %p5357_p4 }
0x2022   : > { %p5353_p5 = pneg %p5352_p6 }
0x2024   : > { %p5360_p8 = pnand %p5359_p13, %p5353_p5 }
0x2026   : > { %5363 = shalt.err (!%p5360_p8)
}
0x2027   : > { %s6695_s0 = sld [smem:[#allocation48_spill]] }
0x202d   : > { %s5364_s14 = scalar_lea.hbm %s6695_s0, 256 }
0x202e   : > { %p5365_p11 = scmp.ne.s32.totalorder %s6695_s0, %s5364_s14  ;;  %p5370_p3 = scmp.lt.u32.totalorder %s5364_s14, %s6695_s0 }
0x2030   : > { %p5366_p9 = pnand %p5365_p11, %p4886_p0 }
0x2032   : > { %p5367_p12 = pneg %p5366_p9 }
0x2034   : > { %p5372_p7 = pnand %p5370_p3, %p5367_p12 }
0x2036   : > { %5375 = shalt.err (!%p5372_p7)
}
0x2037   : > { %s5474_s11 = smov 128   ;;  %s5475_s17 = smov 8  }
0x2038   : > { %4848 = dma.vmem_to_hbm [thread:$0]  (%p4886_p0), %s3946_s23, 256, %s6695_s0, [#allocation5], %s5474_s11, %s5474_s11, %s5475_s17  }
0x2039   : > { %5425 = dma.done.wait (%p4886_p0), [#allocation5], 256  }
0x203a   : > { %5427 = vsyncadd (%p4886_p0), [#allocation5], 4294967040 }
0x203b PF: > { %s6696_s26 = sld [smem:[#allocation29_spill]]  ;;  %s6697_s12 = sld [smem:[#allocation28_spill]] }
0x203c   : > { %s6698_s23 = sld [smem:[#allocation31_spill]]  ;;  %s6699_s18 = sld [smem:[#allocation30_spill]] }
0x203d   : > { %s6700_s21 = smov %s5434_s22  ;;  %s6702_s24 = smov %s5446_s25 }
0x2041   : > { %s43_s26 = sadd.s32 1, %s6696_s26   ;;  %s6701_s22 = smov %s6697_s12 }
0x2042   : > { %p40_p2 = scmp.ge.s32.totalorder %s43_s26, 4   ;;  %s6703_s25 = smov %s6699_s18 }
0x2044   :  { %42 = sbr.rel (!%p40_p2) target bundleno = 32 (0x20), region = 264 }
0x204b   :  { %3961 = vsyncpa [#allocation4], 1 }
0x204c   :  { %3963 = vsyncpa [#allocation4 + $0x1], 1 }
0x204d   :  { %3964 = vsyncpa [#allocation7], 1 }
0x204e   :  { %3966 = vsyncpa [#allocation7 + $0x1], 1 }
0x204f   :  { %3967 = vsyncpa [#allocation10], 1 }
0x2050   :  { %3969 = vsyncpa [#allocation10 + $0x1], 1 }
0x2051   :  { %3970 = vsyncpa [#allocation13], 1 }
0x2052   :  { %3972 = vsyncpa [#allocation13 + $0x1], 1 }
0x2053   :  { %3973 = vsyncpa [#allocation16], 1 }
0x2054   :  { %3975 = vsyncpa [#allocation16 + $0x1], 1 }
0x2055   :  { %3976 = vsyncpa [#allocation19], 1 }
0x2056   :  { %3978 = vsyncpa [#allocation19 + $0x1], 1 }
0x2057   :  { %3979 = vsyncpa [#allocation5], 1 }
0x2058   :  { %3981 = vsyncpa [#allocation5 + $0x1], 1 }

</bundles_post_ra>
